<compile_context>
chip_gen: v5e
topology: v5e:2x2
jax: 0.10.0
libtpu: 0.0.40
codegen_flags: <defaults>
</compile_context>

<pallas_src>
import jax
import jax.numpy as jnp
from jax.experimental import pallas as pl
from jax.experimental.pallas import tpu as pltpu


def _ae_kernel(x_ref,
               w1_ref, b1_ref, w2_ref, b2_ref,
               w3_ref, b3_ref, w4_ref, b4_ref,
               out_ref):
    """Fused autoencoder forward on one batch tile: dec(enc(x)).

    Matmul operands are bf16 (MXU-native), accumulation is f32; bias adds and
    ReLUs run in f32 on the VPU, then results are cast back to bf16 for the
    next MXU stage.  The f32->bf16 cast of x happens here (free under MXU).
    """
    x = x_ref[...].astype(jnp.bfloat16)                            # f32 tile -> bf16

    # ----- encoder -----
    h = jnp.dot(x, w1_ref[...], preferred_element_type=jnp.float32) + b1_ref[...]
    h = jnp.maximum(h, 0.0).astype(jnp.bfloat16)                   # ReLU -> bf16
    z = jnp.dot(h, w2_ref[...], preferred_element_type=jnp.float32) + b2_ref[...]
    z = z.astype(jnp.bfloat16)                                     # latent -> bf16

    # ----- decoder -----
    g = jnp.dot(z, w3_ref[...], preferred_element_type=jnp.float32) + b3_ref[...]
    g = jnp.maximum(g, 0.0).astype(jnp.bfloat16)                   # ReLU -> bf16
    y = jnp.dot(g, w4_ref[...], preferred_element_type=jnp.float32) + b4_ref[...]

    out_ref[...] = y.astype(out_ref.dtype)                         # bf16 out


def _round_up(n, m):
    return ((n + m - 1) // m) * m


def _cdiv(a, b):
    return -(-a // b)


def _choose_tile_b(batch, tile_b):
    """Batch-tile size: multiple of 256 (16 for tiny batches), derived from
    cdiv(B, n_steps) so padding never adds a near-whole dead tile."""
    if batch <= 256:
        return _round_up(batch, 16)
    tile_b = max(256, _round_up(tile_b, 256))
    if batch <= tile_b:
        return _round_up(batch, 256)
    n_steps = _cdiv(batch, tile_b)
    return _round_up(_cdiv(batch, n_steps), 256)


def _scoped_vmem_limit():
    """Physical VMEM minus 16 MiB headroom, capped at 96 MiB.
    -> ~48 MiB on v7x (64 MiB/TC), 96 MiB on v5e/v6e (128 MiB)."""
    phys = 64 * 1024 * 1024  # conservative fallback = v7x per-TC VMEM
    try:
        phys = int(pltpu.get_tpu_info().vmem_capacity_bytes)
    except Exception:
        pass
    return max(16 * 1024 * 1024, min(phys - 16 * 1024 * 1024, 96 * 1024 * 1024))


def basic_ae_forward(x, params, *, tile_b=512, out_dtype=jnp.bfloat16):
    """Fused BasicAe forward as a single batch-tiled pallas_call.

    x: [B, D] float32
    params: dict of w1,b1,w2,b2,w3,b3,w4,b4 (weights [in,out], biases [1,out]).
            Weights may already be bf16 (preferred: cast once via prepare_params).
    """
    B, D = x.shape
    H = params["w1"].shape[1]
    L = params["w2"].shape[1]

    # --- batch tiling ---
    TB = _choose_tile_b(B, tile_b)
    B_pad = _round_up(B, TB)
    x_in = x if B_pad == B else jnp.pad(x, ((0, B_pad - B), (0, 0)))

    # bf16 matmul operands (no-op if already pre-cast); biases stay f32.
    w1 = params["w1"].astype(jnp.bfloat16)
    w2 = params["w2"].astype(jnp.bfloat16)
    w3 = params["w3"].astype(jnp.bfloat16)
    w4 = params["w4"].astype(jnp.bfloat16)
    b1, b2, b3, b4 = params["b1"], params["b2"], params["b3"], params["b4"]

    operands = (x_in, w1, b1, w2, b2, w3, b3, w4, b4)

    # Weights / biases: full-array blocks with a constant index map -> DMA'd once,
    # VMEM-resident across the whole grid; x/out tiles get double-buffered DMA.
    # TODO(synk): on v7x, single-buffer the resident params with
    # pipeline_mode=pl.Buffered(1) once validated on the target jax build.
    def resident_spec(a):
        nd = a.ndim
        return pl.BlockSpec(a.shape, lambda i, _nd=nd: (0,) * _nd)

    in_specs = [pl.BlockSpec((TB, D), lambda i: (i, 0))] + \
               [resident_spec(a) for a in operands[1:]]
    out_spec = pl.BlockSpec((TB, D), lambda i: (i, 0))

    grid = (B_pad // TB,)

    # Advisory cost estimate (4 matmuls; f32 x read, bf16 weights, bf16 out write).
    flops = 2 * B_pad * (D * H + H * L + L * H + H * D)
    bytes_accessed = (
        x_in.size * 4
        + (w1.size + w2.size + w3.size + w4.size) * 2
        + (b1.size + b2.size + b3.size + b4.size) * 4
        + B_pad * D * jnp.dtype(out_dtype).itemsize
    )
    cost = pl.CostEstimate(flops=flops, transcendentals=0,
                           bytes_accessed=bytes_accessed)

    out = pl.pallas_call(
        _ae_kernel,
        out_shape=jax.ShapeDtypeStruct((B_pad, D), out_dtype),
        grid=grid,
        in_specs=in_specs,
        out_specs=out_spec,
        cost_estimate=cost,
        compiler_params=pltpu.CompilerParams(
            # Batch tiles are independent -> shard across TCs on v7x megacore.
            dimension_semantics=("parallel",),
            vmem_limit_bytes=_scoped_vmem_limit(),
        ),
    )(*operands)

    return out[:B] if B_pad != B else out


def init_params(key, d_in, hidden, latent):
    """Deterministic synthetic parameters (no checkpoint loading)."""
    ks = jax.random.split(key, 8)

    def lin(kw, kb, fan_in, fan_out):
        bound = 1.0 / jnp.sqrt(fan_in)
        w = jax.random.uniform(kw, (fan_in, fan_out), jnp.float32, -bound, bound)
        b = jax.random.uniform(kb, (1, fan_out), jnp.float32, -bound, bound)
        return w, b

    w1, b1 = lin(ks[0], ks[1], d_in, hidden)
    w2, b2 = lin(ks[2], ks[3], hidden, latent)
    w3, b3 = lin(ks[4], ks[5], latent, hidden)
    w4, b4 = lin(ks[6], ks[7], hidden, d_in)
    return dict(w1=w1, b1=b1, w2=w2, b2=b2, w3=w3, b3=b3, w4=w4, b4=b4)


def prepare_params(params):
    """One-time bf16 cast of the matmul weights (outside the hot loop)."""
    out = dict(params)
    for k in ("w1", "w2", "w3", "w4"):
        out[k] = params[k].astype(jnp.bfloat16)
    return out


def reference_forward(x, p):
    """Pure-JAX reference with the same bf16-matmul / f32-accumulate numerics."""
    bf = lambda a: a.astype(jnp.bfloat16)
    h = jnp.dot(bf(x), bf(p["w1"]), preferred_element_type=jnp.float32) + p["b1"]
    h = jnp.maximum(h, 0.0)
    z = jnp.dot(bf(h), bf(p["w2"]), preferred_element_type=jnp.float32) + p["b2"]
    g = jnp.dot(bf(z), bf(p["w3"]), preferred_element_type=jnp.float32) + p["b3"]
    g = jnp.maximum(g, 0.0)
    return jnp.dot(bf(g), bf(p["w4"]), preferred_element_type=jnp.float32) + p["b4"]


if __name__ == "__main__":
    key = jax.random.PRNGKey(0)
    k_x, k_p = jax.random.split(key)

    # MXU-aligned feature dims (multiples of 256 fill the v6e/v7x 256-wide MXU).
    # B=2048 with TB=256 -> 8 grid steps, so each v7x TensorCore gets >= 4
    # pipelined steps; on v5e/v6e all 8 steps pipeline on the single core.
    B, D, H, L = 2048, 256, 256, 256     # batch, input dim, hidden, latent
    x = jax.random.normal(k_x, (B, D), dtype=jnp.float32)
    params = prepare_params(init_params(k_p, D, H, L))

    fwd = jax.jit(basic_ae_forward, static_argnames=("tile_b", "out_dtype"))
    out = jax.block_until_ready(fwd(x, params, tile_b=256))

    ref = reference_forward(x, params)
    assert out.shape == (B, D) and out.dtype == jnp.bfloat16
    assert jnp.allclose(out.astype(jnp.float32), ref, atol=2e-2, rtol=2e-2), \
        "mismatch vs reference"

    print("KERNEL_OK")
</pallas_src>

<mosaic_0001>
module attributes {stable_mosaic.version = 11 : i64} {
  func.func @_ae_kernel(%arg0: i32, %arg1: memref<256x256xf32, #tpu.memory_space<vmem>>, %arg2: memref<256x256xbf16, #tpu.memory_space<vmem>>, %arg3: memref<1x256xf32, #tpu.memory_space<vmem>>, %arg4: memref<256x256xbf16, #tpu.memory_space<vmem>>, %arg5: memref<1x256xf32, #tpu.memory_space<vmem>>, %arg6: memref<256x256xbf16, #tpu.memory_space<vmem>>, %arg7: memref<1x256xf32, #tpu.memory_space<vmem>>, %arg8: memref<256x256xbf16, #tpu.memory_space<vmem>>, %arg9: memref<1x256xf32, #tpu.memory_space<vmem>>, %arg10: memref<256x256xbf16, #tpu.memory_space<vmem>>) attributes {dimension_semantics = [#tpu.dimension_semantics<parallel>], iteration_bounds = array<i64: 8>, scalar_prefetch = 0 : i64, scratch_operands = 0 : i64, tpu.core_type = #tpu.core_type<tc>, window_params = [{transform_indices = @transform_0, window_bounds = array<i64: 256, 256>}, {pipeline_mode = #tpu.pipeline_mode<synchronous>, transform_indices = @transform_1, window_bounds = array<i64: 256, 256>}, {pipeline_mode = #tpu.pipeline_mode<synchronous>, transform_indices = @transform_2, window_bounds = array<i64: 1, 256>}, {pipeline_mode = #tpu.pipeline_mode<synchronous>, transform_indices = @transform_3, window_bounds = array<i64: 256, 256>}, {pipeline_mode = #tpu.pipeline_mode<synchronous>, transform_indices = @transform_4, window_bounds = array<i64: 1, 256>}, {pipeline_mode = #tpu.pipeline_mode<synchronous>, transform_indices = @transform_5, window_bounds = array<i64: 256, 256>}, {pipeline_mode = #tpu.pipeline_mode<synchronous>, transform_indices = @transform_6, window_bounds = array<i64: 1, 256>}, {pipeline_mode = #tpu.pipeline_mode<synchronous>, transform_indices = @transform_7, window_bounds = array<i64: 256, 256>}, {pipeline_mode = #tpu.pipeline_mode<synchronous>, transform_indices = @transform_8, window_bounds = array<i64: 1, 256>}, {transform_indices = @transform_9, window_bounds = array<i64: 256, 256>}]} {
    %c0 = arith.constant 0 : index
    %c0_0 = arith.constant 0 : index
    %0 = vector.load %arg1[%c0, %c0_0] : memref<256x256xf32, #tpu.memory_space<vmem>>, vector<256x256xf32>
    %1 = arith.truncf %0 : vector<256x256xf32> to vector<256x256xbf16>
    %c0_1 = arith.constant 0 : index
    %c0_2 = arith.constant 0 : index
    %2 = vector.load %arg2[%c0_1, %c0_2] : memref<256x256xbf16, #tpu.memory_space<vmem>>, vector<256x256xbf16>
    %cst = arith.constant dense<0.000000e+00> : vector<256x256xf32>
    %3 = tpu.matmul %1, %2, %cst {dimension_numbers = #tpu.dot_dimension_numbers<[1], [0], [0], [1], [0, 0, 1, 1], [], []>} : vector<256x256xbf16>, vector<256x256xbf16>, vector<256x256xf32> -> vector<256x256xf32>
    %c0_3 = arith.constant 0 : index
    %c0_4 = arith.constant 0 : index
    %4 = vector.load %arg3[%c0_3, %c0_4] : memref<1x256xf32, #tpu.memory_space<vmem>>, vector<1x256xf32>
    %5 = vector.broadcast %4 : vector<1x256xf32> to vector<256x256xf32>
    %6 = arith.addf %3, %5 : vector<256x256xf32>
    %cst_5 = arith.constant 0.000000e+00 : f32
    %7 = vector.broadcast %cst_5 : f32 to vector<256x256xf32>
    %8 = arith.maximumf %6, %7 : vector<256x256xf32>
    %9 = arith.truncf %8 : vector<256x256xf32> to vector<256x256xbf16>
    %c0_6 = arith.constant 0 : index
    %c0_7 = arith.constant 0 : index
    %10 = vector.load %arg4[%c0_6, %c0_7] : memref<256x256xbf16, #tpu.memory_space<vmem>>, vector<256x256xbf16>
    %cst_8 = arith.constant dense<0.000000e+00> : vector<256x256xf32>
    %11 = tpu.matmul %9, %10, %cst_8 {dimension_numbers = #tpu.dot_dimension_numbers<[1], [0], [0], [1], [0, 0, 1, 1], [], []>} : vector<256x256xbf16>, vector<256x256xbf16>, vector<256x256xf32> -> vector<256x256xf32>
    %c0_9 = arith.constant 0 : index
    %c0_10 = arith.constant 0 : index
    %12 = vector.load %arg5[%c0_9, %c0_10] : memref<1x256xf32, #tpu.memory_space<vmem>>, vector<1x256xf32>
    %13 = vector.broadcast %12 : vector<1x256xf32> to vector<256x256xf32>
    %14 = arith.addf %11, %13 : vector<256x256xf32>
    %15 = arith.truncf %14 : vector<256x256xf32> to vector<256x256xbf16>
    %c0_11 = arith.constant 0 : index
    %c0_12 = arith.constant 0 : index
    %16 = vector.load %arg6[%c0_11, %c0_12] : memref<256x256xbf16, #tpu.memory_space<vmem>>, vector<256x256xbf16>
    %cst_13 = arith.constant dense<0.000000e+00> : vector<256x256xf32>
    %17 = tpu.matmul %15, %16, %cst_13 {dimension_numbers = #tpu.dot_dimension_numbers<[1], [0], [0], [1], [0, 0, 1, 1], [], []>} : vector<256x256xbf16>, vector<256x256xbf16>, vector<256x256xf32> -> vector<256x256xf32>
    %c0_14 = arith.constant 0 : index
    %c0_15 = arith.constant 0 : index
    %18 = vector.load %arg7[%c0_14, %c0_15] : memref<1x256xf32, #tpu.memory_space<vmem>>, vector<1x256xf32>
    %19 = vector.broadcast %18 : vector<1x256xf32> to vector<256x256xf32>
    %20 = arith.addf %17, %19 : vector<256x256xf32>
    %cst_16 = arith.constant 0.000000e+00 : f32
    %21 = vector.broadcast %cst_16 : f32 to vector<256x256xf32>
    %22 = arith.maximumf %20, %21 : vector<256x256xf32>
    %23 = arith.truncf %22 : vector<256x256xf32> to vector<256x256xbf16>
    %c0_17 = arith.constant 0 : index
    %c0_18 = arith.constant 0 : index
    %24 = vector.load %arg8[%c0_17, %c0_18] : memref<256x256xbf16, #tpu.memory_space<vmem>>, vector<256x256xbf16>
    %cst_19 = arith.constant dense<0.000000e+00> : vector<256x256xf32>
    %25 = tpu.matmul %23, %24, %cst_19 {dimension_numbers = #tpu.dot_dimension_numbers<[1], [0], [0], [1], [0, 0, 1, 1], [], []>} : vector<256x256xbf16>, vector<256x256xbf16>, vector<256x256xf32> -> vector<256x256xf32>
    %c0_20 = arith.constant 0 : index
    %c0_21 = arith.constant 0 : index
    %26 = vector.load %arg9[%c0_20, %c0_21] : memref<1x256xf32, #tpu.memory_space<vmem>>, vector<1x256xf32>
    %27 = vector.broadcast %26 : vector<1x256xf32> to vector<256x256xf32>
    %28 = arith.addf %25, %27 : vector<256x256xf32>
    %29 = arith.truncf %28 : vector<256x256xf32> to vector<256x256xbf16>
    %c0_22 = arith.constant 0 : index
    %c0_23 = arith.constant 0 : index
    %30 = vector.load %arg10[%c0_22, %c0_23] : memref<256x256xbf16, #tpu.memory_space<vmem>>, vector<256x256xbf16>
    tpu.vector_store %arg10[%c0_22, %c0_23], %29 {strides = array<i32>} : memref<256x256xbf16, #tpu.memory_space<vmem>>, vector<256x256xbf16>,
    return
  }
  func.func @transform_0(%arg0: i32) -> (i32, i32) {
    %c0_i32 = arith.constant 0 : i32
    %c0_i32_0 = arith.constant 0 : i32
    return %arg0, %c0_i32 : i32, i32
  }
  func.func @transform_1(%arg0: i32) -> (i32, i32) {
    %c0_i32 = arith.constant 0 : i32
    %c0_i32_0 = arith.constant 0 : i32
    %c0_i32_1 = arith.constant 0 : i32
    return %c0_i32, %c0_i32_0 : i32, i32
  }
  func.func @transform_2(%arg0: i32) -> (i32, i32) {
    %c0_i32 = arith.constant 0 : i32
    %c0_i32_0 = arith.constant 0 : i32
    %c0_i32_1 = arith.constant 0 : i32
    return %c0_i32, %c0_i32_0 : i32, i32
  }
  func.func @transform_3(%arg0: i32) -> (i32, i32) {
    %c0_i32 = arith.constant 0 : i32
    %c0_i32_0 = arith.constant 0 : i32
    %c0_i32_1 = arith.constant 0 : i32
    return %c0_i32, %c0_i32_0 : i32, i32
  }
  func.func @transform_4(%arg0: i32) -> (i32, i32) {
    %c0_i32 = arith.constant 0 : i32
    %c0_i32_0 = arith.constant 0 : i32
    %c0_i32_1 = arith.constant 0 : i32
    return %c0_i32, %c0_i32_0 : i32, i32
  }
  func.func @transform_5(%arg0: i32) -> (i32, i32) {
    %c0_i32 = arith.constant 0 : i32
    %c0_i32_0 = arith.constant 0 : i32
    %c0_i32_1 = arith.constant 0 : i32
    return %c0_i32, %c0_i32_0 : i32, i32
  }
  func.func @transform_6(%arg0: i32) -> (i32, i32) {
    %c0_i32 = arith.constant 0 : i32
    %c0_i32_0 = arith.constant 0 : i32
    %c0_i32_1 = arith.constant 0 : i32
    return %c0_i32, %c0_i32_0 : i32, i32
  }
  func.func @transform_7(%arg0: i32) -> (i32, i32) {
    %c0_i32 = arith.constant 0 : i32
    %c0_i32_0 = arith.constant 0 : i32
    %c0_i32_1 = arith.constant 0 : i32
    return %c0_i32, %c0_i32_0 : i32, i32
  }
  func.func @transform_8(%arg0: i32) -> (i32, i32) {
    %c0_i32 = arith.constant 0 : i32
    %c0_i32_0 = arith.constant 0 : i32
    %c0_i32_1 = arith.constant 0 : i32
    return %c0_i32, %c0_i32_0 : i32, i32
  }
  func.func @transform_9(%arg0: i32) -> (i32, i32) {
    %c0_i32 = arith.constant 0 : i32
    %c0_i32_0 = arith.constant 0 : i32
    return %arg0, %c0_i32 : i32, i32
  }
}

</mosaic_0001>

<bundles_post_ra>
// kernel: basic_ae_forward.1
= control target key start
LH: loop header
LB: loop body
LE: loop exit
PB: predicated region body
PF: predicated region fallthrough
CT: control target
= control target key end

     0   :  { %s5424_s0 = inlined_call_operand.hbm [shape: f32[2048,256], index: 0, kind: input, shape index: {}]   ;;  %s5425_s1 = inlined_call_operand.hbm [shape: bf16[256,256], index: 1, kind: input, shape index: {}]   ;;  %s5426_s2 = inlined_call_operand.hbm [shape: f32[1,256], index: 2, kind: input, shape index: {}]   ;;  %s5427_s3 = inlined_call_operand.hbm [shape: bf16[256,256], index: 3, kind: input, shape index: {}]   ;;  %s5428_s4 = inlined_call_operand.hbm [shape: f32[1,256], index: 4, kind: input, shape index: {}]   ;;  %s5429_s5 = inlined_call_operand.hbm [shape: bf16[256,256], index: 5, kind: input, shape index: {}]   ;;  %s5430_s6 = inlined_call_operand.hbm [shape: f32[1,256], index: 6, kind: input, shape index: {}]   ;;  %s5431_s7 = inlined_call_operand.hbm [shape: bf16[256,256], index: 7, kind: input, shape index: {}]   ;;  %s5432_s8 = inlined_call_operand.hbm [shape: f32[1,256], index: 8, kind: input, shape index: {}]   ;;  %s5433_s9 = inlined_call_operand.hbm [shape: bf16[2048,256], index: 9, kind: output, shape index: {}]  }
   0x1   :  { %5434 = sst [smem:[#allocation24_spill]] %s5425_s1 }
   0x2   :  { %5435 = sst [smem:[#allocation25_spill]] %s5426_s2 }
   0x3   :  { %5436 = sst [smem:[#allocation26_spill]] %s5427_s3 }
   0x4   :  { %5437 = sst [smem:[#allocation27_spill]] %s5428_s4 }
   0x5   :  { %14 = vsyncpa [#allocation3], 0 }
   0x6   :  { %16 = vsyncpa [#allocation3 + $0x1], 0 }
   0x7   :  { %17 = vsyncpa [#allocation6], 0 }
   0x8   :  { %18 = vsyncpa [#allocation9], 0 }
   0x9   :  { %19 = vsyncpa [#allocation12], 0 }
   0xa   :  { %20 = vsyncpa [#allocation15], 0 }
   0xb   :  { %21 = vsyncpa [#allocation4], 0 }
   0xc   :  { %23 = vsyncpa [#allocation4 + $0x1], 0  ;;  %s4473_s30 = smov 0   ;;  %s4475_s10 = smov 0  }
   0xd   :  { %s4477_s11 = smov 0   ;;  %s4479_s12 = smov 0  }
   0xe LB: > { %s5438_s1 = sld [smem:[#allocation24_spill]]  ;;  %s4497_s16 = sadd.s32 4294967295, %s4407_s12   ;;  %s4407_s12 = sphi %s4479_s12, %s5452_s12   ;;  %s4403_s11 = sphi %s4477_s11, %s5451_s11   ;;  %s4399_s10 = sphi %s4475_s10, %s5450_s10   ;;  %s4395_s30 = sphi %s4473_s30, %s5449_s30  }
   0xf   : > { %p3247_p0 = scmp.ge.s32.totalorder %s4407_s12, 1  ;;  %p50_p1 = scmp.eq.s32.totalorder %s4497_s16, 0 }
  0x10   : > { %p254_p2 = scmp.lt.s32.totalorder %s4407_s12, 9  ;;  %s4409_s18 = smov [#allocation5]  }
  0x11   : > { %s267_s19 = sshll.u32 %s4409_s18, 4  ;;  %s5440_s3 = sld [smem:[#allocation26_spill]]  ;;  %s268_s19 = int_to_ptr.vmem [resolvable:$true] %s267_s19 }
  0x12   : > { %p4502_p3 = pnand %p3247_p0, %p254_p2  ;;  %s317_s26 = sshll.u32 %s5429_s5, 4  ;;  %s318_s26 = int_to_ptr.hbm [resolvable:$true] %s317_s26 }
  0x13   : > { %s4410_s27 = smov [#allocation8]   ;;  %s4411_s29 = smov 128  }
  0x14   : > { %s265_s15 = sshll.u32 %s5438_s1, 4  ;;  %p3958_p4 = pneg %p4502_p3  ;;  %s266_s15 = int_to_ptr.hbm [resolvable:$true] %s265_s15 }
  0x15   : > { %s293_s28 = sshll.u32 %s4410_s27, 4  ;;  %s4412_s13 = smov 8   ;;  %s294_s28 = int_to_ptr.vmem [resolvable:$true] %s293_s28 }
  0x16   : > { %p4513_p5 = pnand %p3958_p4, %p50_p1  ;;  %s343_s20 = sshll.u32 %s5431_s7, 4  ;;  %s344_s20 = int_to_ptr.hbm [resolvable:$true] %s343_s20 }
  0x17   : > { %s291_s22 = sshll.u32 %s5440_s3, 4  ;;  %s4413_s21 = smov [#allocation11]   ;;  %s292_s22 = int_to_ptr.hbm [resolvable:$true] %s291_s22 }
  0x18   : > { %3961 = dma.hbm_to_vmem [thread:$0]  (!%p4513_p5), %s266_s15, 4096, %s268_s19, [#allocation6], %s4411_s29, %s4411_s29, %s4412_s13  }
  0x19   : > { %3967 = dma.hbm_to_vmem [thread:$0]  (!%p4513_p5), %s292_s22, 4096, %s294_s28, [#allocation9], %s4411_s29, %s4411_s29, %s4412_s13  }
  0x1a   : > { %s319_s1 = sshll.u32 %s4413_s21, 4  ;;  %s4414_s24 = smov [#allocation14]   ;;  %s320_s1 = int_to_ptr.vmem [resolvable:$true] %s319_s1 }
  0x1b   : > { %3973 = dma.hbm_to_vmem [thread:$0]  (!%p4513_p5), %s318_s26, 4096, %s320_s1, [#allocation12], %s4411_s29, %s4411_s29, %s4412_s13  }
  0x1c   : > { %s345_s25 = sshll.u32 %s4414_s24, 4  ;;  %s5442_s2 = sld [smem:[#allocation25_spill]]  ;;  %s346_s25 = int_to_ptr.vmem [resolvable:$true] %s345_s25 }
  0x1d   : > { %3979 = dma.hbm_to_vmem [thread:$0]  (!%p4513_p5), %s344_s20, 4096, %s346_s25, [#allocation15], %s4411_s29, %s4411_s29, %s4412_s13  }
  0x1e   : > { %s5443_s4 = sld [smem:[#allocation27_spill]]  ;;  %s4415_s14 = smov [#allocation7]  }
  0x1f   : > { %s282_s18 = sshll.u32 %s4415_s14, 4  ;;  %s4416_s1 = smov [#allocation10]   ;;  %s283_s18 = int_to_ptr.vmem [resolvable:$true] %s282_s18 }
  0x20   : > { %s308_s3 = sshll.u32 %s4416_s1, 4  ;;  %s332_s29 = sshll.u32 %s5430_s6, 4  ;;  %s309_s3 = int_to_ptr.vmem [resolvable:$true] %s308_s3  ;;  %s333_s29 = int_to_ptr.hbm [resolvable:$true] %s332_s29 }
  0x21   : > { %s358_s24 = sshll.u32 %s5432_s8, 4  ;;  %s4417_s25 = smov [#allocation13]   ;;  %s359_s24 = int_to_ptr.hbm [resolvable:$true] %s358_s24 }
  0x22   : > { %s280_s15 = sshll.u32 %s5442_s2, 4  ;;  %s334_s27 = sshll.u32 %s4417_s25, 4  ;;  %s281_s15 = int_to_ptr.hbm [resolvable:$true] %s280_s15  ;;  %s335_s27 = int_to_ptr.vmem [resolvable:$true] %s334_s27 }
  0x23   : > { %3964 = dma.hbm_to_vmem [thread:$0]  (!%p4513_p5), %s281_s15, 32, %s283_s18, [#allocation6]  }
  0x24   : > { %s306_s28 = sshll.u32 %s5443_s4, 4  ;;  %s4418_s15 = smov [#allocation16]   ;;  %s307_s28 = int_to_ptr.hbm [resolvable:$true] %s306_s28 }
  0x25   : > { %3970 = dma.hbm_to_vmem [thread:$0]  (!%p4513_p5), %s307_s28, 32, %s309_s3, [#allocation9]  }
  0x26   : > { %3976 = dma.hbm_to_vmem [thread:$0]  (!%p4513_p5), %s333_s29, 32, %s335_s27, [#allocation12]  }
  0x27   : > { %s360_s19 = sshll.u32 %s4418_s15, 4  ;;  %s3246_s22 = sadd.s32 4294967294, %s4407_s12   ;;  %s361_s19 = int_to_ptr.vmem [resolvable:$true] %s360_s19 }
  0x28   : > { %3982 = dma.hbm_to_vmem [thread:$0]  (!%p4513_p5), %s359_s24, 32, %s361_s19, [#allocation15]  }
  0x29   : > { %s4553_s28 = sadd.s32 1, %s4407_s12   ;;  %s36_s18 = sadd.s32 1, %s4403_s11 }
  0x2a   : > { %s33_s14 = ssub.s32 %s4407_s12, %s4553_s28  ;;  %p43_p7 = scmp.ne.s32.totalorder %s4403_s11, %s4399_s10 }
  0x2b   : > { %p34_p6 = scmp.eq.s32.totalorder %s33_s14, 0  ;;  %p44_p8 = scmp.eq.s32.totalorder %s4407_s12, 0 }
  0x2c   : > { %p49_p9 = scmp.ne.s32.totalorder %s4399_s10, %s4395_s30  ;;  %p241_p12 = scmp.eq.s32.totalorder %s4497_s16, 7 }
  0x2d   : > { %s4564_s1 = scalar_select %p34_p6, %s4403_s11, %s36_s18  }
  0x2e   : > { %p4566_p10 = por %p44_p8, %p43_p7  ;;  %p4572_p11 = por %p50_p1, %p49_p9 }
  0x2f   : > { %p247_p13 = scmp.eq.s32.totalorder %s3246_s22, 7  ;;  %p3999_p0 = scmp.lt.s32.totalorder %s4407_s12, 8 }
  0x30   : > { %s371_s26 = sand.u32 1, %s4403_s11   ;;  %p4579_p2 = por %p241_p12, %p43_p7 }
  0x31   : > { %p4583_p4 = por %p247_p13, %p49_p9  ;;  %s3257_s13 = sshll.u32 %s371_s26, 9 }
  0x32   : > { %s3791_s20 = sshll.u32 %s4407_s12, 9  ;;  %s375_s15 = scalar_lea.vmem [#allocation2], %s3257_s13 }
  0x33   : > { %s381_s27 = scalar_lea.hbm %s5424_s0, %s3791_s20  ;;  %s384_s19 = sshll.u32 %s375_s15, 4  ;;  %s385_s19 = int_to_ptr.vmem [resolvable:$true] %s384_s19 }
  0x34   : > { %s382_s14 = sshll.u32 %s381_s27, 4  ;;  %p4593_p5 = pnand %p3999_p0, %p4566_p10  ;;  %s383_s14 = int_to_ptr.hbm [resolvable:$true] %s382_s14 }
  0x35   : > { %s372_s18 = scalar_lea.sflag [#allocation3], %s371_s26  ;;  %s4295_s2 = sshra.s32 %s383_s14, 4  ;;  %s4296_s2 = int_to_ptr.hbm [resolvable:$true] %s4295_s2 }
  0x36   : > { %s4297_s4 = scalar_lea.hbm %s4296_s2, 512  ;;  %p4299_p7 = pneg %p4593_p5 }
  0x37   : > { %p4298_p6 = scmp.ne.s32.totalorder %s4296_s2, %s4297_s4  ;;  %s4302_s24 = scalar_lea.hbm %s5424_s0, 4096 }
  0x38   : > { %p4303_p10 = scmp.lt.s32.totalorder %s4296_s2, %s5424_s0  ;;  %p4304_p12 = scmp.lt.s32.totalorder %s4302_s24, %s4297_s4 }
  0x39   : > { %p4300_p8 = pnand %p4299_p7, %p4298_p6 }
  0x3a   : > { %p4305_p13 = por %p4304_p12, %p4303_p10 }
  0x3b   : > { %p4301_p9 = pneg %p4300_p8 }
  0x3d   : > { %p4306_p0 = pnand %p4305_p13, %p4301_p9 }
  0x3f   : > { %4309 = shalt.err (!%p4306_p0)
}
  0x40   : > { %s4419_s26 = smov 256   ;;  %s4420_s27 = smov 16  }
  0x41   : > { %3986 = dma.hbm_to_vmem [thread:$0]  (!%p4593_p5), %s383_s14, 8192, %s385_s19, %s372_s18, %s4419_s26, %s4419_s26, %s4420_s27  }
  0x42   : > { %396 = sbr.rel (%p4502_p3) target bundleno = 1274 (0x4fa), region = 56  ;;  %s4610_s15 = sand.u32 (!%p4502_p3), 1, %s4399_s10  }
  0x43   : > { %s3262_s13 = sshll.u32 (!%p4502_p3), %s4610_s15, 9  ;;  %s399_s2 = scalar_lea.sflag (!%p4502_p3), [#allocation3], %s4610_s15 }
  0x44   : > { %s4614_s4 = scalar_lea.vmem (!%p4502_p3), [#allocation2], %s3262_s13 }
  0x47   : > { %4370 = dma.done.wait (%p4572_p11), %s399_s2, 8192  }
  0x48   : > { %4372 = vsyncadd (%p4572_p11), %s399_s2, 4294959104 }
  0x49   : > { %4374 = dma.done.wait (%p50_p1), [#allocation6], 4128  }
  0x4a   : > { %4376 = vsyncadd (%p50_p1), [#allocation6], 4294963168 }
  0x4b   : > { %4378 = dma.done.wait (%p50_p1), [#allocation9], 4128  }
  0x4c   : > { %4380 = vsyncadd (%p50_p1), [#allocation9], 4294963168 }
  0x4d   : > { %4382 = dma.done.wait (%p50_p1), [#allocation12], 4128  }
  0x4e   : > { %4384 = vsyncadd (%p50_p1), [#allocation12], 4294963168 }
  0x4f   : > { %4386 = dma.done.wait (%p50_p1), [#allocation15], 4128  }
  0x50   : > { %4388 = vsyncadd (%p50_p1), [#allocation15], 4294963168  ;;  %v3330_v0 = vld [vmem:[#allocation5 + $0x70] sm:$0xf]  ;;  %v3807_v1 = vld [vmem:[#allocation5 + $0x74] sm:$0xf0] }
  0x51   : > { %v3394_v2 = vld [vmem:[#allocation5 + $0xf0] sm:$0xf]  ;;  %v3331_v3 = vor.u32 %v3807_v1, %v3330_v0  ;;  %v3823_v4 = vld [vmem:[#allocation5 + $0xf4] sm:$0xf0]  ;;  %v3806_v5 = vld [vmem:[#allocation5 + $0x74] sm:$0xf] }
  0x52   : > { %v3332_v6 = vld [vmem:[#allocation5 + $0x78] sm:$0xf0]  ;;  %v3395_v7 = vor.u32 %v3823_v4, %v3394_v2  ;;  %v3822_v9 = vld [vmem:[#allocation5 + $0xf4] sm:$0xf]  ;;  %v3322_v11 = vld [vmem:[#allocation5 + $0x60] sm:$0xf] }
  0x53   : > { %v3335_v8 = vor.u32 %v3806_v5, %v3332_v6  ;;  %v3396_v10 = vld [vmem:[#allocation5 + $0xf8] sm:$0xf0]  ;;  %774 = vmatpush.bf16.msra.mxu0 %v3331_v3  ;;  %v3805_v13 = vld [vmem:[#allocation5 + $0x64] sm:$0xf0]  ;;  %v3386_v14 = vld [vmem:[#allocation5 + $0xe0] sm:$0xf] }
  0x54   : > { %v3399_v12 = vor.u32 %v3822_v9, %v3396_v10  ;;  %v3821_v15 = vld [vmem:[#allocation5 + $0xe4] sm:$0xf0]  ;;  %863 = vmatpush.bf16.msra.mxu1 %v3395_v7  ;;  %v3323_v16 = vor.u32 %v3805_v13, %v3322_v11  ;;  %v3804_v18 = vld [vmem:[#allocation5 + $0x64] sm:$0xf]  ;;  %v3324_v19 = vld [vmem:[#allocation5 + $0x68] sm:$0xf0] }
  0x55   : > { %952 = vmatpush.bf16.msra.mxu2 %v3335_v8  ;;  %v3387_v17 = vor.u32 %v3821_v15, %v3386_v14  ;;  %v3820_v20 = vld [vmem:[#allocation5 + $0xe4] sm:$0xf]  ;;  %v3327_v21 = vor.u32 %v3804_v18, %v3324_v19  ;;  %v3388_v22 = vld [vmem:[#allocation5 + $0xe8] sm:$0xf0]  ;;  %v3314_v23 = vld [vmem:[#allocation5 + $0x50] sm:$0xf] }
  0x56   : > { %1041 = vmatpush.bf16.msra.mxu3 %v3399_v12  ;;  %v3803_v24 = vld [vmem:[#allocation5 + $0x54] sm:$0xf0]  ;;  %v3391_v25 = vor.u32 %v3820_v20, %v3388_v22  ;;  %v3378_v26 = vld [vmem:[#allocation5 + $0xd0] sm:$0xf]  ;;  %v3802_v28 = vld [vmem:[#allocation5 + $0x54] sm:$0xf] }
  0x57   : > { %v3819_v27 = vld [vmem:[#allocation5 + $0xd4] sm:$0xf0]  ;;  %775 = vmatpush.bf16.msra.mxu0 %v3323_v16  ;;  %v3315_v29 = vor.u32 %v3803_v24, %v3314_v23  ;;  %v3316_v30 = vld [vmem:[#allocation5 + $0x58] sm:$0xf0]  ;;  %v3818_v31 = vld [vmem:[#allocation5 + $0xd4] sm:$0xf] }
  0x58   : > { %v3380_v32 = vld [vmem:[#allocation5 + $0xd8] sm:$0xf0]  ;;  %864 = vmatpush.bf16.msra.mxu1 %v3387_v17  ;;  %v3379_v33 = vor.u32 %v3819_v27, %v3378_v26  ;;  %v3319_v34 = vor.u32 %v3802_v28, %v3316_v30  ;;  %v3306_v35 = vld [vmem:[#allocation5 + $0x40] sm:$0xf]  ;;  %v3801_v36 = vld [vmem:[#allocation5 + $0x44] sm:$0xf0] }
  0x59   : > { %953 = vmatpush.bf16.msra.mxu2 %v3327_v21  ;;  %v3370_v37 = vld [vmem:[#allocation5 + $0xc0] sm:$0xf]  ;;  %v3383_v38 = vor.u32 %v3818_v31, %v3380_v32  ;;  %v3817_v39 = vld [vmem:[#allocation5 + $0xc4] sm:$0xf0]  ;;  %v3800_v40 = vld [vmem:[#allocation5 + $0x44] sm:$0xf]  ;;  %v3307_v44 = vor.u32 %v3801_v36, %v3306_v35 }
  0x5a   : > { %1042 = vmatpush.bf16.msra.mxu3 %v3391_v25  ;;  %v3308_v41 = vld [vmem:[#allocation5 + $0x48] sm:$0xf0]  ;;  %v3816_v42 = vld [vmem:[#allocation5 + $0xc4] sm:$0xf]  ;;  %v3371_v45 = vor.u32 %v3817_v39, %v3370_v37  ;;  %v3298_v47 = vld [vmem:[#allocation5 + $0x30] sm:$0xf] }
  0x5b   : > { %v3372_v43 = vld [vmem:[#allocation5 + $0xc8] sm:$0xf0]  ;;  %776 = vmatpush.bf16.msra.mxu0 %v3315_v29  ;;  %v3311_v46 = vor.u32 %v3800_v40, %v3308_v41  ;;  %v3799_v48 = vld [vmem:[#allocation5 + $0x34] sm:$0xf0]  ;;  %v3362_v49 = vld [vmem:[#allocation5 + $0xb0] sm:$0xf] }
  0x5c   : > { %865 = vmatpush.bf16.msra.mxu1 %v3379_v33  ;;  %v3375_v50 = vor.u32 %v3816_v42, %v3372_v43  ;;  %v3815_v51 = vld [vmem:[#allocation5 + $0xb4] sm:$0xf0]  ;;  %v3798_v52 = vld [vmem:[#allocation5 + $0x34] sm:$0xf]  ;;  %v3300_v53 = vld [vmem:[#allocation5 + $0x38] sm:$0xf0]  ;;  %v3299_v56 = vor.u32 %v3799_v48, %v3298_v47 }
  0x5d   : > { %954 = vmatpush.bf16.msra.mxu2 %v3319_v34  ;;  %v3814_v54 = vld [vmem:[#allocation5 + $0xb4] sm:$0xf]  ;;  %v3364_v55 = vld [vmem:[#allocation5 + $0xb8] sm:$0xf0]  ;;  %v3363_v57 = vor.u32 %v3815_v51, %v3362_v49  ;;  %v3303_v58 = vor.u32 %v3798_v52, %v3300_v53  ;;  %v3290_v59 = vld [vmem:[#allocation5 + $0x20] sm:$0xf] }
  0x5e   : > { %1043 = vmatpush.bf16.msra.mxu3 %v3383_v38  ;;  %v3797_v60 = vld [vmem:[#allocation5 + $0x24] sm:$0xf0]  ;;  %v3354_v61 = vld [vmem:[#allocation5 + $0xa0] sm:$0xf]  ;;  %v3367_v62 = vor.u32 %v3814_v54, %v3364_v55  ;;  %v3796_v0 = vld [vmem:[#allocation5 + $0x24] sm:$0xf] }
  0x5f   : > { %777 = vmatpush.bf16.msra.mxu0 %v3307_v44  ;;  %v3813_v63 = vld [vmem:[#allocation5 + $0xa4] sm:$0xf0]  ;;  %v3292_v1 = vld [vmem:[#allocation5 + $0x28] sm:$0xf0]  ;;  %v3812_v2 = vld [vmem:[#allocation5 + $0xa4] sm:$0xf]  ;;  %v3291_v4 = vor.u32 %v3797_v60, %v3290_v59 }
  0x60   : > { %866 = vmatpush.bf16.msra.mxu1 %v3371_v45  ;;  %v3356_v3 = vld [vmem:[#allocation5 + $0xa8] sm:$0xf0]  ;;  %v3355_v5 = vor.u32 %v3813_v63, %v3354_v61  ;;  %v3295_v6 = vor.u32 %v3796_v0, %v3292_v1  ;;  %v3282_v7 = vld [vmem:[#allocation5 + $0x10] sm:$0xf]  ;;  %v3795_v8 = vld [vmem:[#allocation5 + $0x14] sm:$0xf0] }
  0x61   : > { %955 = vmatpush.bf16.msra.mxu2 %v3311_v46  ;;  %v3346_v9 = vld [vmem:[#allocation5 + $0x90] sm:$0xf]  ;;  %v3359_v10 = vor.u32 %v3812_v2, %v3356_v3  ;;  %v3811_v11 = vld [vmem:[#allocation5 + $0x94] sm:$0xf0]  ;;  %v3794_v12 = vld [vmem:[#allocation5 + $0x14] sm:$0xf]  ;;  %v3283_v16 = vor.u32 %v3795_v8, %v3282_v7 }
  0x62   : > { %1044 = vmatpush.bf16.msra.mxu3 %v3375_v50  ;;  %v3284_v13 = vld [vmem:[#allocation5 + $0x18] sm:$0xf0]  ;;  %v3810_v14 = vld [vmem:[#allocation5 + $0x94] sm:$0xf]  ;;  %v3274_v17 = vld [vmem:[#allocation5] sm:$0xf]  ;;  %v3347_v19 = vor.u32 %v3811_v11, %v3346_v9 }
  0x63   : > { %778 = vmatpush.bf16.msra.mxu0 %v3299_v56  ;;  %v3348_v15 = vld [vmem:[#allocation5 + $0x98] sm:$0xf0]  ;;  %v3793_v18 = vld [vmem:[#allocation5 + $0x4] sm:$0xf0]  ;;  %v3287_v20 = vor.u32 %v3794_v12, %v3284_v13  ;;  %v3338_v21 = vld [vmem:[#allocation5 + $0x80] sm:$0xf] }
  0x64   : > { %867 = vmatpush.bf16.msra.mxu1 %v3363_v57  ;;  %v3809_v22 = vld [vmem:[#allocation5 + $0x84] sm:$0xf0]  ;;  %v3792_v23 = vld [vmem:[#allocation5 + $0x4] sm:$0xf]  ;;  %v3351_v24 = vor.u32 %v3810_v14, %v3348_v15  ;;  %v3276_v25 = vld [vmem:[#allocation5 + $0x8] sm:$0xf0]  ;;  %v3275_v31 = vor.u32 %v3793_v18, %v3274_v17 }
  0x65   : > { %956 = vmatpush.bf16.msra.mxu2 %v3303_v58  ;;  %v3808_v26 = vld [vmem:[#allocation5 + $0x84] sm:$0xf]  ;;  %v3340_v27 = vld [vmem:[#allocation5 + $0x88] sm:$0xf0]  ;;  %v3838_v29 = vld [vmem:[#allocation8 + $0x74] sm:$0xf]  ;;  %v3339_v35 = vor.u32 %v3809_v22, %v3338_v21  ;;  %v3279_v36 = vor.u32 %v3792_v23, %v3276_v25 }
  0x66   : > { %1045 = vmatpush.bf16.msra.mxu3 %v3367_v62  ;;  %v480_v28 = vld [vmem:[%s4614_s4] sm:$0xff]  ;;  %v482_v32 = vld [vmem:[%s4614_s4 + $0x10] sm:$0xff]  ;;  %v481_v37 = vld [vmem:[%s4614_s4 + $0x8] sm:$0xff]  ;;  %v3343_v39 = vor.u32 %v3808_v26, %v3340_v27  ;;  %s3271_s17 = sshll.u32 %s4610_s15, 8  ;;  %s3921_s19 = sshll.u32 %s4497_s16, 8 }
  0x67   : > { %779 = vmatpush.bf16.msra.mxu0 %v3291_v4  ;;  %v3460_v30 = vld [vmem:[#allocation8 + $0x78] sm:$0xf0]  ;;  %v3854_v33 = vld [vmem:[#allocation8 + $0xf4] sm:$0xf]  ;;  %v3458_v41 = vld [vmem:[#allocation8 + $0x70] sm:$0xf]  ;;  %v544_v43 = vpack.c.bf16 %v482_v32, %v480_v28  ;;  %s3093_s18 = scalar_lea.hbm %s5433_s9, %s3921_s19 }
  0x68   : > { %868 = vmatpush.bf16.msra.mxu1 %v3355_v5  ;;  %v3524_v34 = vld [vmem:[#allocation8 + $0xf8] sm:$0xf0]  ;;  %v3463_v40 = vor.u32 %v3838_v29, %v3460_v30  ;;  %v3839_v42 = vld [vmem:[#allocation8 + $0x74] sm:$0xf0]  ;;  %v3522_v45 = vld [vmem:[#allocation8 + $0xf0] sm:$0xf] }
  0x69   : > { %957 = vmatpush.bf16.msra.mxu2 %v3295_v6  ;;  %v483_v38 = vld [vmem:[%s4614_s4 + $0x18] sm:$0xff]  ;;  %v3527_v44 = vor.u32 %v3854_v33, %v3524_v34  ;;  %v3459_v48 = vor.u32 %v3839_v42, %v3458_v41  ;;  %v3836_v50 = vld [vmem:[#allocation8 + $0x64] sm:$0xf]  ;;  %v3452_v51 = vld [vmem:[#allocation8 + $0x68] sm:$0xf0]  ;;  %s5267_s23 = scalar_lea.vmem [#allocation17], %s3271_s17 }
  0x6a   : > { %1046 = vmatpush.bf16.msra.mxu3 %v3359_v10  ;;  %v3855_v46 = vld [vmem:[#allocation8 + $0xf4] sm:$0xf0]  ;;  %v545_v47 = vpack.c.bf16 %v483_v38, %v481_v37  ;;  %v3852_v52 = vld [vmem:[#allocation8 + $0xe4] sm:$0xf]  ;;  %v3455_v53 = vor.u32 %v3836_v50, %v3452_v51  ;;  %v3516_v54 = vld [vmem:[#allocation8 + $0xe8] sm:$0xf0] }
  0x6b   : > { %780 = vmatpush.bf16.msra.mxu0 %v3283_v16  ;;  %v3523_v49 = vor.u32 %v3855_v46, %v3522_v45  ;;  %v3450_v55 = vld [vmem:[#allocation8 + $0x60] sm:$0xf]  ;;  %v3837_v56 = vld [vmem:[#allocation8 + $0x64] sm:$0xf0]  ;;  %v3519_v57 = vor.u32 %v3852_v52, %v3516_v54  ;;  %v486_v63 = vld [vmem:[%s4614_s4 + $0x30] sm:$0xff]  ;;  %s3094_s20 = sshll.u32 %s5267_s23, 4  ;;  %s3095_s20 = int_to_ptr.vmem [resolvable:$true] %s3094_s20 }
  0x6c   : > { %869 = vmatpush.bf16.msra.mxu1 %v3347_v19  ;;  %v3451_v58 = vor.u32 %v3837_v56, %v3450_v55  ;;  %v3514_v59 = vld [vmem:[#allocation8 + $0xe0] sm:$0xf]  ;;  %v3853_v60 = vld [vmem:[#allocation8 + $0xe4] sm:$0xf0]  ;;  %v487_v1 = vld [vmem:[%s4614_s4 + $0x38] sm:$0xff]  ;;  %s3096_s24 = sshll.u32 %s3093_s18, 4  ;;  %s3097_s24 = int_to_ptr.hbm [resolvable:$true] %s3096_s24 }
  0x6d   : > { %958 = vmatpush.bf16.msra.mxu2 %v3287_v20  ;;  %v3515_v61 = vor.u32 %v3853_v60, %v3514_v59  ;;  %v484_v62 = vld [vmem:[%s4614_s4 + $0x20] sm:$0xff]  ;;  %v485_v0 = vld [vmem:[%s4614_s4 + $0x28] sm:$0xff]  ;;  %v490_v5 = vld [vmem:[%s4614_s4 + $0x50] sm:$0xff]  ;;  %s3081_s16 = scalar_lea.sflag [#allocation4], %s4610_s15  ;;  %s4339_s25 = sshra.s32 %s3097_s24, 4  ;;  %s4340_s25 = int_to_ptr.hbm [resolvable:$true] %s4339_s25 }
  0x6e   : > { %1047 = vmatpush.bf16.msra.mxu3 %v3351_v24  ;;  %v546_v2 = vpack.c.bf16 %v486_v63, %v484_v62  ;;  %v547_v3 = vpack.c.bf16 %v487_v1, %v485_v0  ;;  %v488_v4 = vld [vmem:[%s4614_s4 + $0x40] sm:$0xff]  ;;  %v489_v6 = vld [vmem:[%s4614_s4 + $0x48] sm:$0xff]  ;;  %v491_v7 = vld [vmem:[%s4614_s4 + $0x58] sm:$0xff]  ;;  %s4341_s3 = scalar_lea.hbm %s4340_s25, 256  ;;  %s4345_s13 = scalar_lea.hbm %s5433_s9, 2048 }
  0x6f   : > { %781 = vmatpush.bf16.msra.mxu0 %v3275_v31  ;;  %v548_v8 = vpack.c.bf16 %v490_v5, %v488_v4  ;;  %v549_v9 = vpack.c.bf16 %v491_v7, %v489_v6  ;;  %v3834_v10 = vld [vmem:[#allocation8 + $0x54] sm:$0xf]  ;;  %v3444_v11 = vld [vmem:[#allocation8 + $0x58] sm:$0xf0]  ;;  %v3442_v15 = vld [vmem:[#allocation8 + $0x50] sm:$0xf]  ;;  %p4342_p1 = scmp.ne.s32.totalorder %s4340_s25, %s4341_s3  ;;  %p4346_p5 = scmp.lt.s32.totalorder %s4340_s25, %s5433_s9 }
  0x70   : > { %870 = vmatpush.bf16.msra.mxu1 %v3339_v35  ;;  %v3850_v12 = vld [vmem:[#allocation8 + $0xd4] sm:$0xf]  ;;  %v3447_v13 = vor.u32 %v3834_v10, %v3444_v11  ;;  %v3508_v14 = vld [vmem:[#allocation8 + $0xd8] sm:$0xf0]  ;;  %v3835_v16 = vld [vmem:[#allocation8 + $0x54] sm:$0xf0]  ;;  %p4347_p6 = scmp.lt.s32.totalorder %s4345_s13, %s4341_s3 }
  0x71   : > { %959 = vmatpush.bf16.msra.mxu2 %v3279_v36  ;;  %v3511_v17 = vor.u32 %v3850_v12, %v3508_v14  ;;  %v3443_v18 = vor.u32 %v3835_v16, %v3442_v15  ;;  %v3506_v19 = vld [vmem:[#allocation8 + $0xd0] sm:$0xf]  ;;  %v3851_v20 = vld [vmem:[#allocation8 + $0xd4] sm:$0xf0]  ;;  %v492_v22 = vld [vmem:[%s4614_s4 + $0x60] sm:$0xff]  ;;  %p4343_p3 = pnand %p4342_p1, %p4579_p2 }
  0x72   : > { %1048 = vmatpush.bf16.msra.mxu3 %v3343_v39  ;;  %782 = vmatmul.bf16.vlgmr.msra.gmra.mxu0 %v544_v43  ;;  %v3507_v21 = vor.u32 %v3851_v20, %v3506_v19  ;;  %v494_v23 = vld [vmem:[%s4614_s4 + $0x70] sm:$0xff]  ;;  %v493_v24 = vld [vmem:[%s4614_s4 + $0x68] sm:$0xff]  ;;  %v495_v25 = vld [vmem:[%s4614_s4 + $0x78] sm:$0xff]  ;;  %p4348_p7 = por %p4347_p6, %p4346_p5 }
  0x73   : > { %871 = vmatmul.bf16.vlgmr.msra.gmra.mxu1 %v545_v47  ;;  %1424 = vmatpush.bf16.msrb.mxu0 %v3459_v48  ;;  %v550_v26 = vpack.c.bf16 %v494_v23, %v492_v22  ;;  %v551_v27 = vpack.c.bf16 %v495_v25, %v493_v24  ;;  %v496_v28 = vld [vmem:[%s4614_s4 + $0x80] sm:$0xff]  ;;  %v498_v29 = vld [vmem:[%s4614_s4 + $0x90] sm:$0xff]  ;;  %v497_v30 = vld [vmem:[%s4614_s4 + $0x88] sm:$0xff]  ;;  %p4344_p11 = pneg %p4343_p3 }
  0x74   : > { %960 = vmatmul.bf16.vlgmr.msra.gmra.mxu2 %v544_v43  ;;  %1513 = vmatpush.bf16.msrb.mxu1 %v3523_v49  ;;  %v499_v31 = vld [vmem:[%s4614_s4 + $0x98] sm:$0xff]  ;;  %v552_v32 = vpack.c.bf16 %v498_v29, %v496_v28  ;;  %v3832_v34 = vld [vmem:[#allocation8 + $0x44] sm:$0xf]  ;;  %v3436_v35 = vld [vmem:[#allocation8 + $0x48] sm:$0xf0] }
  0x75   : > { %1602 = vmatpush.bf16.msrb.mxu2 %v3463_v40  ;;  %1049 = vmatmul.bf16.vlgmr.msra.gmra.mxu3 %v545_v47  ;;  %v553_v33 = vpack.c.bf16 %v499_v31, %v497_v30  ;;  %v3848_v36 = vld [vmem:[#allocation8 + $0xc4] sm:$0xf]  ;;  %v3439_v37 = vor.u32 %v3832_v34, %v3436_v35  ;;  %v3500_v38 = vld [vmem:[#allocation8 + $0xc8] sm:$0xf0]  ;;  %v3434_v39 = vld [vmem:[#allocation8 + $0x40] sm:$0xf]  ;;  %p4349_p8 = pnand %p4348_p7, %p4344_p11 }
  0x76   : > { %1691 = vmatpush.bf16.msrb.mxu3 %v3527_v44  ;;  %v3833_v40 = vld [vmem:[#allocation8 + $0x44] sm:$0xf0]  ;;  %v3503_v41 = vor.u32 %v3848_v36, %v3500_v38  ;;  %v3498_v43 = vld [vmem:[#allocation8 + $0xc0] sm:$0xf]  ;;  %v502_v47 = vld [vmem:[%s4614_s4 + $0xb0] sm:$0xff] }
  0x77   : > { %1425 = vmatpush.bf16.msrb.mxu0 %v3451_v58  ;;  %v3435_v42 = vor.u32 %v3833_v40, %v3434_v39  ;;  %v3849_v44 = vld [vmem:[#allocation8 + $0xc4] sm:$0xf0]  ;;  %v500_v46 = vld [vmem:[%s4614_s4 + $0xa0] sm:$0xff]  ;;  %v503_v49 = vld [vmem:[%s4614_s4 + $0xb8] sm:$0xff] }
  0x78   : > { %1514 = vmatpush.bf16.msrb.mxu1 %v3515_v61  ;;  %v3499_v45 = vor.u32 %v3849_v44, %v3498_v43  ;;  %v501_v48 = vld [vmem:[%s4614_s4 + $0xa8] sm:$0xff]  ;;  %v554_v50 = vpack.c.bf16 %v502_v47, %v500_v46  ;;  %v504_v52 = vld [vmem:[%s4614_s4 + $0xc0] sm:$0xff]  ;;  %v507_v55 = vld [vmem:[%s4614_s4 + $0xd8] sm:$0xff] }
  0x79   : > { %1603 = vmatpush.bf16.msrb.mxu2 %v3455_v53  ;;  %v555_v51 = vpack.c.bf16 %v503_v49, %v501_v48  ;;  %v506_v53 = vld [vmem:[%s4614_s4 + $0xd0] sm:$0xff]  ;;  %v505_v54 = vld [vmem:[%s4614_s4 + $0xc8] sm:$0xff]  ;;  %v3428_v59 = vld [vmem:[#allocation8 + $0x38] sm:$0xf0] }
  0x7a   : > { %1692 = vmatpush.bf16.msrb.mxu3 %v3519_v57  ;;  %v556_v56 = vpack.c.bf16 %v506_v53, %v504_v52  ;;  %v557_v57 = vpack.c.bf16 %v507_v55, %v505_v54  ;;  %v3830_v58 = vld [vmem:[#allocation8 + $0x34] sm:$0xf]  ;;  %v3492_v62 = vld [vmem:[#allocation8 + $0xb8] sm:$0xf0]  ;;  %v3426_v5 = vld [vmem:[#allocation8 + $0x30] sm:$0xf] }
  0x7b   : > { %1426 = vmatpush.bf16.msrb.mxu0 %v3443_v18  ;;  %v3846_v60 = vld [vmem:[#allocation8 + $0xb4] sm:$0xf]  ;;  %v3431_v61 = vor.u32 %v3830_v58, %v3428_v59  ;;  %v508_v0 = vld [vmem:[%s4614_s4 + $0xe0] sm:$0xff]  ;;  %v3831_v6 = vld [vmem:[#allocation8 + $0x34] sm:$0xf0] }
  0x7c   : > { %1515 = vmatpush.bf16.msrb.mxu1 %v3507_v21  ;;  %v3495_v63 = vor.u32 %v3846_v60, %v3492_v62  ;;  %v510_v1 = vld [vmem:[%s4614_s4 + $0xf0] sm:$0xff]  ;;  %v3847_v10 = vld [vmem:[#allocation8 + $0xb4] sm:$0xf0]  ;;  %v608_v12 = vld [vmem:[#allocation7] sm:$0x3] }
  0x7d   : > { %1604 = vmatpush.bf16.msrb.mxu2 %v3447_v13  ;;  %v558_v4 = vpack.c.bf16 %v510_v1, %v508_v0  ;;  %v3490_v7 = vld [vmem:[#allocation8 + $0xb0] sm:$0xf]  ;;  %v512_v13 = vld [vmem:[%s4614_s4 + $0x100] sm:$0xff]  ;;  %v4670_v15 = vperm.slane %v608_v12, 0  ;;  %v513_v16 = vld [vmem:[%s4614_s4 + $0x108] sm:$0xff]  ;;  %v4675_v24 = vperm.slane %v608_v12, 1 }
  0x7e   : > { %1693 = vmatpush.bf16.msrb.mxu3 %v3511_v17  ;;  %v3491_v11 = vor.u32 %v3847_v10, %v3490_v7  ;;  %v514_v14 = vld [vmem:[%s4614_s4 + $0x110] sm:$0xff]  ;;  %v515_v17 = vld [vmem:[%s4614_s4 + $0x118] sm:$0xff]  ;;  %v3828_v25 = vld [vmem:[#allocation8 + $0x24] sm:$0xf] }
  0x7f   : > { %1427 = vmatpush.bf16.msrb.mxu0 %v3435_v42  ;;  %v560_v18 = vpack.c.bf16 %v514_v14, %v512_v13  ;;  %v561_v20 = vpack.c.bf16 %v515_v17, %v513_v16  ;;  %v3844_v28 = vld [vmem:[#allocation8 + $0xa4] sm:$0xf]  ;;  %v3484_v29 = vld [vmem:[#allocation8 + $0xa8] sm:$0xf0]  ;;  %v519_v42 = vld [vmem:[%s4614_s4 + $0x138] sm:$0xff] }
  0x80   : > { %1516 = vmatpush.bf16.msrb.mxu1 %v3499_v45  ;;  %v3487_v31 = vor.u32 %v3844_v28, %v3484_v29  ;;  %v516_v39 = vld [vmem:[%s4614_s4 + $0x120] sm:$0xff]  ;;  %v518_v40 = vld [vmem:[%s4614_s4 + $0x130] sm:$0xff]  ;;  %v3829_v46 = vld [vmem:[#allocation8 + $0x24] sm:$0xf0] }
  0x81   : > { %1605 = vmatpush.bf16.msrb.mxu2 %v3439_v37  ;;  %v3418_v45 = vld [vmem:[#allocation8 + $0x20] sm:$0xf]  ;;  %v3845_v49 = vld [vmem:[#allocation8 + $0xa4] sm:$0xf0]  ;;  %v562_v52 = vpack.c.bf16 %v518_v40, %v516_v39  ;;  %v522_v10 = vld [vmem:[%s4614_s4 + $0x150] sm:$0xff] }
  0x82   : > { %787 = vmatmul.bf16.gmra.mxu0 %v546_v2  ;;  %1694 = vmatpush.bf16.msrb.mxu3 %v3503_v41  ;;  %v517_v41 = vld [vmem:[%s4614_s4 + $0x128] sm:$0xff]  ;;  %v3419_v47 = vor.u32 %v3829_v46, %v3418_v45  ;;  %v3482_v48 = vld [vmem:[#allocation8 + $0xa0] sm:$0xf]  ;;  %v523_v14 = vld [vmem:[%s4614_s4 + $0x158] sm:$0xff] }
  0x83   : > { %876 = vmatmul.bf16.gmra.mxu1 %v547_v3  ;;  %v3483_v53 = vor.u32 %v3845_v49, %v3482_v48  ;;  %v521_v13 = vld [vmem:[%s4614_s4 + $0x148] sm:$0xff]  ;;  %v524_v45 = vld [vmem:[%s4614_s4 + $0x160] sm:$0xff]  ;;  %v526_v46 = vld [vmem:[%s4614_s4 + $0x170] sm:$0xff] }
  0x84   : > { %965 = vmatmul.bf16.gmra.mxu2 %v546_v2  ;;  %v509_v2 = vld [vmem:[%s4614_s4 + $0xe8] sm:$0xff]  ;;  %1517 = vmatpush.bf16.msrb.mxu1 %v3491_v11  ;;  %v527_v48 = vld [vmem:[%s4614_s4 + $0x178] sm:$0xff] }
  0x85   : > { %1054 = vmatmul.bf16.gmra.mxu3 %v547_v3  ;;  %1606 = vmatpush.bf16.msrb.mxu2 %v3431_v61  ;;  %v511_v3 = vld [vmem:[%s4614_s4 + $0xf8] sm:$0xff] }
  0x86   : > { %1695 = vmatpush.bf16.msrb.mxu3 %v3495_v63 }
  0x88   : > { %1518 = vmatpush.bf16.msrb.mxu1 %v3483_v53  ;;  %v3827_v53 = vld [vmem:[#allocation8 + $0x14] sm:$0xf0] }
  0x8a   : > { %1696 = vmatpush.bf16.msrb.mxu3 %v3487_v31  ;;  %v3412_v31 = vld [vmem:[#allocation8 + $0x18] sm:$0xf0] }
  0x92   : > { %792 = vmatmul.bf16.gmra.mxu0 %v548_v8 }
  0x93   : > { %881 = vmatmul.bf16.gmra.mxu1 %v549_v9 }
  0x94   : > { %970 = vmatmul.bf16.gmra.mxu2 %v548_v8  ;;  %v559_v8 = vpack.c.bf16 %v511_v3, %v509_v2 }
  0x95   : > { %1059 = vmatmul.bf16.gmra.mxu3 %v549_v9  ;;  %v3427_v9 = vor.u32 %v3831_v6, %v3426_v5 }
  0x97   : > { %1428 = vmatpush.bf16.msrb.mxu0 %v3427_v9  ;;  %v520_v9 = vld [vmem:[%s4614_s4 + $0x140] sm:$0xff] }
  0x98   : > { %v564_v17 = vpack.c.bf16 %v522_v10, %v520_v9 }
  0x9b   : > { %1429 = vmatpush.bf16.msrb.mxu0 %v3419_v47  ;;  %v525_v47 = vld [vmem:[%s4614_s4 + $0x168] sm:$0xff] }
  0xa2   : > { %797 = vmatmul.bf16.gmra.mxu0 %v550_v26 }
  0xa3   : > { %886 = vmatmul.bf16.gmra.mxu1 %v551_v27 }
  0xa4   : > { %975 = vmatmul.bf16.gmra.mxu2 %v550_v26  ;;  %v3420_v26 = vld [vmem:[#allocation8 + $0x28] sm:$0xf0] }
  0xa5   : > { %1064 = vmatmul.bf16.gmra.mxu3 %v551_v27  ;;  %v3423_v27 = vor.u32 %v3828_v25, %v3420_v26 }
  0xa7   : > { %1607 = vmatpush.bf16.msrb.mxu2 %v3423_v27 }
  0xb2   : > { %802 = vmatmul.bf16.gmra.mxu0 %v552_v32 }
  0xb3   : > { %891 = vmatmul.bf16.gmra.mxu1 %v553_v33 }
  0xb4   : > { %980 = vmatmul.bf16.gmra.mxu2 %v552_v32 }
  0xb5   : > { %1069 = vmatmul.bf16.gmra.mxu3 %v553_v33 }
  0xc2   : > { %807 = vmatmul.bf16.gmra.mxu0 %v554_v50 }
  0xc3   : > { %896 = vmatmul.bf16.gmra.mxu1 %v555_v51 }
  0xc4   : > { %985 = vmatmul.bf16.gmra.mxu2 %v554_v50 }
  0xc5   : > { %1074 = vmatmul.bf16.gmra.mxu3 %v555_v51 }
  0xd2   : > { %812 = vmatmul.bf16.gmra.mxu0 %v556_v56 }
  0xd3   : > { %901 = vmatmul.bf16.gmra.mxu1 %v557_v57 }
  0xd4   : > { %990 = vmatmul.bf16.gmra.mxu2 %v556_v56 }
  0xd5   : > { %1079 = vmatmul.bf16.gmra.mxu3 %v557_v57  ;;  %v563_v57 = vpack.c.bf16 %v519_v42, %v517_v41 }
  0xe2   : > { %817 = vmatmul.bf16.gmra.mxu0 %v558_v4 }
  0xe3   : > { %906 = vmatmul.bf16.gmra.mxu1 %v559_v8 }
  0xe4   : > { %995 = vmatmul.bf16.gmra.mxu2 %v558_v4 }
  0xe5   : > { %1084 = vmatmul.bf16.gmra.mxu3 %v559_v8 }
  0xef   : > { %v783_v19 = vpop.f32.mrf.mxu0 }
  0xf0   : > { %v784_v21 = vadd.f32 %v783_v19, %v4670_v15  ;;  %v872_v22 = vpop.f32.mrf.mxu1 }
  0xf2   : > { %v873_v23 = vadd.f32 %v872_v22, %v784_v21  ;;  %822 = vmatmul.bf16.gmra.mxu0 %v560_v18  ;;  %v565_v22 = vpack.c.bf16 %v523_v14, %v521_v13 }
  0xf3   : > { %911 = vmatmul.bf16.gmra.mxu1 %v561_v20 }
  0xf4   : > { %1000 = vmatmul.bf16.gmra.mxu2 %v560_v18  ;;  %v1130_v43 = vmax.f32 %v873_v23, 0.0 }
  0xf5   : > { %1089 = vmatmul.bf16.gmra.mxu3 %v561_v20 }
  0xf7   : > { %v961_v30 = vpop.f32.mrf.mxu2  ;;  %v785_v34 = vpop.f32.mrf.mxu0 }
  0xf8   : > { %v962_v32 = vadd.f32 %v961_v30, %v4675_v24  ;;  %v1050_v33 = vpop.f32.mrf.mxu3  ;;  %v786_v35 = vadd.f32 %v785_v34, %v4670_v15  ;;  %v874_v36 = vpop.f32.mrf.mxu1  ;;  %v3826_v30 = vld [vmem:[#allocation8 + $0x14] sm:$0xf]  ;;  %v3476_v34 = vld [vmem:[#allocation8 + $0x98] sm:$0xf0] }
  0xfa   : > { %v1051_v37 = vadd.f32 %v1050_v33, %v962_v32  ;;  %v875_v38 = vadd.f32 %v874_v36, %v786_v35  ;;  %v3415_v32 = vor.u32 %v3826_v30, %v3412_v31  ;;  %v3842_v33 = vld [vmem:[#allocation8 + $0x94] sm:$0xf] }
  0xfc   : > { %v1132_v44 = vmax.f32 %v875_v38, 0.0  ;;  %v1131_v62 = vmax.f32 %v1051_v37, 0.0  ;;  %v3479_v37 = vor.u32 %v3842_v33, %v3476_v34  ;;  %1608 = vmatpush.bf16.msrb.mxu2 %v3415_v32 }
  0xfe   : > { %v4683_v50 = vpack.c.bf16 %v1132_v44, %v1130_v43  ;;  %1697 = vmatpush.bf16.msrb.mxu3 %v3479_v37 }
  0xff   : > { %v963_v51 = vpop.f32.mrf.mxu2  ;;  %v788_v56 = vpop.f32.mrf.mxu0 }
 0x100   : > { %v964_v54 = vadd.f32 %v963_v51, %v4675_v24  ;;  %v1052_v55 = vpop.f32.mrf.mxu3  ;;  %v789_v58 = vadd.f32 %v788_v56, %v4670_v15  ;;  %v877_v59 = vpop.f32.mrf.mxu1  ;;  %v3843_v56 = vld [vmem:[#allocation8 + $0x94] sm:$0xf0] }
 0x102   : > { %v1053_v60 = vadd.f32 %v1052_v55, %v964_v54  ;;  %v878_v61 = vadd.f32 %v877_v59, %v789_v58  ;;  %827 = vmatmul.bf16.gmra.mxu0 %v562_v52  ;;  %v3474_v55 = vld [vmem:[#allocation8 + $0x90] sm:$0xf]  ;;  %v566_v58 = vpack.c.bf16 %v526_v46, %v524_v45 }
 0x103   : > { %916 = vmatmul.bf16.gmra.mxu1 %v563_v57  ;;  %v3475_v59 = vor.u32 %v3843_v56, %v3474_v55  ;;  %v532_v56 = vld [vmem:[%s4614_s4 + $0x1a0] sm:$0xff] }
 0x104   : > { %v1133_v63 = vmax.f32 %v1053_v60, 0.0  ;;  %1005 = vmatmul.bf16.gmra.mxu2 %v562_v52  ;;  %v1134_v11 = vmax.f32 %v878_v61, 0.0  ;;  %v3410_v52 = vld [vmem:[#allocation8 + $0x10] sm:$0xf] }
 0x105   : > { %1094 = vmatmul.bf16.gmra.mxu3 %v563_v57  ;;  %v3411_v54 = vor.u32 %v3827_v53, %v3410_v52  ;;  %1519 = vmatpush.bf16.msrb.mxu1 %v3475_v59  ;;  %v535_v59 = vld [vmem:[%s4614_s4 + $0x1b8] sm:$0xff] }
 0x106   : > { %v4687_v0 = vpack.c.bf16 %v1133_v63, %v1131_v62 }
 0x107   : > { %v966_v1 = vpop.f32.mrf.mxu2  ;;  %v790_v4 = vpop.f32.mrf.mxu0  ;;  %1430 = vmatpush.bf16.msrb.mxu0 %v3411_v54 }
 0x108   : > { %v967_v2 = vadd.f32 %v966_v1, %v4675_v24  ;;  %v1055_v3 = vpop.f32.mrf.mxu3  ;;  %v791_v5 = vadd.f32 %v790_v4, %v4670_v15  ;;  %v879_v6 = vpop.f32.mrf.mxu1  ;;  %v567_v1 = vpack.c.bf16 %v527_v48, %v525_v47 }
 0x10a   : > { %v1056_v7 = vadd.f32 %v1055_v3, %v967_v2  ;;  %v880_v8 = vadd.f32 %v879_v6, %v791_v5 }
 0x10c   : > { %v1136_v12 = vmax.f32 %v880_v8, 0.0  ;;  %v1135_v28 = vmax.f32 %v1056_v7, 0.0 }
 0x10e   : > { %v4695_v18 = vpack.c.bf16 %v1136_v12, %v1134_v11 }
 0x10f   : > { %v968_v16 = vpop.f32.mrf.mxu2  ;;  %v793_v21 = vpop.f32.mrf.mxu0 }
 0x110   : > { %v969_v19 = vadd.f32 %v968_v16, %v4675_v24  ;;  %v1057_v20 = vpop.f32.mrf.mxu3  ;;  %v794_v23 = vadd.f32 %v793_v21, %v4670_v15  ;;  %v882_v25 = vpop.f32.mrf.mxu1 }
 0x112   : > { %v1058_v26 = vadd.f32 %v1057_v20, %v969_v19  ;;  %v883_v27 = vadd.f32 %v882_v25, %v794_v23  ;;  %832 = vmatmul.bf16.gmra.mxu0 %v564_v17  ;;  %v528_v19 = vld [vmem:[%s4614_s4 + $0x180] sm:$0xff]  ;;  %v530_v20 = vld [vmem:[%s4614_s4 + $0x190] sm:$0xff]  ;;  %v529_v23 = vld [vmem:[%s4614_s4 + $0x188] sm:$0xff] }
 0x113   : > { %921 = vmatmul.bf16.gmra.mxu1 %v565_v22  ;;  %v531_v25 = vld [vmem:[%s4614_s4 + $0x198] sm:$0xff] }
 0x114   : > { %v1137_v29 = vmax.f32 %v1058_v26, 0.0  ;;  %1010 = vmatmul.bf16.gmra.mxu2 %v564_v17  ;;  %v1138_v49 = vmax.f32 %v883_v27, 0.0  ;;  %v568_v27 = vpack.c.bf16 %v530_v20, %v528_v19  ;;  %v569_v32 = vpack.c.bf16 %v531_v25, %v529_v23 }
 0x115   : > { %1099 = vmatmul.bf16.gmra.mxu3 %v565_v22 }
 0x116   : > { %v4699_v35 = vpack.c.bf16 %v1137_v29, %v1135_v28 }
 0x117   : > { %v971_v36 = vpop.f32.mrf.mxu2  ;;  %v795_v40 = vpop.f32.mrf.mxu0 }
 0x118   : > { %v972_v38 = vadd.f32 %v971_v36, %v4675_v24  ;;  %v1060_v39 = vpop.f32.mrf.mxu3  ;;  %v796_v41 = vadd.f32 %v795_v40, %v4670_v15  ;;  %v884_v42 = vpop.f32.mrf.mxu1  ;;  %v3824_v40 = vld [vmem:[#allocation8 + $0x4] sm:$0xf] }
 0x11a   : > { %v1061_v43 = vadd.f32 %v1060_v39, %v972_v38  ;;  %v885_v44 = vadd.f32 %v884_v42, %v796_v41  ;;  %v3404_v41 = vld [vmem:[#allocation8 + $0x8] sm:$0xf0] }
 0x11b   : > { %v3407_v42 = vor.u32 %v3824_v40, %v3404_v41 }
 0x11c   : > { %v1140_v51 = vmax.f32 %v885_v44, 0.0  ;;  %v1139_v6 = vmax.f32 %v1061_v43, 0.0  ;;  %v3840_v43 = vld [vmem:[#allocation8 + $0x84] sm:$0xf]  ;;  %v3468_v44 = vld [vmem:[#allocation8 + $0x88] sm:$0xf0] }
 0x11d   : > { %v3471_v47 = vor.u32 %v3840_v43, %v3468_v44  ;;  %1609 = vmatpush.bf16.msrb.mxu2 %v3407_v42 }
 0x11e   : > { %v4707_v60 = vpack.c.bf16 %v1140_v51, %v1138_v49 }
 0x11f   : > { %v973_v57 = vpop.f32.mrf.mxu2  ;;  %v798_v63 = vpop.f32.mrf.mxu0  ;;  %1698 = vmatpush.bf16.msrb.mxu3 %v3471_v47 }
 0x120   : > { %v974_v61 = vadd.f32 %v973_v57, %v4675_v24  ;;  %v1062_v62 = vpop.f32.mrf.mxu3  ;;  %v799_v2 = vadd.f32 %v798_v63, %v4670_v15  ;;  %v887_v3 = vpop.f32.mrf.mxu1  ;;  %v534_v57 = vld [vmem:[%s4614_s4 + $0x1b0] sm:$0xff]  ;;  %v3402_v63 = vld [vmem:[#allocation8] sm:$0xf] }
 0x122   : > { %v1063_v4 = vadd.f32 %v1062_v62, %v974_v61  ;;  %v888_v5 = vadd.f32 %v887_v3, %v799_v2  ;;  %837 = vmatmul.bf16.gmra.mxu0 %v566_v58  ;;  %v3466_v3 = vld [vmem:[#allocation8 + $0x80] sm:$0xf] }
 0x123   : > { %926 = vmatmul.bf16.gmra.mxu1 %v567_v1 }
 0x124   : > { %v1141_v7 = vmax.f32 %v1063_v4, 0.0  ;;  %1015 = vmatmul.bf16.gmra.mxu2 %v566_v58  ;;  %v1142_v21 = vmax.f32 %v888_v5, 0.0  ;;  %v533_v58 = vld [vmem:[%s4614_s4 + $0x1a8] sm:$0xff] }
 0x125   : > { %1104 = vmatmul.bf16.gmra.mxu3 %v567_v1  ;;  %v3825_v1 = vld [vmem:[#allocation8 + $0x4] sm:$0xf0] }
 0x126   : > { %v4711_v8 = vpack.c.bf16 %v1141_v7, %v1139_v6  ;;  %v3403_v2 = vor.u32 %v3825_v1, %v3402_v63  ;;  %v3841_v4 = vld [vmem:[#allocation8 + $0x84] sm:$0xf0]  ;;  %v570_v6 = vpack.c.bf16 %v534_v57, %v532_v56  ;;  %v3588_v56 = vld [vmem:[#allocation11 + $0x78] sm:$0xf0] }
 0x127   : > { %v976_v9 = vpop.f32.mrf.mxu2  ;;  %v800_v12 = vpop.f32.mrf.mxu0  ;;  %v3467_v7 = vor.u32 %v3841_v4, %v3466_v3 }
 0x128   : > { %v977_v10 = vadd.f32 %v976_v9, %v4675_v24  ;;  %v1065_v11 = vpop.f32.mrf.mxu3  ;;  %v801_v13 = vadd.f32 %v800_v12, %v4670_v15  ;;  %v889_v14 = vpop.f32.mrf.mxu1  ;;  %1431 = vmatpush.bf16.msrb.mxu0 %v3403_v2 }
 0x129   : > { %1520 = vmatpush.bf16.msrb.mxu1 %v3467_v7 }
 0x12a   : > { %v1066_v16 = vadd.f32 %v1065_v11, %v977_v10  ;;  %v890_v17 = vadd.f32 %v889_v14, %v801_v13  ;;  %v571_v13 = vpack.c.bf16 %v535_v59, %v533_v58  ;;  %v3886_v58 = vld [vmem:[#allocation11 + $0xf4] sm:$0xf]  ;;  %v3652_v59 = vld [vmem:[#allocation11 + $0xf8] sm:$0xf0] }
 0x12b   : > { %v3655_v63 = vor.u32 %v3886_v58, %v3652_v59 }
 0x12c   : > { %v1144_v22 = vmax.f32 %v890_v17, 0.0  ;;  %v1143_v38 = vmax.f32 %v1066_v16, 0.0 }
 0x12d   : > { %2277 = vmatpush.bf16.msra.mxu3 %v3655_v63 }
 0x12e   : > { %v4719_v28 = vpack.c.bf16 %v1144_v22, %v1142_v21 }
 0x12f   : > { %v978_v26 = vpop.f32.mrf.mxu2  ;;  %v803_v31 = vpop.f32.mrf.mxu0 }
 0x130   : > { %v979_v29 = vadd.f32 %v978_v26, %v4675_v24  ;;  %v1067_v30 = vpop.f32.mrf.mxu3  ;;  %v804_v33 = vadd.f32 %v803_v31, %v4670_v15  ;;  %v892_v34 = vpop.f32.mrf.mxu1 }
 0x132   : > { %v1068_v36 = vadd.f32 %v1067_v30, %v979_v29  ;;  %v893_v37 = vadd.f32 %v892_v34, %v804_v33  ;;  %842 = vmatmul.bf16.gmra.mxu0 %v568_v27  ;;  %v536_v33 = vld [vmem:[%s4614_s4 + $0x1c0] sm:$0xff]  ;;  %v538_v34 = vld [vmem:[%s4614_s4 + $0x1d0] sm:$0xff] }
 0x133   : > { %931 = vmatmul.bf16.gmra.mxu1 %v569_v32  ;;  %v572_v41 = vpack.c.bf16 %v538_v34, %v536_v33 }
 0x134   : > { %v1145_v39 = vmax.f32 %v1068_v36, 0.0  ;;  %1020 = vmatmul.bf16.gmra.mxu2 %v568_v27  ;;  %v1146_v61 = vmax.f32 %v893_v37, 0.0 }
 0x135   : > { %1109 = vmatmul.bf16.gmra.mxu3 %v569_v32 }
 0x136   : > { %v4723_v45 = vpack.c.bf16 %v1145_v39, %v1143_v38  ;;  %v537_v38 = vld [vmem:[%s4614_s4 + $0x1c8] sm:$0xff]  ;;  %v539_v39 = vld [vmem:[%s4614_s4 + $0x1d8] sm:$0xff] }
 0x137   : > { %v981_v46 = vpop.f32.mrf.mxu2  ;;  %v805_v51 = vpop.f32.mrf.mxu0  ;;  %v573_v47 = vpack.c.bf16 %v539_v39, %v537_v38 }
 0x138   : > { %v982_v48 = vadd.f32 %v981_v46, %v4675_v24  ;;  %v1070_v49 = vpop.f32.mrf.mxu3  ;;  %v806_v52 = vadd.f32 %v805_v51, %v4670_v15  ;;  %v894_v53 = vpop.f32.mrf.mxu1 }
 0x13a   : > { %v1071_v54 = vadd.f32 %v1070_v49, %v982_v48  ;;  %v895_v55 = vadd.f32 %v894_v53, %v806_v52 }
 0x13c   : > { %v1148_v62 = vmax.f32 %v895_v55, 0.0  ;;  %v1147_v20 = vmax.f32 %v1071_v54, 0.0  ;;  %v3870_v55 = vld [vmem:[#allocation11 + $0x74] sm:$0xf] }
 0x13d   : > { %v3591_v57 = vor.u32 %v3870_v55, %v3588_v56 }
 0x13e   : > { %v4731_v9 = vpack.c.bf16 %v1148_v62, %v1146_v61 }
 0x13f   : > { %v983_v5 = vpop.f32.mrf.mxu2  ;;  %v808_v12 = vpop.f32.mrf.mxu0  ;;  %2188 = vmatpush.bf16.msra.mxu2 %v3591_v57 }
 0x140   : > { %v984_v10 = vadd.f32 %v983_v5, %v4675_v24  ;;  %v1072_v11 = vpop.f32.mrf.mxu3  ;;  %v809_v14 = vadd.f32 %v808_v12, %v4670_v15  ;;  %v897_v16 = vpop.f32.mrf.mxu1  ;;  %v541_v12 = vld [vmem:[%s4614_s4 + $0x1e8] sm:$0xff] }
 0x142   : > { %v1073_v17 = vadd.f32 %v1072_v11, %v984_v10  ;;  %v898_v19 = vadd.f32 %v897_v16, %v809_v14  ;;  %847 = vmatmul.bf16.gmra.mxu0 %v570_v6  ;;  %v540_v10 = vld [vmem:[%s4614_s4 + $0x1e0] sm:$0xff]  ;;  %v542_v11 = vld [vmem:[%s4614_s4 + $0x1f0] sm:$0xff] }
 0x143   : > { %936 = vmatmul.bf16.gmra.mxu1 %v571_v13 }
 0x144   : > { %v1149_v21 = vmax.f32 %v1073_v17, 0.0  ;;  %1025 = vmatmul.bf16.gmra.mxu2 %v570_v6  ;;  %v1150_v36 = vmax.f32 %v898_v19, 0.0  ;;  %v3586_v17 = vld [vmem:[#allocation11 + $0x70] sm:$0xf]  ;;  %v3871_v19 = vld [vmem:[#allocation11 + $0x74] sm:$0xf0] }
 0x145   : > { %1114 = vmatmul.bf16.gmra.mxu3 %v571_v13  ;;  %v543_v13 = vld [vmem:[%s4614_s4 + $0x1f8] sm:$0xff] }
 0x146   : > { %v4735_v22 = vpack.c.bf16 %v1149_v21, %v1147_v20  ;;  %v3587_v20 = vor.u32 %v3871_v19, %v3586_v17  ;;  %v3650_v21 = vld [vmem:[#allocation11 + $0xf0] sm:$0xf]  ;;  %v575_v33 = vpack.c.bf16 %v543_v13, %v541_v12 }
 0x147   : > { %v986_v23 = vpop.f32.mrf.mxu2  ;;  %v810_v27 = vpop.f32.mrf.mxu0 }
 0x148   : > { %v987_v25 = vadd.f32 %v986_v23, %v4675_v24  ;;  %v1075_v26 = vpop.f32.mrf.mxu3  ;;  %v811_v29 = vadd.f32 %v810_v27, %v4670_v15  ;;  %v899_v30 = vpop.f32.mrf.mxu1  ;;  %v3887_v23 = vld [vmem:[#allocation11 + $0xf4] sm:$0xf0]  ;;  %2010 = vmatpush.bf16.msra.mxu0 %v3587_v20 }
 0x149   : > { %v3651_v27 = vor.u32 %v3887_v23, %v3650_v21 }
 0x14a   : > { %v1076_v31 = vadd.f32 %v1075_v26, %v987_v25  ;;  %v900_v32 = vadd.f32 %v899_v30, %v811_v29  ;;  %v574_v26 = vpack.c.bf16 %v542_v11, %v540_v10  ;;  %v3884_v10 = vld [vmem:[#allocation11 + $0xe4] sm:$0xf]  ;;  %v3644_v11 = vld [vmem:[#allocation11 + $0xe8] sm:$0xf0] }
 0x14b   : > { %2099 = vmatpush.bf16.msra.mxu1 %v3651_v27  ;;  %v3869_v27 = vld [vmem:[#allocation11 + $0x64] sm:$0xf0] }
 0x14c   : > { %v1152_v37 = vmax.f32 %v900_v32, 0.0  ;;  %v1151_v53 = vmax.f32 %v1076_v31, 0.0 }
 0x14e   : > { %v4743_v42 = vpack.c.bf16 %v1152_v37, %v1150_v36 }
 0x14f   : > { %v988_v40 = vpop.f32.mrf.mxu2  ;;  %v813_v46 = vpop.f32.mrf.mxu0 }
 0x150   : > { %v989_v43 = vadd.f32 %v988_v40, %v4675_v24  ;;  %v1077_v44 = vpop.f32.mrf.mxu3  ;;  %v814_v48 = vadd.f32 %v813_v46, %v4670_v15  ;;  %v902_v49 = vpop.f32.mrf.mxu1 }
 0x152   : > { %v1078_v51 = vadd.f32 %v1077_v44, %v989_v43  ;;  %v903_v52 = vadd.f32 %v902_v49, %v814_v48  ;;  %852 = vmatmul.bf16.gmra.mxu0 %v572_v41 }
 0x153   : > { %941 = vmatmul.bf16.gmra.mxu1 %v573_v47 }
 0x154   : > { %v1153_v54 = vmax.f32 %v1078_v51, 0.0  ;;  %1030 = vmatmul.bf16.gmra.mxu2 %v572_v41  ;;  %v1154_v14 = vmax.f32 %v903_v52, 0.0 }
 0x155   : > { %1119 = vmatmul.bf16.gmra.mxu3 %v573_v47 }
 0x156   : > { %v4747_v61 = vpack.c.bf16 %v1153_v54, %v1151_v53 }
 0x157   : > { %v991_v62 = vpop.f32.mrf.mxu2  ;;  %v815_v3 = vpop.f32.mrf.mxu0 }
 0x158   : > { %v992_v1 = vadd.f32 %v991_v62, %v4675_v24  ;;  %v1080_v2 = vpop.f32.mrf.mxu3  ;;  %v816_v4 = vadd.f32 %v815_v3, %v4670_v15  ;;  %v904_v5 = vpop.f32.mrf.mxu1 }
 0x15a   : > { %v1081_v6 = vadd.f32 %v1080_v2, %v992_v1  ;;  %v905_v7 = vadd.f32 %v904_v5, %v816_v4  ;;  %v3868_v5 = vld [vmem:[#allocation11 + $0x64] sm:$0xf] }
 0x15c   : > { %v1156_v16 = vmax.f32 %v905_v7, 0.0  ;;  %v1155_v39 = vmax.f32 %v1081_v6, 0.0  ;;  %v3580_v6 = vld [vmem:[#allocation11 + $0x68] sm:$0xf0] }
 0x15d   : > { %v3583_v7 = vor.u32 %v3868_v5, %v3580_v6 }
 0x15e   : > { %v4755_v29 = vpack.c.bf16 %v1156_v16, %v1154_v14  ;;  %v3647_v14 = vor.u32 %v3884_v10, %v3644_v11 }
 0x15f   : > { %v993_v25 = vpop.f32.mrf.mxu2  ;;  %v818_v32 = vpop.f32.mrf.mxu0  ;;  %2189 = vmatpush.bf16.msra.mxu2 %v3583_v7 }
 0x160   : > { %v994_v30 = vadd.f32 %v993_v25, %v4675_v24  ;;  %v1082_v31 = vpop.f32.mrf.mxu3  ;;  %v819_v34 = vadd.f32 %v818_v32, %v4670_v15  ;;  %v907_v36 = vpop.f32.mrf.mxu1  ;;  %2278 = vmatpush.bf16.msra.mxu3 %v3647_v14  ;;  %v3885_v32 = vld [vmem:[#allocation11 + $0xe4] sm:$0xf0]  ;;  %v3572_v14 = vld [vmem:[#allocation11 + $0x58] sm:$0xf0] }
 0x162   : > { %v1083_v37 = vadd.f32 %v1082_v31, %v994_v30  ;;  %v908_v38 = vadd.f32 %v907_v36, %v819_v34  ;;  %857 = vmatmul.bf16.gmra.mxu0 %v574_v26  ;;  %v3642_v31 = vld [vmem:[#allocation11 + $0xe0] sm:$0xf] }
 0x163   : > { %946 = vmatmul.bf16.gmra.mxu1 %v575_v33  ;;  %v3643_v34 = vor.u32 %v3885_v32, %v3642_v31  ;;  %v3570_v32 = vld [vmem:[#allocation11 + $0x50] sm:$0xf] }
 0x164   : > { %v1157_v40 = vmax.f32 %v1083_v37, 0.0  ;;  %1035 = vmatmul.bf16.gmra.mxu2 %v574_v26  ;;  %v1158_v53 = vmax.f32 %v908_v38, 0.0  ;;  %v3578_v26 = vld [vmem:[#allocation11 + $0x60] sm:$0xf] }
 0x165   : > { %1124 = vmatmul.bf16.gmra.mxu3 %v575_v33  ;;  %v3579_v30 = vor.u32 %v3869_v27, %v3578_v26  ;;  %2100 = vmatpush.bf16.msra.mxu1 %v3643_v34 }
 0x166   : > { %v4759_v41 = vpack.c.bf16 %v1157_v40, %v1155_v39 }
 0x167   : > { %v996_v43 = vpop.f32.mrf.mxu2  ;;  %v820_v47 = vpop.f32.mrf.mxu0  ;;  %2011 = vmatpush.bf16.msra.mxu0 %v3579_v30 }
 0x168   : > { %v997_v44 = vadd.f32 %v996_v43, %v4675_v24  ;;  %v1085_v46 = vpop.f32.mrf.mxu3  ;;  %v821_v48 = vadd.f32 %v820_v47, %v4670_v15  ;;  %v909_v49 = vpop.f32.mrf.mxu1 }
 0x16a   : > { %v1086_v51 = vadd.f32 %v1085_v46, %v997_v44  ;;  %v910_v52 = vadd.f32 %v909_v49, %v821_v48 }
 0x16c   : > { %v1160_v54 = vmax.f32 %v910_v52, 0.0  ;;  %v1159_v3 = vmax.f32 %v1086_v51, 0.0 }
 0x16e   : > { %v4763_v56 = vpack.c.bf16 %v1160_v54, %v1158_v53 }
 0x16f   : > { %v998_v55 = vpop.f32.mrf.mxu2  ;;  %v823_v59 = vpop.f32.mrf.mxu0 }
 0x170   : > { %v999_v57 = vadd.f32 %v998_v55, %v4675_v24  ;;  %v1087_v58 = vpop.f32.mrf.mxu3  ;;  %v824_v62 = vadd.f32 %v823_v59, %v4670_v15  ;;  %v912_v63 = vpop.f32.mrf.mxu1 }
 0x172   : > { %v1088_v1 = vadd.f32 %v1087_v58, %v999_v57  ;;  %v913_v2 = vadd.f32 %v912_v63, %v824_v62  ;;  %1432 = vmatmul.bf16.vlgmr.msrb.gmra.mxu0 %v4683_v50 }
 0x173   : > { %1521 = vmatmul.bf16.vlgmr.msrb.gmra.mxu1 %v4687_v0 }
 0x174   : > { %v1161_v4 = vmax.f32 %v1088_v1, 0.0  ;;  %1610 = vmatmul.bf16.vlgmr.msrb.gmra.mxu2 %v4683_v50  ;;  %v1162_v23 = vmax.f32 %v913_v2, 0.0 }
 0x175   : > { %1699 = vmatmul.bf16.vlgmr.msrb.gmra.mxu3 %v4687_v0 }
 0x176   : > { %v4771_v12 = vpack.c.bf16 %v1161_v4, %v1159_v3 }
 0x177   : > { %v1001_v13 = vpop.f32.mrf.mxu2  ;;  %v825_v19 = vpop.f32.mrf.mxu0 }
 0x178   : > { %v1002_v16 = vadd.f32 %v1001_v13, %v4675_v24  ;;  %v1090_v17 = vpop.f32.mrf.mxu3  ;;  %v826_v20 = vadd.f32 %v825_v19, %v4670_v15  ;;  %v914_v21 = vpop.f32.mrf.mxu1  ;;  %v3866_v13 = vld [vmem:[#allocation11 + $0x54] sm:$0xf]  ;;  %v3636_v19 = vld [vmem:[#allocation11 + $0xd8] sm:$0xf0] }
 0x17a   : > { %v1091_v50 = vadd.f32 %v1090_v17, %v1002_v16  ;;  %v915_v0 = vadd.f32 %v914_v21, %v826_v20  ;;  %v3575_v16 = vor.u32 %v3866_v13, %v3572_v14  ;;  %v3882_v17 = vld [vmem:[#allocation11 + $0xd4] sm:$0xf] }
 0x17c   : > { %v1164_v25 = vmax.f32 %v915_v0, 0.0  ;;  %v1163_v47 = vmax.f32 %v1091_v50, 0.0  ;;  %v3639_v50 = vor.u32 %v3882_v17, %v3636_v19  ;;  %2190 = vmatpush.bf16.msra.mxu2 %v3575_v16 }
 0x17e   : > { %v4775_v36 = vpack.c.bf16 %v1164_v25, %v1162_v23  ;;  %2279 = vmatpush.bf16.msra.mxu3 %v3639_v50  ;;  %v3564_v50 = vld [vmem:[#allocation11 + $0x48] sm:$0xf0] }
 0x17f   : > { %v1003_v33 = vpop.f32.mrf.mxu2  ;;  %v828_v39 = vpop.f32.mrf.mxu0 }
 0x180   : > { %v1004_v37 = vadd.f32 %v1003_v33, %v4675_v24  ;;  %v1092_v38 = vpop.f32.mrf.mxu3  ;;  %v829_v40 = vadd.f32 %v828_v39, %v4670_v15  ;;  %v917_v43 = vpop.f32.mrf.mxu1  ;;  %v3867_v33 = vld [vmem:[#allocation11 + $0x54] sm:$0xf0] }
 0x181   : > { %v3571_v34 = vor.u32 %v3867_v33, %v3570_v32 }
 0x182   : > { %v1093_v44 = vadd.f32 %v1092_v38, %v1004_v37  ;;  %v918_v46 = vadd.f32 %v917_v43, %v829_v40  ;;  %1437 = vmatmul.bf16.gmra.mxu0 %v4695_v18  ;;  %v3634_v37 = vld [vmem:[#allocation11 + $0xd0] sm:$0xf]  ;;  %v3883_v38 = vld [vmem:[#allocation11 + $0xd4] sm:$0xf0] }
 0x183   : > { %1526 = vmatmul.bf16.gmra.mxu1 %v4699_v35  ;;  %v3635_v40 = vor.u32 %v3883_v38, %v3634_v37  ;;  %2012 = vmatpush.bf16.msra.mxu0 %v3571_v34  ;;  %v3562_v38 = vld [vmem:[#allocation11 + $0x40] sm:$0xf] }
 0x184   : > { %v1165_v48 = vmax.f32 %v1093_v44, 0.0  ;;  %1615 = vmatmul.bf16.gmra.mxu2 %v4695_v18  ;;  %v1166_v62 = vmax.f32 %v918_v46, 0.0 }
 0x185   : > { %1704 = vmatmul.bf16.gmra.mxu3 %v4699_v35  ;;  %2101 = vmatpush.bf16.msra.mxu1 %v3635_v40 }
 0x186   : > { %v4783_v49 = vpack.c.bf16 %v1165_v48, %v1163_v47 }
 0x187   : > { %v1006_v51 = vpop.f32.mrf.mxu2  ;;  %v830_v54 = vpop.f32.mrf.mxu0 }
 0x188   : > { %v1007_v52 = vadd.f32 %v1006_v51, %v4675_v24  ;;  %v1095_v53 = vpop.f32.mrf.mxu3  ;;  %v831_v55 = vadd.f32 %v830_v54, %v4670_v15  ;;  %v919_v57 = vpop.f32.mrf.mxu1 }
 0x18a   : > { %v1096_v58 = vadd.f32 %v1095_v53, %v1007_v52  ;;  %v920_v59 = vadd.f32 %v919_v57, %v831_v55 }
 0x18c   : > { %v1168_v63 = vmax.f32 %v920_v59, 0.0  ;;  %v1167_v10 = vmax.f32 %v1096_v58, 0.0 }
 0x18e   : > { %v4787_v2 = vpack.c.bf16 %v1168_v63, %v1166_v62 }
 0x18f   : > { %v1008_v1 = vpop.f32.mrf.mxu2  ;;  %v833_v3 = vpop.f32.mrf.mxu0 }
 0x190   : > { %v1009_v18 = vadd.f32 %v1008_v1, %v4675_v24  ;;  %v1097_v35 = vpop.f32.mrf.mxu3  ;;  %v834_v4 = vadd.f32 %v833_v3, %v4670_v15  ;;  %v922_v5 = vpop.f32.mrf.mxu1 }
 0x192   : > { %v1098_v6 = vadd.f32 %v1097_v35, %v1009_v18  ;;  %v923_v7 = vadd.f32 %v922_v5, %v834_v4  ;;  %1442 = vmatmul.bf16.gmra.mxu0 %v4707_v60 }
 0x193   : > { %1531 = vmatmul.bf16.gmra.mxu1 %v4711_v8 }
 0x194   : > { %v1169_v11 = vmax.f32 %v1098_v6, 0.0  ;;  %1620 = vmatmul.bf16.gmra.mxu2 %v4707_v60  ;;  %v1170_v30 = vmax.f32 %v923_v7, 0.0 }
 0x195   : > { %1709 = vmatmul.bf16.gmra.mxu3 %v4711_v8 }
 0x196   : > { %v4795_v20 = vpack.c.bf16 %v1169_v11, %v1167_v10 }
 0x197   : > { %v1011_v21 = vpop.f32.mrf.mxu2  ;;  %v835_v25 = vpop.f32.mrf.mxu0 }
 0x198   : > { %v1012_v0 = vadd.f32 %v1011_v21, %v4675_v24  ;;  %v1100_v23 = vpop.f32.mrf.mxu3  ;;  %v836_v26 = vadd.f32 %v835_v25, %v4670_v15  ;;  %v924_v27 = vpop.f32.mrf.mxu1  ;;  %v3864_v21 = vld [vmem:[#allocation11 + $0x44] sm:$0xf]  ;;  %v3628_v25 = vld [vmem:[#allocation11 + $0xc8] sm:$0xf0] }
 0x19a   : > { %v1101_v60 = vadd.f32 %v1100_v23, %v1012_v0  ;;  %v925_v8 = vadd.f32 %v924_v27, %v836_v26  ;;  %v3567_v0 = vor.u32 %v3864_v21, %v3564_v50  ;;  %v3880_v23 = vld [vmem:[#allocation11 + $0xc4] sm:$0xf] }
 0x19c   : > { %v1172_v31 = vmax.f32 %v925_v8, 0.0  ;;  %v1171_v54 = vmax.f32 %v1101_v60, 0.0  ;;  %v3631_v60 = vor.u32 %v3880_v23, %v3628_v25  ;;  %2191 = vmatpush.bf16.msra.mxu2 %v3567_v0 }
 0x19e   : > { %v4799_v43 = vpack.c.bf16 %v1172_v31, %v1170_v30  ;;  %2280 = vmatpush.bf16.msra.mxu3 %v3631_v60  ;;  %v3556_v60 = vld [vmem:[#allocation11 + $0x38] sm:$0xf0] }
 0x19f   : > { %v1013_v39 = vpop.f32.mrf.mxu2  ;;  %v838_v47 = vpop.f32.mrf.mxu0 }
 0x1a0   : > { %v1014_v44 = vadd.f32 %v1013_v39, %v4675_v24  ;;  %v1102_v46 = vpop.f32.mrf.mxu3  ;;  %v839_v48 = vadd.f32 %v838_v47, %v4670_v15  ;;  %v927_v51 = vpop.f32.mrf.mxu1  ;;  %v3865_v39 = vld [vmem:[#allocation11 + $0x44] sm:$0xf0] }
 0x1a1   : > { %v3563_v40 = vor.u32 %v3865_v39, %v3562_v38 }
 0x1a2   : > { %v1103_v52 = vadd.f32 %v1102_v46, %v1014_v44  ;;  %v928_v53 = vadd.f32 %v927_v51, %v839_v48  ;;  %1447 = vmatmul.bf16.gmra.mxu0 %v4719_v28  ;;  %v3626_v44 = vld [vmem:[#allocation11 + $0xc0] sm:$0xf]  ;;  %v3881_v46 = vld [vmem:[#allocation11 + $0xc4] sm:$0xf0] }
 0x1a3   : > { %1536 = vmatmul.bf16.gmra.mxu1 %v4723_v45  ;;  %v3627_v48 = vor.u32 %v3881_v46, %v3626_v44  ;;  %2013 = vmatpush.bf16.msra.mxu0 %v3563_v40  ;;  %v3554_v46 = vld [vmem:[#allocation11 + $0x30] sm:$0xf] }
 0x1a4   : > { %v1173_v55 = vmax.f32 %v1103_v52, 0.0  ;;  %1625 = vmatmul.bf16.gmra.mxu2 %v4719_v28  ;;  %v1174_v4 = vmax.f32 %v928_v53, 0.0 }
 0x1a5   : > { %1714 = vmatmul.bf16.gmra.mxu3 %v4723_v45  ;;  %2102 = vmatpush.bf16.msra.mxu1 %v3627_v48 }
 0x1a6   : > { %v4807_v57 = vpack.c.bf16 %v1173_v55, %v1171_v54 }
 0x1a7   : > { %v1016_v58 = vpop.f32.mrf.mxu2  ;;  %v840_v63 = vpop.f32.mrf.mxu0 }
 0x1a8   : > { %v1017_v59 = vadd.f32 %v1016_v58, %v4675_v24  ;;  %v1105_v62 = vpop.f32.mrf.mxu3  ;;  %v841_v1 = vadd.f32 %v840_v63, %v4670_v15  ;;  %v929_v18 = vpop.f32.mrf.mxu1 }
 0x1aa   : > { %v1106_v35 = vadd.f32 %v1105_v62, %v1017_v59  ;;  %v930_v3 = vadd.f32 %v929_v18, %v841_v1 }
 0x1ac   : > { %v1176_v5 = vmax.f32 %v930_v3, 0.0  ;;  %v1175_v17 = vmax.f32 %v1106_v35, 0.0 }
 0x1ae   : > { %v4811_v7 = vpack.c.bf16 %v1176_v5, %v1174_v4 }
 0x1af   : > { %v1018_v6 = vpop.f32.mrf.mxu2  ;;  %v843_v10 = vpop.f32.mrf.mxu0 }
 0x1b0   : > { %v1019_v28 = vadd.f32 %v1018_v6, %v4675_v24  ;;  %v1107_v45 = vpop.f32.mrf.mxu3  ;;  %v844_v11 = vadd.f32 %v843_v10, %v4670_v15  ;;  %v932_v13 = vpop.f32.mrf.mxu1 }
 0x1b2   : > { %v1108_v14 = vadd.f32 %v1107_v45, %v1019_v28  ;;  %v933_v16 = vadd.f32 %v932_v13, %v844_v11  ;;  %1452 = vmatmul.bf16.gmra.mxu0 %v4731_v9 }
 0x1b3   : > { %1541 = vmatmul.bf16.gmra.mxu1 %v4735_v22 }
 0x1b4   : > { %v1177_v19 = vmax.f32 %v1108_v14, 0.0  ;;  %1630 = vmatmul.bf16.gmra.mxu2 %v4731_v9  ;;  %v1178_v34 = vmax.f32 %v933_v16, 0.0 }
 0x1b5   : > { %1719 = vmatmul.bf16.gmra.mxu3 %v4735_v22 }
 0x1b6   : > { %v4819_v26 = vpack.c.bf16 %v1177_v19, %v1175_v17 }
 0x1b7   : > { %v1021_v27 = vpop.f32.mrf.mxu2  ;;  %v845_v31 = vpop.f32.mrf.mxu0 }
 0x1b8   : > { %v1022_v8 = vadd.f32 %v1021_v27, %v4675_v24  ;;  %v1110_v30 = vpop.f32.mrf.mxu3  ;;  %v846_v32 = vadd.f32 %v845_v31, %v4670_v15  ;;  %v934_v33 = vpop.f32.mrf.mxu1  ;;  %v3862_v27 = vld [vmem:[#allocation11 + $0x34] sm:$0xf]  ;;  %v3620_v31 = vld [vmem:[#allocation11 + $0xb8] sm:$0xf0] }
 0x1ba   : > { %v1111_v9 = vadd.f32 %v1110_v30, %v1022_v8  ;;  %v935_v22 = vadd.f32 %v934_v33, %v846_v32  ;;  %v3559_v8 = vor.u32 %v3862_v27, %v3556_v60  ;;  %v3878_v30 = vld [vmem:[#allocation11 + $0xb4] sm:$0xf] }
 0x1bc   : > { %v1180_v37 = vmax.f32 %v935_v22, 0.0  ;;  %v1179_v63 = vmax.f32 %v1111_v9, 0.0  ;;  %v3623_v9 = vor.u32 %v3878_v30, %v3620_v31  ;;  %2192 = vmatpush.bf16.msra.mxu2 %v3559_v8 }
 0x1be   : > { %v4823_v51 = vpack.c.bf16 %v1180_v37, %v1178_v34  ;;  %2281 = vmatpush.bf16.msra.mxu3 %v3623_v9 }
 0x1bf   : > { %v1023_v47 = vpop.f32.mrf.mxu2  ;;  %v848_v54 = vpop.f32.mrf.mxu0 }
 0x1c0   : > { %v1024_v52 = vadd.f32 %v1023_v47, %v4675_v24  ;;  %v1112_v53 = vpop.f32.mrf.mxu3  ;;  %v849_v55 = vadd.f32 %v848_v54, %v4670_v15  ;;  %v937_v58 = vpop.f32.mrf.mxu1  ;;  %v3863_v47 = vld [vmem:[#allocation11 + $0x34] sm:$0xf0] }
 0x1c1   : > { %v3555_v48 = vor.u32 %v3863_v47, %v3554_v46 }
 0x1c2   : > { %v1113_v59 = vadd.f32 %v1112_v53, %v1024_v52  ;;  %v938_v62 = vadd.f32 %v937_v58, %v849_v55  ;;  %1457 = vmatmul.bf16.gmra.mxu0 %v4743_v42  ;;  %v3618_v52 = vld [vmem:[#allocation11 + $0xb0] sm:$0xf]  ;;  %v3879_v53 = vld [vmem:[#allocation11 + $0xb4] sm:$0xf0] }
 0x1c3   : > { %1546 = vmatmul.bf16.gmra.mxu1 %v4747_v61  ;;  %v3619_v55 = vor.u32 %v3879_v53, %v3618_v52  ;;  %2014 = vmatpush.bf16.msra.mxu0 %v3555_v48  ;;  %v3546_v53 = vld [vmem:[#allocation11 + $0x20] sm:$0xf] }
 0x1c4   : > { %v1181_v1 = vmax.f32 %v1113_v59, 0.0  ;;  %1635 = vmatmul.bf16.gmra.mxu2 %v4743_v42  ;;  %v1182_v11 = vmax.f32 %v938_v62, 0.0 }
 0x1c5   : > { %1724 = vmatmul.bf16.gmra.mxu3 %v4747_v61  ;;  %2103 = vmatpush.bf16.msra.mxu1 %v3619_v55  ;;  %v3610_v55 = vld [vmem:[#allocation11 + $0xa0] sm:$0xf] }
 0x1c6   : > { %v4831_v18 = vpack.c.bf16 %v1181_v1, %v1179_v63 }
 0x1c7   : > { %v1026_v35 = vpop.f32.mrf.mxu2  ;;  %v850_v5 = vpop.f32.mrf.mxu0 }
 0x1c8   : > { %v1027_v3 = vadd.f32 %v1026_v35, %v4675_v24  ;;  %v1115_v4 = vpop.f32.mrf.mxu3  ;;  %v851_v6 = vadd.f32 %v850_v5, %v4670_v15  ;;  %v939_v28 = vpop.f32.mrf.mxu1 }
 0x1ca   : > { %v1116_v45 = vadd.f32 %v1115_v4, %v1027_v3  ;;  %v940_v10 = vadd.f32 %v939_v28, %v851_v6 }
 0x1cc   : > { %v1184_v13 = vmax.f32 %v940_v10, 0.0  ;;  %v1183_v23 = vmax.f32 %v1116_v45, 0.0 }
 0x1ce   : > { %v4835_v16 = vpack.c.bf16 %v1184_v13, %v1182_v11 }
 0x1cf   : > { %v1028_v14 = vpop.f32.mrf.mxu2  ;;  %v853_v17 = vpop.f32.mrf.mxu0 }
 0x1d0   : > { %v1029_v42 = vadd.f32 %v1028_v14, %v4675_v24  ;;  %v1117_v61 = vpop.f32.mrf.mxu3  ;;  %v854_v19 = vadd.f32 %v853_v17, %v4670_v15  ;;  %v942_v21 = vpop.f32.mrf.mxu1  ;;  %v1258_v17 = vld [vmem:[#allocation10] sm:$0x3] }
 0x1d1   : > { %v4868_v9 = vperm.slane %v1258_v17, 1 }
 0x1d2   : > { %v1118_v50 = vadd.f32 %v1117_v61, %v1029_v42  ;;  %v943_v0 = vadd.f32 %v942_v21, %v854_v19  ;;  %1462 = vmatmul.bf16.gmra.mxu0 %v4755_v29 }
 0x1d3   : > { %1551 = vmatmul.bf16.gmra.mxu1 %v4759_v41 }
 0x1d4   : > { %v1185_v25 = vmax.f32 %v1118_v50, 0.0  ;;  %1640 = vmatmul.bf16.gmra.mxu2 %v4755_v29  ;;  %v1186_v40 = vmax.f32 %v943_v0, 0.0  ;;  %v4859_v0 = vperm.slane %v1258_v17, 0 }
 0x1d5   : > { %1729 = vmatmul.bf16.gmra.mxu3 %v4759_v41 }
 0x1d6   : > { %v4843_v32 = vpack.c.bf16 %v1185_v25, %v1183_v23 }
 0x1d7   : > { %v1031_v33 = vpop.f32.mrf.mxu2  ;;  %v855_v37 = vpop.f32.mrf.mxu0 }
 0x1d8   : > { %v1032_v22 = vadd.f32 %v1031_v33, %v4675_v24  ;;  %v1120_v34 = vpop.f32.mrf.mxu3  ;;  %v856_v38 = vadd.f32 %v855_v37, %v4670_v15  ;;  %v944_v39 = vpop.f32.mrf.mxu1 }
 0x1da   : > { %v1121_v29 = vadd.f32 %v1120_v34, %v1032_v22  ;;  %v945_v41 = vadd.f32 %v944_v39, %v856_v38  ;;  %v3548_v22 = vld [vmem:[#allocation11 + $0x28] sm:$0xf0]  ;;  %v3876_v34 = vld [vmem:[#allocation11 + $0xa4] sm:$0xf] }
 0x1db   : > { %v3612_v38 = vld [vmem:[#allocation11 + $0xa8] sm:$0xf0] }
 0x1dc   : > { %v1188_v44 = vmax.f32 %v945_v41, 0.0  ;;  %v1187_v5 = vmax.f32 %v1121_v29, 0.0  ;;  %v3615_v41 = vor.u32 %v3876_v34, %v3612_v38  ;;  %v3604_v34 = vld [vmem:[#allocation11 + $0x98] sm:$0xf0] }
 0x1de   : > { %v4847_v58 = vpack.c.bf16 %v1188_v44, %v1186_v40  ;;  %2282 = vmatpush.bf16.msra.mxu3 %v3615_v41 }
 0x1df   : > { %v1033_v54 = vpop.f32.mrf.mxu2  ;;  %v858_v63 = vpop.f32.mrf.mxu0 }
 0x1e0   : > { %v1034_v59 = vadd.f32 %v1033_v54, %v4675_v24  ;;  %v1122_v62 = vpop.f32.mrf.mxu3  ;;  %v859_v1 = vadd.f32 %v858_v63, %v4670_v15  ;;  %v947_v35 = vpop.f32.mrf.mxu1  ;;  %v3861_v54 = vld [vmem:[#allocation11 + $0x24] sm:$0xf0] }
 0x1e2   : > { %v1123_v3 = vadd.f32 %v1122_v62, %v1034_v59  ;;  %v948_v4 = vadd.f32 %v947_v35, %v859_v1  ;;  %1467 = vmatmul.bf16.gmra.mxu0 %v4763_v56  ;;  %v3547_v59 = vor.u32 %v3861_v54, %v3546_v53  ;;  %v3877_v62 = vld [vmem:[#allocation11 + $0xa4] sm:$0xf0]  ;;  %v3875_v54 = vld [vmem:[#allocation11 + $0x94] sm:$0xf0] }
 0x1e3   : > { %1556 = vmatmul.bf16.gmra.mxu1 %v4771_v12  ;;  %v3611_v1 = vor.u32 %v3877_v62, %v3610_v55 }
 0x1e4   : > { %v1189_v6 = vmax.f32 %v1123_v3, 0.0  ;;  %1645 = vmatmul.bf16.gmra.mxu2 %v4763_v56  ;;  %v1190_v21 = vmax.f32 %v948_v4, 0.0  ;;  %2015 = vmatpush.bf16.msra.mxu0 %v3547_v59 }
 0x1e5   : > { %1734 = vmatmul.bf16.gmra.mxu3 %v4771_v12  ;;  %2104 = vmatpush.bf16.msra.mxu1 %v3611_v1 }
 0x1e6   : > { %v4855_v28 = vpack.c.bf16 %v1189_v6, %v1187_v5 }
 0x1e7   : > { %v1036_v45 = vpop.f32.mrf.mxu2  ;;  %v860_v13 = vpop.f32.mrf.mxu0 }
 0x1e8   : > { %v1037_v10 = vadd.f32 %v1036_v45, %v4675_v24  ;;  %v1125_v11 = vpop.f32.mrf.mxu3  ;;  %v861_v14 = vadd.f32 %v860_v13, %v4670_v15  ;;  %v949_v42 = vpop.f32.mrf.mxu1 }
 0x1ea   : > { %v1126_v61 = vadd.f32 %v1125_v11, %v1037_v10  ;;  %v950_v19 = vadd.f32 %v949_v42, %v861_v14 }
 0x1ec   : > { %v1192_v50 = vmax.f32 %v950_v19, 0.0  ;;  %v1191_v31 = vmax.f32 %v1126_v61, 0.0 }
 0x1ee   : > { %v4861_v23 = vpack.c.bf16 %v1192_v50, %v1190_v21 }
 0x1ef   : > { %v1038_v56 = vpop.f32.mrf.mxu2  ;;  %v1433_v27 = vpop.f32.mrf.mxu0 }
 0x1f0   : > { %v1039_v12 = vadd.f32 %v1038_v56, %v4675_v24  ;;  %v1127_v25 = vpop.f32.mrf.mxu3  ;;  %v1434_v60 = vadd.f32 %v1433_v27, %v4859_v0  ;;  %v1522_v8 = vpop.f32.mrf.mxu1  ;;  %v3860_v24 = vld [vmem:[#allocation11 + $0x24] sm:$0xf] }
 0x1f1   : > { %v3551_v37 = vor.u32 %v3860_v24, %v3548_v22  ;;  %v3874_v24 = vld [vmem:[#allocation11 + $0x94] sm:$0xf] }
 0x1f2   : > { %v1128_v30 = vadd.f32 %v1127_v25, %v1039_v12  ;;  %v1523_v15 = vadd.f32 %v1522_v8, %v1434_v60  ;;  %1472 = vmatmul.bf16.gmra.mxu0 %v4775_v36  ;;  %v3607_v38 = vor.u32 %v3874_v24, %v3604_v34  ;;  %v3596_v24 = vld [vmem:[#allocation11 + $0x88] sm:$0xf0] }
 0x1f3   : > { %1561 = vmatmul.bf16.gmra.mxu1 %v4783_v49  ;;  %2193 = vmatpush.bf16.msra.mxu2 %v3551_v37 }
 0x1f4   : > { %v1193_v33 = vmax.f32 %v1128_v30, 0.0  ;;  %1650 = vmatmul.bf16.gmra.mxu2 %v4775_v36  ;;  %2283 = vmatpush.bf16.msra.mxu3 %v3607_v38 }
 0x1f5   : > { %1739 = vmatmul.bf16.gmra.mxu3 %v4783_v49 }
 0x1f6   : > { %v4871_v39 = vpack.c.bf16 %v1193_v33, %v1191_v31  ;;  %v3858_v31 = vld [vmem:[#allocation11 + $0x14] sm:$0xf]  ;;  %v3540_v33 = vld [vmem:[#allocation11 + $0x18] sm:$0xf0] }
 0x1f7   : > { %v1611_v29 = vpop.f32.mrf.mxu2  ;;  %v1435_v46 = vpop.f32.mrf.mxu0  ;;  %v3543_v22 = vor.u32 %v3858_v31, %v3540_v33  ;;  %v3872_v31 = vld [vmem:[#allocation11 + $0x84] sm:$0xf] }
 0x1f8   : > { %v1612_v40 = vadd.f32 %v1611_v29, %v4868_v9  ;;  %v1700_v44 = vpop.f32.mrf.mxu3  ;;  %v1436_v36 = vadd.f32 %v1435_v46, %v4859_v0  ;;  %v1524_v47 = vpop.f32.mrf.mxu1  ;;  %v3599_v34 = vor.u32 %v3872_v31, %v3596_v24  ;;  %v3780_v31 = vld [vmem:[#allocation14 + $0xf8] sm:$0xf0] }
 0x1f9   : > { %2194 = vmatpush.bf16.msra.mxu2 %v3543_v22 }
 0x1fa   : > { %v1701_v48 = vadd.f32 %v1700_v44, %v1612_v40  ;;  %v1525_v49 = vadd.f32 %v1524_v47, %v1436_v36  ;;  %2284 = vmatpush.bf16.msra.mxu3 %v3599_v34 }
 0x1fc   : > { %v4875_v52 = vpack.c.bf16 %v1525_v49, %v1523_v15  ;;  %v3602_v49 = vld [vmem:[#allocation11 + $0x90] sm:$0xf] }
 0x1fd   : > { %v3603_v59 = vor.u32 %v3875_v54, %v3602_v49 }
 0x1ff   : > { %v1613_v63 = vpop.f32.mrf.mxu2  ;;  %v1438_v4 = vpop.f32.mrf.mxu0  ;;  %2105 = vmatpush.bf16.msra.mxu1 %v3603_v59 }
 0x200   : > { %v1614_v35 = vadd.f32 %v1613_v63, %v4868_v9  ;;  %v1702_v3 = vpop.f32.mrf.mxu3  ;;  %v1439_v5 = vadd.f32 %v1438_v4, %v4859_v0  ;;  %v1527_v6 = vpop.f32.mrf.mxu1 }
 0x202   : > { %v1703_v45 = vadd.f32 %v1702_v3, %v1614_v35  ;;  %v1528_v10 = vadd.f32 %v1527_v6, %v1439_v5  ;;  %1477 = vmatmul.bf16.gmra.mxu0 %v4787_v2 }
 0x203   : > { %1566 = vmatmul.bf16.gmra.mxu1 %v4795_v20 }
 0x204   : > { %v4880_v11 = vpack.c.bf16 %v1703_v45, %v1701_v48  ;;  %1655 = vmatmul.bf16.gmra.mxu2 %v4787_v2  ;;  %v3859_v48 = vld [vmem:[#allocation11 + $0x14] sm:$0xf0] }
 0x205   : > { %1744 = vmatmul.bf16.gmra.mxu3 %v4795_v20 }
 0x207   : > { %v1616_v13 = vpop.f32.mrf.mxu2  ;;  %v1440_v61 = vpop.f32.mrf.mxu0 }
 0x208   : > { %v1617_v14 = vadd.f32 %v1616_v13, %v4868_v9  ;;  %v1705_v42 = vpop.f32.mrf.mxu3  ;;  %v1441_v17 = vadd.f32 %v1440_v61, %v4859_v0  ;;  %v1529_v19 = vpop.f32.mrf.mxu1 }
 0x20a   : > { %v1706_v21 = vadd.f32 %v1705_v42, %v1617_v14  ;;  %v1530_v50 = vadd.f32 %v1529_v19, %v1441_v17 }
 0x20c   : > { %v4887_v56 = vpack.c.bf16 %v1530_v50, %v1528_v10 }
 0x20f   : > { %v1618_v12 = vpop.f32.mrf.mxu2  ;;  %v1443_v60 = vpop.f32.mrf.mxu0 }
 0x210   : > { %v1619_v25 = vadd.f32 %v1618_v12, %v4868_v9  ;;  %v1707_v27 = vpop.f32.mrf.mxu3  ;;  %v1444_v2 = vadd.f32 %v1443_v60, %v4859_v0  ;;  %v1532_v20 = vpop.f32.mrf.mxu1 }
 0x212   : > { %v1708_v8 = vadd.f32 %v1707_v27, %v1619_v25  ;;  %v1533_v30 = vadd.f32 %v1532_v20, %v1444_v2  ;;  %1482 = vmatmul.bf16.gmra.mxu0 %v4799_v43 }
 0x213   : > { %1571 = vmatmul.bf16.gmra.mxu1 %v4807_v57 }
 0x214   : > { %v4892_v15 = vpack.c.bf16 %v1708_v8, %v1706_v21  ;;  %1660 = vmatmul.bf16.gmra.mxu2 %v4799_v43  ;;  %v3856_v8 = vld [vmem:[#allocation11 + $0x4] sm:$0xf] }
 0x215   : > { %1749 = vmatmul.bf16.gmra.mxu3 %v4807_v57  ;;  %v3538_v57 = vld [vmem:[#allocation11 + $0x10] sm:$0xf] }
 0x216   : > { %v3539_v53 = vor.u32 %v3859_v48, %v3538_v57  ;;  %v3873_v48 = vld [vmem:[#allocation11 + $0x84] sm:$0xf0] }
 0x217   : > { %v1621_v37 = vpop.f32.mrf.mxu2  ;;  %v1445_v40 = vpop.f32.mrf.mxu0 }
 0x218   : > { %v1622_v29 = vadd.f32 %v1621_v37, %v4868_v9  ;;  %v1710_v41 = vpop.f32.mrf.mxu3  ;;  %v1446_v44 = vadd.f32 %v1445_v40, %v4859_v0  ;;  %v1534_v46 = vpop.f32.mrf.mxu1  ;;  %2016 = vmatpush.bf16.msra.mxu0 %v3539_v53 }
 0x21a   : > { %v1711_v36 = vadd.f32 %v1710_v41, %v1622_v29  ;;  %v1535_v43 = vadd.f32 %v1534_v46, %v1446_v44 }
 0x21c   : > { %v4899_v47 = vpack.c.bf16 %v1535_v43, %v1533_v30  ;;  %v3532_v30 = vld [vmem:[#allocation11 + $0x8] sm:$0xf0]  ;;  %v3594_v43 = vld [vmem:[#allocation11 + $0x80] sm:$0xf] }
 0x21d   : > { %v3535_v33 = vor.u32 %v3856_v8, %v3532_v30  ;;  %v3595_v53 = vor.u32 %v3873_v48, %v3594_v43  ;;  %v3918_v8 = vld [vmem:[#allocation14 + $0xf4] sm:$0xf] }
 0x21e   : > { %v3783_v24 = vor.u32 %v3918_v8, %v3780_v31  ;;  %v3772_v8 = vld [vmem:[#allocation14 + $0xe8] sm:$0xf0] }
 0x21f   : > { %v1623_v55 = vpop.f32.mrf.mxu2  ;;  %v1448_v1 = vpop.f32.mrf.mxu0  ;;  %2195 = vmatpush.bf16.msra.mxu2 %v3535_v33  ;;  %2106 = vmatpush.bf16.msra.mxu1 %v3595_v53 }
 0x220   : > { %v1624_v62 = vadd.f32 %v1623_v55, %v4868_v9  ;;  %v1712_v63 = vpop.f32.mrf.mxu3  ;;  %v1449_v35 = vadd.f32 %v1448_v1, %v4859_v0  ;;  %v1537_v3 = vpop.f32.mrf.mxu1  ;;  %2927 = vmatpush.bf16.msrb.mxu3 %v3783_v24 }
 0x222   : > { %v1713_v4 = vadd.f32 %v1712_v63, %v1624_v62  ;;  %v1538_v5 = vadd.f32 %v1537_v3, %v1449_v35  ;;  %1487 = vmatmul.bf16.gmra.mxu0 %v4811_v7 }
 0x223   : > { %1576 = vmatmul.bf16.gmra.mxu1 %v4819_v26 }
 0x224   : > { %v4904_v6 = vpack.c.bf16 %v1713_v4, %v1711_v36  ;;  %1665 = vmatmul.bf16.gmra.mxu2 %v4811_v7  ;;  %v3857_v36 = vld [vmem:[#allocation11 + $0x4] sm:$0xf0] }
 0x225   : > { %1754 = vmatmul.bf16.gmra.mxu3 %v4819_v26 }
 0x227   : > { %v1626_v45 = vpop.f32.mrf.mxu2  ;;  %v1450_v14 = vpop.f32.mrf.mxu0 }
 0x228   : > { %v1627_v10 = vadd.f32 %v1626_v45, %v4868_v9  ;;  %v1715_v13 = vpop.f32.mrf.mxu3  ;;  %v1451_v42 = vadd.f32 %v1450_v14, %v4859_v0  ;;  %v1539_v61 = vpop.f32.mrf.mxu1 }
 0x22a   : > { %v1716_v17 = vadd.f32 %v1715_v13, %v1627_v10  ;;  %v1540_v19 = vadd.f32 %v1539_v61, %v1451_v42 }
 0x22c   : > { %v4911_v21 = vpack.c.bf16 %v1540_v19, %v1538_v5 }
 0x22f   : > { %v1628_v50 = vpop.f32.mrf.mxu2  ;;  %v1453_v27 = vpop.f32.mrf.mxu0 }
 0x230   : > { %v1629_v12 = vadd.f32 %v1628_v50, %v4868_v9  ;;  %v1717_v25 = vpop.f32.mrf.mxu3  ;;  %v1454_v7 = vadd.f32 %v1453_v27, %v4859_v0  ;;  %v1542_v26 = vpop.f32.mrf.mxu1 }
 0x232   : > { %v1718_v60 = vadd.f32 %v1717_v25, %v1629_v12  ;;  %v1543_v2 = vadd.f32 %v1542_v26, %v1454_v7  ;;  %1492 = vmatmul.bf16.gmra.mxu0 %v4823_v51 }
 0x233   : > { %1581 = vmatmul.bf16.gmra.mxu1 %v4831_v18 }
 0x234   : > { %v4916_v20 = vpack.c.bf16 %v1718_v60, %v1716_v17  ;;  %1670 = vmatmul.bf16.gmra.mxu2 %v4823_v51  ;;  %v3902_v60 = vld [vmem:[#allocation14 + $0x74] sm:$0xf] }
 0x235   : > { %1759 = vmatmul.bf16.gmra.mxu3 %v4831_v18  ;;  %v3530_v18 = vld [vmem:[#allocation11] sm:$0xf] }
 0x236   : > { %v3531_v57 = vor.u32 %v3857_v36, %v3530_v18  ;;  %v3919_v36 = vld [vmem:[#allocation14 + $0xf4] sm:$0xf0] }
 0x237   : > { %v1631_v22 = vpop.f32.mrf.mxu2  ;;  %v1455_v29 = vpop.f32.mrf.mxu0 }
 0x238   : > { %v1632_v37 = vadd.f32 %v1631_v22, %v4868_v9  ;;  %v1720_v38 = vpop.f32.mrf.mxu3  ;;  %v1456_v41 = vadd.f32 %v1455_v29, %v4859_v0  ;;  %v1544_v40 = vpop.f32.mrf.mxu1  ;;  %2017 = vmatpush.bf16.msra.mxu0 %v3531_v57 }
 0x23a   : > { %v1721_v44 = vadd.f32 %v1720_v38, %v1632_v37  ;;  %v1545_v51 = vadd.f32 %v1544_v40, %v1456_v41 }
 0x23c   : > { %v4923_v46 = vpack.c.bf16 %v1545_v51, %v1543_v2  ;;  %v3716_v2 = vld [vmem:[#allocation14 + $0x78] sm:$0xf0]  ;;  %v3778_v51 = vld [vmem:[#allocation14 + $0xf0] sm:$0xf] }
 0x23d   : > { %v3719_v30 = vor.u32 %v3902_v60, %v3716_v2  ;;  %v3779_v57 = vor.u32 %v3919_v36, %v3778_v51  ;;  %v3916_v60 = vld [vmem:[#allocation14 + $0xe4] sm:$0xf] }
 0x23e   : > { %v3775_v31 = vor.u32 %v3916_v60, %v3772_v8  ;;  %v3764_v60 = vld [vmem:[#allocation14 + $0xd8] sm:$0xf0] }
 0x23f   : > { %v1633_v49 = vpop.f32.mrf.mxu2  ;;  %v1458_v59 = vpop.f32.mrf.mxu0  ;;  %2838 = vmatpush.bf16.msrb.mxu2 %v3719_v30  ;;  %2749 = vmatpush.bf16.msrb.mxu1 %v3779_v57 }
 0x240   : > { %v1634_v54 = vadd.f32 %v1633_v49, %v4868_v9  ;;  %v1722_v55 = vpop.f32.mrf.mxu3  ;;  %v1459_v62 = vadd.f32 %v1458_v59, %v4859_v0  ;;  %v1547_v63 = vpop.f32.mrf.mxu1  ;;  %2928 = vmatpush.bf16.msrb.mxu3 %v3775_v31 }
 0x242   : > { %v1723_v1 = vadd.f32 %v1722_v55, %v1634_v54  ;;  %v1548_v35 = vadd.f32 %v1547_v63, %v1459_v62  ;;  %1497 = vmatmul.bf16.gmra.mxu0 %v4835_v16 }
 0x243   : > { %1586 = vmatmul.bf16.gmra.mxu1 %v4843_v32 }
 0x244   : > { %v4928_v3 = vpack.c.bf16 %v1723_v1, %v1721_v44  ;;  %1675 = vmatmul.bf16.gmra.mxu2 %v4835_v16  ;;  %v3903_v44 = vld [vmem:[#allocation14 + $0x74] sm:$0xf0] }
 0x245   : > { %1764 = vmatmul.bf16.gmra.mxu3 %v4843_v32 }
 0x247   : > { %v1636_v4 = vpop.f32.mrf.mxu2  ;;  %v1460_v10 = vpop.f32.mrf.mxu0 }
 0x248   : > { %v1637_v5 = vadd.f32 %v1636_v4, %v4868_v9  ;;  %v1725_v45 = vpop.f32.mrf.mxu3  ;;  %v1461_v13 = vadd.f32 %v1460_v10, %v4859_v0  ;;  %v1549_v14 = vpop.f32.mrf.mxu1 }
 0x24a   : > { %v1726_v42 = vadd.f32 %v1725_v45, %v1637_v5  ;;  %v1550_v61 = vadd.f32 %v1549_v14, %v1461_v13 }
 0x24c   : > { %v4935_v17 = vpack.c.bf16 %v1550_v61, %v1548_v35 }
 0x24f   : > { %v1638_v19 = vpop.f32.mrf.mxu2  ;;  %v1463_v25 = vpop.f32.mrf.mxu0 }
 0x250   : > { %v1639_v50 = vadd.f32 %v1638_v19, %v4868_v9  ;;  %v1727_v12 = vpop.f32.mrf.mxu3  ;;  %v1464_v16 = vadd.f32 %v1463_v25, %v4859_v0  ;;  %v1552_v32 = vpop.f32.mrf.mxu1 }
 0x252   : > { %v1728_v27 = vadd.f32 %v1727_v12, %v1639_v50  ;;  %v1553_v7 = vadd.f32 %v1552_v32, %v1464_v16  ;;  %1502 = vmatmul.bf16.gmra.mxu0 %v4847_v58 }
 0x253   : > { %1591 = vmatmul.bf16.gmra.mxu1 %v4855_v28 }
 0x254   : > { %v4940_v26 = vpack.c.bf16 %v1728_v27, %v1726_v42  ;;  %1680 = vmatmul.bf16.gmra.mxu2 %v4847_v58  ;;  %v3900_v27 = vld [vmem:[#allocation14 + $0x64] sm:$0xf] }
 0x255   : > { %1769 = vmatmul.bf16.gmra.mxu3 %v4855_v28  ;;  %v3714_v28 = vld [vmem:[#allocation14 + $0x70] sm:$0xf] }
 0x256   : > { %v3715_v18 = vor.u32 %v3903_v44, %v3714_v28  ;;  %v3917_v44 = vld [vmem:[#allocation14 + $0xe4] sm:$0xf0] }
 0x257   : > { %v1641_v33 = vpop.f32.mrf.mxu2  ;;  %v1465_v37 = vpop.f32.mrf.mxu0 }
 0x258   : > { %v1642_v22 = vadd.f32 %v1641_v33, %v4868_v9  ;;  %v1730_v34 = vpop.f32.mrf.mxu3  ;;  %v1466_v38 = vadd.f32 %v1465_v37, %v4859_v0  ;;  %v1554_v29 = vpop.f32.mrf.mxu1  ;;  %2660 = vmatpush.bf16.msrb.mxu0 %v3715_v18 }
 0x25a   : > { %v1731_v41 = vadd.f32 %v1730_v34, %v1642_v22  ;;  %v1555_v58 = vadd.f32 %v1554_v29, %v1466_v38 }
 0x25c   : > { %v4947_v40 = vpack.c.bf16 %v1555_v58, %v1553_v7  ;;  %v3708_v7 = vld [vmem:[#allocation14 + $0x68] sm:$0xf0]  ;;  %v3770_v58 = vld [vmem:[#allocation14 + $0xe0] sm:$0xf] }
 0x25d   : > { %v3711_v2 = vor.u32 %v3900_v27, %v3708_v7  ;;  %v3771_v18 = vor.u32 %v3917_v44, %v3770_v58  ;;  %v3914_v27 = vld [vmem:[#allocation14 + $0xd4] sm:$0xf] }
 0x25e   : > { %v3767_v8 = vor.u32 %v3914_v27, %v3764_v60  ;;  %v3756_v27 = vld [vmem:[#allocation14 + $0xc8] sm:$0xf0] }
 0x25f   : > { %v1643_v43 = vpop.f32.mrf.mxu2  ;;  %v1468_v53 = vpop.f32.mrf.mxu0  ;;  %2839 = vmatpush.bf16.msrb.mxu2 %v3711_v2  ;;  %2750 = vmatpush.bf16.msrb.mxu1 %v3771_v18 }
 0x260   : > { %v1644_v48 = vadd.f32 %v1643_v43, %v4868_v9  ;;  %v1732_v49 = vpop.f32.mrf.mxu3  ;;  %v1469_v54 = vadd.f32 %v1468_v53, %v4859_v0  ;;  %v1557_v55 = vpop.f32.mrf.mxu1  ;;  %2929 = vmatpush.bf16.msrb.mxu3 %v3767_v8 }
 0x262   : > { %v1733_v59 = vadd.f32 %v1732_v49, %v1644_v48  ;;  %v1558_v62 = vadd.f32 %v1557_v55, %v1469_v54  ;;  %1507 = vmatmul.bf16.gmra.mxu0 %v4861_v23 }
 0x263   : > { %1596 = vmatmul.bf16.gmra.mxu1 %v4871_v39 }
 0x264   : > { %v4952_v63 = vpack.c.bf16 %v1733_v59, %v1731_v41  ;;  %1685 = vmatmul.bf16.gmra.mxu2 %v4861_v23  ;;  %v3901_v41 = vld [vmem:[#allocation14 + $0x64] sm:$0xf0] }
 0x265   : > { %1774 = vmatmul.bf16.gmra.mxu3 %v4871_v39 }
 0x267   : > { %v1646_v1 = vpop.f32.mrf.mxu2  ;;  %v1470_v5 = vpop.f32.mrf.mxu0 }
 0x268   : > { %v1647_v35 = vadd.f32 %v1646_v1, %v4868_v9  ;;  %v1735_v4 = vpop.f32.mrf.mxu3  ;;  %v1471_v45 = vadd.f32 %v1470_v5, %v4859_v0  ;;  %v1559_v10 = vpop.f32.mrf.mxu1 }
 0x26a   : > { %v1736_v13 = vadd.f32 %v1735_v4, %v1647_v35  ;;  %v1560_v14 = vadd.f32 %v1559_v10, %v1471_v45 }
 0x26c   : > { %v4959_v42 = vpack.c.bf16 %v1560_v14, %v1558_v62 }
 0x26f   : > { %v1648_v61 = vpop.f32.mrf.mxu2  ;;  %v1473_v12 = vpop.f32.mrf.mxu0 }
 0x270   : > { %v1649_v19 = vadd.f32 %v1648_v61, %v4868_v9  ;;  %v1737_v50 = vpop.f32.mrf.mxu3  ;;  %v1474_v23 = vadd.f32 %v1473_v12, %v4859_v0  ;;  %v1562_v39 = vpop.f32.mrf.mxu1 }
 0x272   : > { %v1738_v25 = vadd.f32 %v1737_v50, %v1649_v19  ;;  %v1563_v16 = vadd.f32 %v1562_v39, %v1474_v23  ;;  %2018 = vmatmul.bf16.vlgmr.msra.gmra.mxu0 %v4875_v52 }
 0x273   : > { %2107 = vmatmul.bf16.vlgmr.msra.gmra.mxu1 %v4880_v11 }
 0x274   : > { %v4964_v32 = vpack.c.bf16 %v1738_v25, %v1736_v13  ;;  %2196 = vmatmul.bf16.vlgmr.msra.gmra.mxu2 %v4875_v52  ;;  %v3898_v25 = vld [vmem:[#allocation14 + $0x54] sm:$0xf] }
 0x275   : > { %2285 = vmatmul.bf16.vlgmr.msra.gmra.mxu3 %v4880_v11  ;;  %v3706_v11 = vld [vmem:[#allocation14 + $0x60] sm:$0xf] }
 0x276   : > { %v3707_v28 = vor.u32 %v3901_v41, %v3706_v11  ;;  %v3915_v41 = vld [vmem:[#allocation14 + $0xd4] sm:$0xf0] }
 0x277   : > { %v1651_v30 = vpop.f32.mrf.mxu2  ;;  %v1475_v22 = vpop.f32.mrf.mxu0 }
 0x278   : > { %v1652_v33 = vadd.f32 %v1651_v30, %v4868_v9  ;;  %v1740_v24 = vpop.f32.mrf.mxu3  ;;  %v1476_v34 = vadd.f32 %v1475_v22, %v4859_v0  ;;  %v1564_v37 = vpop.f32.mrf.mxu1  ;;  %2661 = vmatpush.bf16.msrb.mxu0 %v3707_v28 }
 0x27a   : > { %v1741_v38 = vadd.f32 %v1740_v24, %v1652_v33  ;;  %v1565_v52 = vadd.f32 %v1564_v37, %v1476_v34 }
 0x27c   : > { %v4971_v29 = vpack.c.bf16 %v1565_v52, %v1563_v16  ;;  %v3700_v16 = vld [vmem:[#allocation14 + $0x58] sm:$0xf0]  ;;  %v3762_v52 = vld [vmem:[#allocation14 + $0xd0] sm:$0xf] }
 0x27d   : > { %v3703_v7 = vor.u32 %v3898_v25, %v3700_v16  ;;  %v3763_v28 = vor.u32 %v3915_v41, %v3762_v52  ;;  %v3912_v25 = vld [vmem:[#allocation14 + $0xc4] sm:$0xf] }
 0x27e   : > { %v3759_v60 = vor.u32 %v3912_v25, %v3756_v27  ;;  %v3748_v25 = vld [vmem:[#allocation14 + $0xb8] sm:$0xf0] }
 0x27f   : > { %v1653_v51 = vpop.f32.mrf.mxu2  ;;  %v1478_v57 = vpop.f32.mrf.mxu0  ;;  %2840 = vmatpush.bf16.msrb.mxu2 %v3703_v7  ;;  %2751 = vmatpush.bf16.msrb.mxu1 %v3763_v28 }
 0x280   : > { %v1654_v36 = vadd.f32 %v1653_v51, %v4868_v9  ;;  %v1742_v43 = vpop.f32.mrf.mxu3  ;;  %v1479_v48 = vadd.f32 %v1478_v57, %v4859_v0  ;;  %v1567_v49 = vpop.f32.mrf.mxu1  ;;  %2930 = vmatpush.bf16.msrb.mxu3 %v3759_v60 }
 0x282   : > { %v1743_v53 = vadd.f32 %v1742_v43, %v1654_v36  ;;  %v1568_v54 = vadd.f32 %v1567_v49, %v1479_v48  ;;  %2023 = vmatmul.bf16.gmra.mxu0 %v4887_v56 }
 0x283   : > { %2112 = vmatmul.bf16.gmra.mxu1 %v4892_v15 }
 0x284   : > { %v4976_v55 = vpack.c.bf16 %v1743_v53, %v1741_v38  ;;  %2201 = vmatmul.bf16.gmra.mxu2 %v4887_v56  ;;  %v3899_v38 = vld [vmem:[#allocation14 + $0x54] sm:$0xf0] }
 0x285   : > { %2290 = vmatmul.bf16.gmra.mxu3 %v4892_v15 }
 0x287   : > { %v1656_v59 = vpop.f32.mrf.mxu2  ;;  %v1480_v35 = vpop.f32.mrf.mxu0 }
 0x288   : > { %v1657_v62 = vadd.f32 %v1656_v59, %v4868_v9  ;;  %v1745_v1 = vpop.f32.mrf.mxu3  ;;  %v1481_v4 = vadd.f32 %v1480_v35, %v4859_v0  ;;  %v1569_v5 = vpop.f32.mrf.mxu1 }
 0x28a   : > { %v1746_v45 = vadd.f32 %v1745_v1, %v1657_v62  ;;  %v1570_v10 = vadd.f32 %v1569_v5, %v1481_v4 }
 0x28c   : > { %v4983_v13 = vpack.c.bf16 %v1570_v10, %v1568_v54 }
 0x28f   : > { %v1658_v14 = vpop.f32.mrf.mxu2  ;;  %v1483_v50 = vpop.f32.mrf.mxu0 }
 0x290   : > { %v1659_v61 = vadd.f32 %v1658_v14, %v4868_v9  ;;  %v1747_v19 = vpop.f32.mrf.mxu3  ;;  %v1484_v56 = vadd.f32 %v1483_v50, %v4859_v0  ;;  %v1572_v15 = vpop.f32.mrf.mxu1 }
 0x292   : > { %v1748_v12 = vadd.f32 %v1747_v19, %v1659_v61  ;;  %v1573_v23 = vadd.f32 %v1572_v15, %v1484_v56  ;;  %2028 = vmatmul.bf16.gmra.mxu0 %v4899_v47 }
 0x293   : > { %2117 = vmatmul.bf16.gmra.mxu1 %v4904_v6 }
 0x294   : > { %v4988_v39 = vpack.c.bf16 %v1748_v12, %v1746_v45  ;;  %2206 = vmatmul.bf16.gmra.mxu2 %v4899_v47  ;;  %v3896_v12 = vld [vmem:[#allocation14 + $0x44] sm:$0xf] }
 0x295   : > { %2295 = vmatmul.bf16.gmra.mxu3 %v4904_v6  ;;  %v3698_v6 = vld [vmem:[#allocation14 + $0x50] sm:$0xf] }
 0x296   : > { %v3699_v11 = vor.u32 %v3899_v38, %v3698_v6  ;;  %v3913_v38 = vld [vmem:[#allocation14 + $0xc4] sm:$0xf0] }
 0x297   : > { %v1661_v2 = vpop.f32.mrf.mxu2  ;;  %v1485_v33 = vpop.f32.mrf.mxu0 }
 0x298   : > { %v1662_v30 = vadd.f32 %v1661_v2, %v4868_v9  ;;  %v1750_v31 = vpop.f32.mrf.mxu3  ;;  %v1486_v24 = vadd.f32 %v1485_v33, %v4859_v0  ;;  %v1574_v22 = vpop.f32.mrf.mxu1  ;;  %2662 = vmatpush.bf16.msrb.mxu0 %v3699_v11 }
 0x29a   : > { %v1751_v34 = vadd.f32 %v1750_v31, %v1662_v30  ;;  %v1575_v47 = vadd.f32 %v1574_v22, %v1486_v24 }
 0x29c   : > { %v4995_v37 = vpack.c.bf16 %v1575_v47, %v1573_v23  ;;  %v3692_v23 = vld [vmem:[#allocation14 + $0x48] sm:$0xf0]  ;;  %v3754_v47 = vld [vmem:[#allocation14 + $0xc0] sm:$0xf] }
 0x29d   : > { %v3695_v16 = vor.u32 %v3896_v12, %v3692_v23  ;;  %v3755_v11 = vor.u32 %v3913_v38, %v3754_v47  ;;  %v3910_v12 = vld [vmem:[#allocation14 + $0xb4] sm:$0xf] }
 0x29e   : > { %v3751_v27 = vor.u32 %v3910_v12, %v3748_v25  ;;  %v3908_v12 = vld [vmem:[#allocation14 + $0xa4] sm:$0xf] }
 0x29f   : > { %v1663_v58 = vpop.f32.mrf.mxu2  ;;  %v1488_v18 = vpop.f32.mrf.mxu0  ;;  %2841 = vmatpush.bf16.msrb.mxu2 %v3695_v16  ;;  %2752 = vmatpush.bf16.msrb.mxu1 %v3755_v11 }
 0x2a0   : > { %v1664_v44 = vadd.f32 %v1663_v58, %v4868_v9  ;;  %v1752_v51 = vpop.f32.mrf.mxu3  ;;  %v1489_v36 = vadd.f32 %v1488_v18, %v4859_v0  ;;  %v1577_v43 = vpop.f32.mrf.mxu1  ;;  %2931 = vmatpush.bf16.msrb.mxu3 %v3751_v27 }
 0x2a2   : > { %v1753_v57 = vadd.f32 %v1752_v51, %v1664_v44  ;;  %v1578_v48 = vadd.f32 %v1577_v43, %v1489_v36  ;;  %2033 = vmatmul.bf16.gmra.mxu0 %v4911_v21 }
 0x2a3   : > { %2122 = vmatmul.bf16.gmra.mxu1 %v4916_v20 }
 0x2a4   : > { %v5000_v49 = vpack.c.bf16 %v1753_v57, %v1751_v34  ;;  %2211 = vmatmul.bf16.gmra.mxu2 %v4911_v21  ;;  %v3897_v34 = vld [vmem:[#allocation14 + $0x44] sm:$0xf0] }
 0x2a5   : > { %2300 = vmatmul.bf16.gmra.mxu3 %v4916_v20 }
 0x2a7   : > { %v1666_v53 = vpop.f32.mrf.mxu2  ;;  %v1490_v62 = vpop.f32.mrf.mxu0 }
 0x2a8   : > { %v1667_v54 = vadd.f32 %v1666_v53, %v4868_v9  ;;  %v1755_v59 = vpop.f32.mrf.mxu3  ;;  %v1491_v1 = vadd.f32 %v1490_v62, %v4859_v0  ;;  %v1579_v35 = vpop.f32.mrf.mxu1 }
 0x2aa   : > { %v1756_v4 = vadd.f32 %v1755_v59, %v1667_v54  ;;  %v1580_v5 = vadd.f32 %v1579_v35, %v1491_v1 }
 0x2ac   : > { %v5007_v45 = vpack.c.bf16 %v1580_v5, %v1578_v48 }
 0x2af   : > { %v1668_v10 = vpop.f32.mrf.mxu2  ;;  %v1493_v19 = vpop.f32.mrf.mxu0 }
 0x2b0   : > { %v1669_v14 = vadd.f32 %v1668_v10, %v4868_v9  ;;  %v1757_v61 = vpop.f32.mrf.mxu3  ;;  %v1494_v21 = vadd.f32 %v1493_v19, %v4859_v0  ;;  %v1582_v20 = vpop.f32.mrf.mxu1 }
 0x2b2   : > { %v1758_v50 = vadd.f32 %v1757_v61, %v1669_v14  ;;  %v1583_v56 = vadd.f32 %v1582_v20, %v1494_v21  ;;  %2038 = vmatmul.bf16.gmra.mxu0 %v4923_v46 }
 0x2b3   : > { %2127 = vmatmul.bf16.gmra.mxu1 %v4928_v3 }
 0x2b4   : > { %v5012_v15 = vpack.c.bf16 %v1758_v50, %v1756_v4  ;;  %2216 = vmatmul.bf16.gmra.mxu2 %v4923_v46  ;;  %v3894_v50 = vld [vmem:[#allocation14 + $0x34] sm:$0xf] }
 0x2b5   : > { %2305 = vmatmul.bf16.gmra.mxu3 %v4928_v3  ;;  %v3690_v3 = vld [vmem:[#allocation14 + $0x40] sm:$0xf] }
 0x2b6   : > { %v3691_v6 = vor.u32 %v3897_v34, %v3690_v3  ;;  %v3746_v3 = vld [vmem:[#allocation14 + $0xb0] sm:$0xf] }
 0x2b7   : > { %v1671_v7 = vpop.f32.mrf.mxu2  ;;  %v1495_v30 = vpop.f32.mrf.mxu0 }
 0x2b8   : > { %v1672_v2 = vadd.f32 %v1671_v7, %v4868_v9  ;;  %v1760_v8 = vpop.f32.mrf.mxu3  ;;  %v1496_v31 = vadd.f32 %v1495_v30, %v4859_v0  ;;  %v1584_v33 = vpop.f32.mrf.mxu1  ;;  %2663 = vmatpush.bf16.msrb.mxu0 %v3691_v6 }
 0x2ba   : > { %v1761_v24 = vadd.f32 %v1760_v8, %v1672_v2  ;;  %v1585_v46 = vadd.f32 %v1584_v33, %v1496_v31 }
 0x2bc   : > { %v5019_v22 = vpack.c.bf16 %v1585_v46, %v1583_v56  ;;  %v3684_v56 = vld [vmem:[#allocation14 + $0x38] sm:$0xf0]  ;;  %v3895_v46 = vld [vmem:[#allocation14 + $0x34] sm:$0xf0] }
 0x2bd   : > { %v3687_v23 = vor.u32 %v3894_v50, %v3684_v56  ;;  %v3676_v50 = vld [vmem:[#allocation14 + $0x28] sm:$0xf0] }
 0x2bf   : > { %v1673_v52 = vpop.f32.mrf.mxu2  ;;  %v1498_v28 = vpop.f32.mrf.mxu0  ;;  %2842 = vmatpush.bf16.msrb.mxu2 %v3687_v23  ;;  %v3740_v23 = vld [vmem:[#allocation14 + $0xa8] sm:$0xf0] }
 0x2c0   : > { %v1674_v41 = vadd.f32 %v1673_v52, %v4868_v9  ;;  %v1762_v58 = vpop.f32.mrf.mxu3  ;;  %v1499_v44 = vadd.f32 %v1498_v28, %v4859_v0  ;;  %v1587_v51 = vpop.f32.mrf.mxu1  ;;  %v3911_v52 = vld [vmem:[#allocation14 + $0xb4] sm:$0xf0] }
 0x2c2   : > { %v1763_v18 = vadd.f32 %v1762_v58, %v1674_v41  ;;  %v1588_v36 = vadd.f32 %v1587_v51, %v1499_v44  ;;  %2043 = vmatmul.bf16.gmra.mxu0 %v4935_v17  ;;  %v3747_v58 = vor.u32 %v3911_v52, %v3746_v3  ;;  %v3909_v3 = vld [vmem:[#allocation14 + $0xa4] sm:$0xf0] }
 0x2c3   : > { %2132 = vmatmul.bf16.gmra.mxu1 %v4940_v26 }
 0x2c4   : > { %v5024_v43 = vpack.c.bf16 %v1763_v18, %v1761_v24  ;;  %2221 = vmatmul.bf16.gmra.mxu2 %v4935_v17  ;;  %v3682_v24 = vld [vmem:[#allocation14 + $0x30] sm:$0xf]  ;;  %2753 = vmatpush.bf16.msrb.mxu1 %v3747_v58 }
 0x2c5   : > { %2310 = vmatmul.bf16.gmra.mxu3 %v4940_v26  ;;  %v3683_v38 = vor.u32 %v3895_v46, %v3682_v24  ;;  %v3738_v46 = vld [vmem:[#allocation14 + $0xa0] sm:$0xf] }
 0x2c7   : > { %v1676_v57 = vpop.f32.mrf.mxu2  ;;  %v1500_v54 = vpop.f32.mrf.mxu0  ;;  %2664 = vmatpush.bf16.msrb.mxu0 %v3683_v38 }
 0x2c8   : > { %v1677_v48 = vadd.f32 %v1676_v57, %v4868_v9  ;;  %v1765_v53 = vpop.f32.mrf.mxu3  ;;  %v1501_v59 = vadd.f32 %v1500_v54, %v4859_v0  ;;  %v1589_v62 = vpop.f32.mrf.mxu1 }
 0x2ca   : > { %v1766_v1 = vadd.f32 %v1765_v53, %v1677_v48  ;;  %v1590_v35 = vadd.f32 %v1589_v62, %v1501_v59  ;;  %v1844_v62 = vld [vmem:[#allocation13] sm:$0x3] }
 0x2cc   : > { %v5031_v4 = vpack.c.bf16 %v1590_v35, %v1588_v36 }
 0x2cf   : > { %v1678_v5 = vpop.f32.mrf.mxu2  ;;  %v1503_v61 = vpop.f32.mrf.mxu0 }
 0x2d0   : > { %v1679_v10 = vadd.f32 %v1678_v5, %v4868_v9  ;;  %v1767_v14 = vpop.f32.mrf.mxu3  ;;  %v1504_v17 = vadd.f32 %v1503_v61, %v4859_v0  ;;  %v1592_v26 = vpop.f32.mrf.mxu1  ;;  %v5057_v5 = vperm.slane %v1844_v62, 0 }
 0x2d2   : > { %v1768_v19 = vadd.f32 %v1767_v14, %v1679_v10  ;;  %v1593_v21 = vadd.f32 %v1592_v26, %v1504_v17  ;;  %2048 = vmatmul.bf16.gmra.mxu0 %v4947_v40 }
 0x2d3   : > { %2137 = vmatmul.bf16.gmra.mxu1 %v4952_v63 }
 0x2d4   : > { %v5036_v20 = vpack.c.bf16 %v1768_v19, %v1766_v1  ;;  %2226 = vmatmul.bf16.gmra.mxu2 %v4947_v40 }
 0x2d5   : > { %2315 = vmatmul.bf16.gmra.mxu3 %v4952_v63 }
 0x2d7   : > { %v1681_v16 = vpop.f32.mrf.mxu2  ;;  %v1505_v2 = vpop.f32.mrf.mxu0 }
 0x2d8   : > { %v1682_v7 = vadd.f32 %v1681_v16, %v4868_v9  ;;  %v1770_v60 = vpop.f32.mrf.mxu3  ;;  %v1506_v8 = vadd.f32 %v1505_v2, %v4859_v0  ;;  %v1594_v30 = vpop.f32.mrf.mxu1  ;;  %v3743_v16 = vor.u32 %v3908_v12, %v3740_v23 }
 0x2da   : > { %v1771_v31 = vadd.f32 %v1770_v60, %v1682_v7  ;;  %v1595_v40 = vadd.f32 %v1594_v30, %v1506_v8  ;;  %2932 = vmatpush.bf16.msrb.mxu3 %v3743_v16  ;;  %v3668_v16 = vld [vmem:[#allocation14 + $0x18] sm:$0xf0] }
 0x2dc   : > { %v5043_v33 = vpack.c.bf16 %v1595_v40, %v1593_v21  ;;  %v5066_v21 = vperm.slane %v1844_v62, 1  ;;  %v3674_v40 = vld [vmem:[#allocation14 + $0x20] sm:$0xf] }
 0x2df   : > { %v1683_v63 = vpop.f32.mrf.mxu2  ;;  %v1508_v6 = vpop.f32.mrf.mxu0 }
 0x2e0   : > { %v1684_v34 = vadd.f32 %v1683_v63, %v4868_v9  ;;  %v1772_v47 = vpop.f32.mrf.mxu3  ;;  %v1509_v11 = vadd.f32 %v1508_v6, %v4859_v0  ;;  %v1597_v41 = vpop.f32.mrf.mxu1  ;;  %v3893_v63 = vld [vmem:[#allocation14 + $0x24] sm:$0xf0]  ;;  %v3739_v6 = vor.u32 %v3909_v3, %v3738_v46  ;;  %v3666_v3 = vld [vmem:[#allocation14 + $0x10] sm:$0xf] }
 0x2e1   : > { %v3675_v24 = vor.u32 %v3893_v63, %v3674_v40 }
 0x2e2   : > { %v1773_v28 = vadd.f32 %v1772_v47, %v1684_v34  ;;  %v1598_v44 = vadd.f32 %v1597_v41, %v1509_v11  ;;  %2053 = vmatmul.bf16.gmra.mxu0 %v4959_v42  ;;  %2754 = vmatpush.bf16.msrb.mxu1 %v3739_v6 }
 0x2e3   : > { %2142 = vmatmul.bf16.gmra.mxu1 %v4964_v32  ;;  %2665 = vmatpush.bf16.msrb.mxu0 %v3675_v24 }
 0x2e4   : > { %v5048_v51 = vpack.c.bf16 %v1773_v28, %v1771_v31  ;;  %2231 = vmatmul.bf16.gmra.mxu2 %v4959_v42 }
 0x2e5   : > { %2320 = vmatmul.bf16.gmra.mxu3 %v4964_v32 }
 0x2e7   : > { %v1686_v18 = vpop.f32.mrf.mxu2  ;;  %v1510_v48 = vpop.f32.mrf.mxu0 }
 0x2e8   : > { %v1687_v36 = vadd.f32 %v1686_v18, %v4868_v9  ;;  %v1775_v57 = vpop.f32.mrf.mxu3  ;;  %v1511_v53 = vadd.f32 %v1510_v48, %v4859_v0  ;;  %v1599_v54 = vpop.f32.mrf.mxu1 }
 0x2ea   : > { %v1776_v59 = vadd.f32 %v1775_v57, %v1687_v36  ;;  %v1600_v1 = vadd.f32 %v1599_v54, %v1511_v53 }
 0x2ec   : > { %v5055_v35 = vpack.c.bf16 %v1600_v1, %v1598_v44 }
 0x2ef   : > { %v1688_v10 = vpop.f32.mrf.mxu2  ;;  %v2019_v32 = vpop.f32.mrf.mxu0 }
 0x2f0   : > { %v1689_v42 = vadd.f32 %v1688_v10, %v4868_v9  ;;  %v1777_v14 = vpop.f32.mrf.mxu3  ;;  %v2020_v61 = vadd.f32 %v2019_v32, %v5057_v5  ;;  %v2108_v17 = vpop.f32.mrf.mxu1  ;;  %v3892_v9 = vld [vmem:[#allocation14 + $0x24] sm:$0xf] }
 0x2f1   : > { %v3679_v56 = vor.u32 %v3892_v9, %v3676_v50 }
 0x2f2   : > { %v1778_v26 = vadd.f32 %v1777_v14, %v1689_v42  ;;  %v2109_v19 = vadd.f32 %v2108_v17, %v2020_v61  ;;  %2058 = vmatmul.bf16.gmra.mxu0 %v4971_v29 }
 0x2f3   : > { %2147 = vmatmul.bf16.gmra.mxu1 %v4976_v55  ;;  %2843 = vmatpush.bf16.msrb.mxu2 %v3679_v56 }
 0x2f4   : > { %v5062_v0 = vpack.c.bf16 %v1778_v26, %v1776_v59  ;;  %2236 = vmatmul.bf16.gmra.mxu2 %v4971_v29  ;;  %v2366_v31 = vmax.f32 %v2109_v19, 0.0 }
 0x2f5   : > { %2325 = vmatmul.bf16.gmra.mxu3 %v4976_v55 }
 0x2f7   : > { %v2197_v25 = vpop.f32.mrf.mxu2  ;;  %v2021_v60 = vpop.f32.mrf.mxu0 }
 0x2f8   : > { %v2198_v27 = vadd.f32 %v2197_v25, %v5066_v21  ;;  %v2286_v7 = vpop.f32.mrf.mxu3  ;;  %v2022_v2 = vadd.f32 %v2021_v60, %v5057_v5  ;;  %v2110_v8 = vpop.f32.mrf.mxu1  ;;  %v3890_v25 = vld [vmem:[#allocation14 + $0x14] sm:$0xf]  ;;  %v3732_v60 = vld [vmem:[#allocation14 + $0x98] sm:$0xf0] }
 0x2fa   : > { %v2287_v29 = vadd.f32 %v2286_v7, %v2198_v27  ;;  %v2111_v30 = vadd.f32 %v2110_v8, %v2022_v2  ;;  %v3671_v27 = vor.u32 %v3890_v25, %v3668_v16  ;;  %v3906_v7 = vld [vmem:[#allocation14 + $0x94] sm:$0xf] }
 0x2fc   : > { %v2368_v55 = vmax.f32 %v2111_v30, 0.0  ;;  %v2367_v18 = vmax.f32 %v2287_v29, 0.0  ;;  %v3735_v29 = vor.u32 %v3906_v7, %v3732_v60  ;;  %2844 = vmatpush.bf16.msrb.mxu2 %v3671_v27 }
 0x2fe   : > { %v5071_v34 = vpack.c.bf16 %v2368_v55, %v2366_v31  ;;  %2933 = vmatpush.bf16.msrb.mxu3 %v3735_v29  ;;  %v3660_v29 = vld [vmem:[#allocation14 + $0x8] sm:$0xf0] }
 0x2ff   : > { %v2199_v47 = vpop.f32.mrf.mxu2  ;;  %v2024_v11 = vpop.f32.mrf.mxu0 }
 0x300   : > { %v2200_v38 = vadd.f32 %v2199_v47, %v5066_v21  ;;  %v2288_v52 = vpop.f32.mrf.mxu3  ;;  %v2025_v41 = vadd.f32 %v2024_v11, %v5057_v5  ;;  %v2113_v58 = vpop.f32.mrf.mxu1  ;;  %v3891_v47 = vld [vmem:[#allocation14 + $0x14] sm:$0xf0] }
 0x301   : > { %v3667_v6 = vor.u32 %v3891_v47, %v3666_v3 }
 0x302   : > { %v2289_v28 = vadd.f32 %v2288_v52, %v2200_v38  ;;  %v2114_v44 = vadd.f32 %v2113_v58, %v2025_v41  ;;  %2063 = vmatmul.bf16.gmra.mxu0 %v4983_v13  ;;  %v3730_v38 = vld [vmem:[#allocation14 + $0x90] sm:$0xf]  ;;  %v3907_v52 = vld [vmem:[#allocation14 + $0x94] sm:$0xf0] }
 0x303   : > { %2152 = vmatmul.bf16.gmra.mxu1 %v4988_v39  ;;  %v3731_v41 = vor.u32 %v3907_v52, %v3730_v38  ;;  %2666 = vmatpush.bf16.msrb.mxu0 %v3667_v6  ;;  %v3658_v52 = vld [vmem:[#allocation14] sm:$0xf] }
 0x304   : > { %v2369_v36 = vmax.f32 %v2289_v28, 0.0  ;;  %2241 = vmatmul.bf16.gmra.mxu2 %v4983_v13  ;;  %v2370_v14 = vmax.f32 %v2114_v44, 0.0 }
 0x305   : > { %2330 = vmatmul.bf16.gmra.mxu3 %v4988_v39  ;;  %2755 = vmatpush.bf16.msrb.mxu1 %v3731_v41 }
 0x306   : > { %v5079_v57 = vpack.c.bf16 %v2369_v36, %v2367_v18 }
 0x307   : > { %v2202_v48 = vpop.f32.mrf.mxu2  ;;  %v2026_v59 = vpop.f32.mrf.mxu0 }
 0x308   : > { %v2203_v53 = vadd.f32 %v2202_v48, %v5066_v21  ;;  %v2291_v54 = vpop.f32.mrf.mxu3  ;;  %v2027_v62 = vadd.f32 %v2026_v59, %v5057_v5  ;;  %v2115_v1 = vpop.f32.mrf.mxu1 }
 0x30a   : > { %v2292_v10 = vadd.f32 %v2291_v54, %v2203_v53  ;;  %v2116_v42 = vadd.f32 %v2115_v1, %v2027_v62 }
 0x30c   : > { %v2372_v32 = vmax.f32 %v2116_v42, 0.0  ;;  %v2371_v12 = vmax.f32 %v2292_v10, 0.0 }
 0x30e   : > { %v5083_v17 = vpack.c.bf16 %v2372_v32, %v2370_v14 }
 0x30f   : > { %v2204_v61 = vpop.f32.mrf.mxu2  ;;  %v2029_v26 = vpop.f32.mrf.mxu0 }
 0x310   : > { %v2205_v13 = vadd.f32 %v2204_v61, %v5066_v21  ;;  %v2293_v39 = vpop.f32.mrf.mxu3  ;;  %v2030_v19 = vadd.f32 %v2029_v26, %v5057_v5  ;;  %v2118_v9 = vpop.f32.mrf.mxu1 }
 0x312   : > { %v2294_v50 = vadd.f32 %v2293_v39, %v2205_v13  ;;  %v2119_v56 = vadd.f32 %v2118_v9, %v2030_v19  ;;  %2068 = vmatmul.bf16.gmra.mxu0 %v4995_v37 }
 0x313   : > { %2157 = vmatmul.bf16.gmra.mxu1 %v5000_v49 }
 0x314   : > { %v2373_v23 = vmax.f32 %v2294_v50, 0.0  ;;  %2246 = vmatmul.bf16.gmra.mxu2 %v4995_v37  ;;  %v2374_v24 = vmax.f32 %v2119_v56, 0.0 }
 0x315   : > { %2335 = vmatmul.bf16.gmra.mxu3 %v5000_v49 }
 0x316   : > { %v5091_v2 = vpack.c.bf16 %v2373_v23, %v2371_v12 }
 0x317   : > { %v2207_v8 = vpop.f32.mrf.mxu2  ;;  %v2031_v55 = vpop.f32.mrf.mxu0 }
 0x318   : > { %v2208_v30 = vadd.f32 %v2207_v8, %v5066_v21  ;;  %v2296_v31 = vpop.f32.mrf.mxu3  ;;  %v2032_v40 = vadd.f32 %v2031_v55, %v5057_v5  ;;  %v2120_v63 = vpop.f32.mrf.mxu1  ;;  %v3888_v8 = vld [vmem:[#allocation14 + $0x4] sm:$0xf]  ;;  %v3724_v55 = vld [vmem:[#allocation14 + $0x88] sm:$0xf0] }
 0x31a   : > { %v2297_v37 = vadd.f32 %v2296_v31, %v2208_v30  ;;  %v2121_v49 = vadd.f32 %v2120_v63, %v2032_v40  ;;  %v3663_v30 = vor.u32 %v3888_v8, %v3660_v29  ;;  %v3904_v31 = vld [vmem:[#allocation14 + $0x84] sm:$0xf] }
 0x31c   : > { %v2376_v46 = vmax.f32 %v2121_v49, 0.0  ;;  %v2375_v59 = vmax.f32 %v2297_v37, 0.0  ;;  %v3727_v37 = vor.u32 %v3904_v31, %v3724_v55  ;;  %2845 = vmatpush.bf16.msrb.mxu2 %v3663_v30 }
 0x31e   : > { %v5095_v58 = vpack.c.bf16 %v2376_v46, %v2374_v24  ;;  %2934 = vmatpush.bf16.msrb.mxu3 %v3727_v37 }
 0x31f   : > { %v2209_v11 = vpop.f32.mrf.mxu2  ;;  %v2034_v18 = vpop.f32.mrf.mxu0 }
 0x320   : > { %v2210_v28 = vadd.f32 %v2209_v11, %v5066_v21  ;;  %v2298_v44 = vpop.f32.mrf.mxu3  ;;  %v2035_v36 = vadd.f32 %v2034_v18, %v5057_v5  ;;  %v2123_v48 = vpop.f32.mrf.mxu1  ;;  %v3889_v11 = vld [vmem:[#allocation14 + $0x4] sm:$0xf0] }
 0x321   : > { %v3659_v41 = vor.u32 %v3889_v11, %v3658_v52 }
 0x322   : > { %v2299_v53 = vadd.f32 %v2298_v44, %v2210_v28  ;;  %v2124_v54 = vadd.f32 %v2123_v48, %v2035_v36  ;;  %2073 = vmatmul.bf16.gmra.mxu0 %v5007_v45  ;;  %v3722_v28 = vld [vmem:[#allocation14 + $0x80] sm:$0xf]  ;;  %v3905_v44 = vld [vmem:[#allocation14 + $0x84] sm:$0xf0] }
 0x323   : > { %2162 = vmatmul.bf16.gmra.mxu1 %v5012_v15  ;;  %v3723_v36 = vor.u32 %v3905_v44, %v3722_v28  ;;  %2667 = vmatpush.bf16.msrb.mxu0 %v3659_v41 }
 0x324   : > { %v2377_v62 = vmax.f32 %v2299_v53, 0.0  ;;  %2251 = vmatmul.bf16.gmra.mxu2 %v5007_v45  ;;  %v2378_v19 = vmax.f32 %v2124_v54, 0.0 }
 0x325   : > { %2340 = vmatmul.bf16.gmra.mxu3 %v5012_v15  ;;  %2756 = vmatpush.bf16.msrb.mxu1 %v3723_v36 }
 0x326   : > { %v5103_v1 = vpack.c.bf16 %v2377_v62, %v2375_v59 }
 0x327   : > { %v2212_v10 = vpop.f32.mrf.mxu2  ;;  %v2036_v32 = vpop.f32.mrf.mxu0 }
 0x328   : > { %v2213_v42 = vadd.f32 %v2212_v10, %v5066_v21  ;;  %v2301_v14 = vpop.f32.mrf.mxu3  ;;  %v2037_v61 = vadd.f32 %v2036_v32, %v5057_v5  ;;  %v2125_v13 = vpop.f32.mrf.mxu1 }
 0x32a   : > { %v2302_v39 = vadd.f32 %v2301_v14, %v2213_v42  ;;  %v2126_v26 = vadd.f32 %v2125_v13, %v2037_v61 }
 0x32c   : > { %v2380_v9 = vmax.f32 %v2126_v26, 0.0  ;;  %v2379_v7 = vmax.f32 %v2302_v39, 0.0 }
 0x32e   : > { %v5107_v56 = vpack.c.bf16 %v2380_v9, %v2378_v19 }
 0x32f   : > { %v2214_v50 = vpop.f32.mrf.mxu2  ;;  %v2039_v12 = vpop.f32.mrf.mxu0 }
 0x330   : > { %v2215_v45 = vadd.f32 %v2214_v50, %v5066_v21  ;;  %v2303_v15 = vpop.f32.mrf.mxu3  ;;  %v2040_v23 = vadd.f32 %v2039_v12, %v5057_v5  ;;  %v2128_v25 = vpop.f32.mrf.mxu1 }
 0x332   : > { %v2304_v16 = vadd.f32 %v2303_v15, %v2215_v45  ;;  %v2129_v27 = vadd.f32 %v2128_v25, %v2040_v23  ;;  %2078 = vmatmul.bf16.gmra.mxu0 %v5019_v22 }
 0x333   : > { %2167 = vmatmul.bf16.gmra.mxu1 %v5024_v43 }
 0x334   : > { %v2381_v60 = vmax.f32 %v2304_v16, 0.0  ;;  %2256 = vmatmul.bf16.gmra.mxu2 %v5019_v22  ;;  %v2382_v6 = vmax.f32 %v2129_v27, 0.0 }
 0x335   : > { %2345 = vmatmul.bf16.gmra.mxu3 %v5024_v43 }
 0x336   : > { %v5115_v40 = vpack.c.bf16 %v2381_v60, %v2379_v7 }
 0x337   : > { %v2217_v63 = vpop.f32.mrf.mxu2  ;;  %v2041_v46 = vpop.f32.mrf.mxu0 }
 0x338   : > { %v2218_v49 = vadd.f32 %v2217_v63, %v5066_v21  ;;  %v2306_v24 = vpop.f32.mrf.mxu3  ;;  %v2042_v3 = vadd.f32 %v2041_v46, %v5057_v5  ;;  %v2130_v47 = vpop.f32.mrf.mxu1 }
 0x33a   : > { %v2307_v22 = vadd.f32 %v2306_v24, %v2218_v49  ;;  %v2131_v43 = vadd.f32 %v2130_v47, %v2042_v3 }
 0x33c   : > { %v2384_v38 = vmax.f32 %v2131_v43, 0.0  ;;  %v2383_v32 = vmax.f32 %v2307_v22, 0.0 }
 0x33e   : > { %v5119_v48 = vpack.c.bf16 %v2384_v38, %v2382_v6 }
 0x33f   : > { %v2219_v18 = vpop.f32.mrf.mxu2  ;;  %v2044_v59 = vpop.f32.mrf.mxu0 }
 0x340   : > { %v2220_v53 = vadd.f32 %v2219_v18, %v5066_v21  ;;  %v2308_v54 = vpop.f32.mrf.mxu3  ;;  %v2045_v62 = vadd.f32 %v2044_v59, %v5057_v5  ;;  %v2133_v10 = vpop.f32.mrf.mxu1 }
 0x342   : > { %v2309_v42 = vadd.f32 %v2308_v54, %v2220_v53  ;;  %v2134_v14 = vadd.f32 %v2133_v10, %v2045_v62  ;;  %2083 = vmatmul.bf16.gmra.mxu0 %v5031_v4 }
 0x343   : > { %2172 = vmatmul.bf16.gmra.mxu1 %v5036_v20 }
 0x344   : > { %v2385_v61 = vmax.f32 %v2309_v42, 0.0  ;;  %2261 = vmatmul.bf16.gmra.mxu2 %v5031_v4  ;;  %v2386_v23 = vmax.f32 %v2134_v14, 0.0 }
 0x345   : > { %2350 = vmatmul.bf16.gmra.mxu3 %v5036_v20 }
 0x346   : > { %v5127_v13 = vpack.c.bf16 %v2385_v61, %v2383_v32 }
 0x347   : > { %v2222_v39 = vpop.f32.mrf.mxu2  ;;  %v2046_v9 = vpop.f32.mrf.mxu0 }
 0x348   : > { %v2223_v26 = vadd.f32 %v2222_v39, %v5066_v21  ;;  %v2311_v19 = vpop.f32.mrf.mxu3  ;;  %v2047_v50 = vadd.f32 %v2046_v9, %v5057_v5  ;;  %v2135_v45 = vpop.f32.mrf.mxu1 }
 0x34a   : > { %v2312_v15 = vadd.f32 %v2311_v19, %v2223_v26  ;;  %v2136_v12 = vadd.f32 %v2135_v45, %v2047_v50 }
 0x34c   : > { %v2388_v25 = vmax.f32 %v2136_v12, 0.0  ;;  %v2387_v31 = vmax.f32 %v2312_v15, 0.0 }
 0x34e   : > { %v5131_v27 = vpack.c.bf16 %v2388_v25, %v2386_v23 }
 0x34f   : > { %v2224_v16 = vpop.f32.mrf.mxu2  ;;  %v2049_v7 = vpop.f32.mrf.mxu0 }
 0x350   : > { %v2225_v4 = vadd.f32 %v2224_v16, %v5066_v21  ;;  %v2313_v20 = vpop.f32.mrf.mxu3  ;;  %v2050_v60 = vadd.f32 %v2049_v7, %v5057_v5  ;;  %v2138_v8 = vpop.f32.mrf.mxu1 }
 0x352   : > { %v2314_v29 = vadd.f32 %v2313_v20, %v2225_v4  ;;  %v2139_v30 = vadd.f32 %v2138_v8, %v2050_v60  ;;  %2088 = vmatmul.bf16.gmra.mxu0 %v5043_v33 }
 0x353   : > { %2177 = vmatmul.bf16.gmra.mxu1 %v5048_v51 }
 0x354   : > { %v2389_v55 = vmax.f32 %v2314_v29, 0.0  ;;  %2266 = vmatmul.bf16.gmra.mxu2 %v5043_v33  ;;  %v2390_v6 = vmax.f32 %v2139_v30, 0.0 }
 0x355   : > { %2355 = vmatmul.bf16.gmra.mxu3 %v5048_v51 }
 0x356   : > { %v5139_v63 = vpack.c.bf16 %v2389_v55, %v2387_v31 }
 0x357   : > { %v2227_v37 = vpop.f32.mrf.mxu2  ;;  %v2051_v46 = vpop.f32.mrf.mxu0 }
 0x358   : > { %v2228_v49 = vadd.f32 %v2227_v37, %v5066_v21  ;;  %v2316_v24 = vpop.f32.mrf.mxu3  ;;  %v2052_v3 = vadd.f32 %v2051_v46, %v5057_v5  ;;  %v2140_v47 = vpop.f32.mrf.mxu1 }
 0x35a   : > { %v2317_v22 = vadd.f32 %v2316_v24, %v2228_v49  ;;  %v2141_v43 = vadd.f32 %v2140_v47, %v2052_v3 }
 0x35c   : > { %v2392_v38 = vmax.f32 %v2141_v43, 0.0  ;;  %v2391_v53 = vmax.f32 %v2317_v22, 0.0 }
 0x35e   : > { %v5143_v11 = vpack.c.bf16 %v2392_v38, %v2390_v6 }
 0x35f   : > { %v2229_v52 = vpop.f32.mrf.mxu2  ;;  %v2054_v41 = vpop.f32.mrf.mxu0 }
 0x360   : > { %v2230_v33 = vadd.f32 %v2229_v52, %v5066_v21  ;;  %v2318_v51 = vpop.f32.mrf.mxu3  ;;  %v2055_v28 = vadd.f32 %v2054_v41, %v5057_v5  ;;  %v2143_v44 = vpop.f32.mrf.mxu1 }
 0x362   : > { %v2319_v18 = vadd.f32 %v2318_v51, %v2230_v33  ;;  %v2144_v36 = vadd.f32 %v2143_v44, %v2055_v28  ;;  %2093 = vmatmul.bf16.gmra.mxu0 %v5055_v35 }
 0x363   : > { %2182 = vmatmul.bf16.gmra.mxu1 %v5062_v0 }
 0x364   : > { %v2393_v54 = vmax.f32 %v2319_v18, 0.0  ;;  %2271 = vmatmul.bf16.gmra.mxu2 %v5055_v35  ;;  %v2394_v19 = vmax.f32 %v2144_v36, 0.0 }
 0x365   : > { %2360 = vmatmul.bf16.gmra.mxu3 %v5062_v0 }
 0x366   : > { %v5151_v59 = vpack.c.bf16 %v2393_v54, %v2391_v53 }
 0x367   : > { %v2232_v62 = vpop.f32.mrf.mxu2  ;;  %v2056_v14 = vpop.f32.mrf.mxu0 }
 0x368   : > { %v2233_v10 = vadd.f32 %v2232_v62, %v5066_v21  ;;  %v2321_v42 = vpop.f32.mrf.mxu3  ;;  %v2057_v32 = vadd.f32 %v2056_v14, %v5057_v5  ;;  %v2145_v61 = vpop.f32.mrf.mxu1 }
 0x36a   : > { %v2322_v39 = vadd.f32 %v2321_v42, %v2233_v10  ;;  %v2146_v26 = vadd.f32 %v2145_v61, %v2057_v32 }
 0x36c   : > { %v2396_v9 = vmax.f32 %v2146_v26, 0.0  ;;  %v2395_v4 = vmax.f32 %v2322_v39, 0.0 }
 0x36e   : > { %v5155_v45 = vpack.c.bf16 %v2396_v9, %v2394_v19 }
 0x36f   : > { %v2234_v50 = vpop.f32.mrf.mxu2  ;;  %v2059_v15 = vpop.f32.mrf.mxu0 }
 0x370   : > { %v2235_v35 = vadd.f32 %v2234_v50, %v5066_v21  ;;  %v2323_v0 = vpop.f32.mrf.mxu3  ;;  %v2060_v12 = vadd.f32 %v2059_v15, %v5057_v5  ;;  %v2148_v23 = vpop.f32.mrf.mxu1 }
 0x372   : > { %v2324_v25 = vadd.f32 %v2323_v0, %v2235_v35  ;;  %v2149_v16 = vadd.f32 %v2148_v23, %v2060_v12  ;;  %2668 = vmatmul.bf16.vlgmr.msrb.gmra.mxu0 %v5071_v34 }
 0x373   : > { %2757 = vmatmul.bf16.vlgmr.msrb.gmra.mxu1 %v5079_v57 }
 0x374   : > { %v2397_v20 = vmax.f32 %v2324_v25, 0.0  ;;  %2846 = vmatmul.bf16.vlgmr.msrb.gmra.mxu2 %v5071_v34  ;;  %v2398_v24 = vmax.f32 %v2149_v16, 0.0 }
 0x375   : > { %2935 = vmatmul.bf16.vlgmr.msrb.gmra.mxu3 %v5079_v57 }
 0x376   : > { %v5163_v7 = vpack.c.bf16 %v2397_v20, %v2395_v4 }
 0x377   : > { %v2237_v60 = vpop.f32.mrf.mxu2  ;;  %v2061_v30 = vpop.f32.mrf.mxu0 }
 0x378   : > { %v2238_v8 = vadd.f32 %v2237_v60, %v5066_v21  ;;  %v2326_v29 = vpop.f32.mrf.mxu3  ;;  %v2062_v31 = vadd.f32 %v2061_v30, %v5057_v5  ;;  %v2150_v55 = vpop.f32.mrf.mxu1 }
 0x37a   : > { %v2327_v37 = vadd.f32 %v2326_v29, %v2238_v8  ;;  %v2151_v49 = vadd.f32 %v2150_v55, %v2062_v31 }
 0x37c   : > { %v2400_v46 = vmax.f32 %v2151_v49, 0.0  ;;  %v2399_v33 = vmax.f32 %v2327_v37, 0.0 }
 0x37e   : > { %v5167_v47 = vpack.c.bf16 %v2400_v46, %v2398_v24 }
 0x37f   : > { %v2239_v3 = vpop.f32.mrf.mxu2  ;;  %v2064_v22 = vpop.f32.mrf.mxu0 }
 0x380   : > { %v2240_v34 = vadd.f32 %v2239_v3, %v5066_v21  ;;  %v2328_v57 = vpop.f32.mrf.mxu3  ;;  %v2065_v43 = vadd.f32 %v2064_v22, %v5057_v5  ;;  %v2153_v6 = vpop.f32.mrf.mxu1 }
 0x382   : > { %v2329_v38 = vadd.f32 %v2328_v57, %v2240_v34  ;;  %v2154_v52 = vadd.f32 %v2153_v6, %v2065_v43  ;;  %2673 = vmatmul.bf16.gmra.mxu0 %v5083_v17 }
 0x383   : > { %2762 = vmatmul.bf16.gmra.mxu1 %v5091_v2 }
 0x384   : > { %v2401_v51 = vmax.f32 %v2329_v38, 0.0  ;;  %2851 = vmatmul.bf16.gmra.mxu2 %v5083_v17  ;;  %v2402_v42 = vmax.f32 %v2154_v52, 0.0 }
 0x385   : > { %2940 = vmatmul.bf16.gmra.mxu3 %v5091_v2 }
 0x386   : > { %v5175_v41 = vpack.c.bf16 %v2401_v51, %v2399_v33 }
 0x387   : > { %v2242_v28 = vpop.f32.mrf.mxu2  ;;  %v2066_v36 = vpop.f32.mrf.mxu0 }
 0x388   : > { %v2243_v44 = vadd.f32 %v2242_v28, %v5066_v21  ;;  %v2331_v18 = vpop.f32.mrf.mxu3  ;;  %v2067_v53 = vadd.f32 %v2066_v36, %v5057_v5  ;;  %v2155_v54 = vpop.f32.mrf.mxu1 }
 0x38a   : > { %v2332_v62 = vadd.f32 %v2331_v18, %v2243_v44  ;;  %v2156_v10 = vadd.f32 %v2155_v54, %v2067_v53 }
 0x38c   : > { %v2404_v14 = vmax.f32 %v2156_v10, 0.0  ;;  %v2403_v35 = vmax.f32 %v2332_v62, 0.0 }
 0x38e   : > { %v5179_v61 = vpack.c.bf16 %v2404_v14, %v2402_v42 }
 0x38f   : > { %v2244_v32 = vpop.f32.mrf.mxu2  ;;  %v2069_v39 = vpop.f32.mrf.mxu0 }
 0x390   : > { %v2245_v17 = vadd.f32 %v2244_v32, %v5066_v21  ;;  %v2333_v2 = vpop.f32.mrf.mxu3  ;;  %v2070_v26 = vadd.f32 %v2069_v39, %v5057_v5  ;;  %v2158_v19 = vpop.f32.mrf.mxu1 }
 0x392   : > { %v2334_v9 = vadd.f32 %v2333_v2, %v2245_v17  ;;  %v2159_v50 = vadd.f32 %v2158_v19, %v2070_v26  ;;  %2678 = vmatmul.bf16.gmra.mxu0 %v5095_v58 }
 0x393   : > { %2767 = vmatmul.bf16.gmra.mxu1 %v5103_v1 }
 0x394   : > { %v2405_v0 = vmax.f32 %v2334_v9, 0.0  ;;  %2856 = vmatmul.bf16.gmra.mxu2 %v5095_v58  ;;  %v2406_v29 = vmax.f32 %v2159_v50, 0.0 }
 0x395   : > { %2945 = vmatmul.bf16.gmra.mxu3 %v5103_v1 }
 0x396   : > { %v5187_v15 = vpack.c.bf16 %v2405_v0, %v2403_v35 }
 0x397   : > { %v2247_v12 = vpop.f32.mrf.mxu2  ;;  %v2071_v16 = vpop.f32.mrf.mxu0 }
 0x398   : > { %v2248_v23 = vadd.f32 %v2247_v12, %v5066_v21  ;;  %v2336_v25 = vpop.f32.mrf.mxu3  ;;  %v2072_v4 = vadd.f32 %v2071_v16, %v5057_v5  ;;  %v2160_v20 = vpop.f32.mrf.mxu1 }
 0x39a   : > { %v2337_v60 = vadd.f32 %v2336_v25, %v2248_v23  ;;  %v2161_v8 = vadd.f32 %v2160_v20, %v2072_v4 }
 0x39c   : > { %v2408_v30 = vmax.f32 %v2161_v8, 0.0  ;;  %v2407_v34 = vmax.f32 %v2337_v60, 0.0 }
 0x39e   : > { %v5191_v55 = vpack.c.bf16 %v2408_v30, %v2406_v29 }
 0x39f   : > { %v2249_v31 = vpop.f32.mrf.mxu2  ;;  %v2074_v37 = vpop.f32.mrf.mxu0 }
 0x3a0   : > { %v2250_v58 = vadd.f32 %v2249_v31, %v5066_v21  ;;  %v2338_v1 = vpop.f32.mrf.mxu3  ;;  %v2075_v49 = vadd.f32 %v2074_v37, %v5057_v5  ;;  %v2163_v24 = vpop.f32.mrf.mxu1 }
 0x3a2   : > { %v2339_v46 = vadd.f32 %v2338_v1, %v2250_v58  ;;  %v2164_v3 = vadd.f32 %v2163_v24, %v2075_v49  ;;  %2683 = vmatmul.bf16.gmra.mxu0 %v5107_v56 }
 0x3a3   : > { %2772 = vmatmul.bf16.gmra.mxu1 %v5115_v40 }
 0x3a4   : > { %v2409_v57 = vmax.f32 %v2339_v46, 0.0  ;;  %2861 = vmatmul.bf16.gmra.mxu2 %v5107_v56  ;;  %v2410_v18 = vmax.f32 %v2164_v3, 0.0 }
 0x3a5   : > { %2950 = vmatmul.bf16.gmra.mxu3 %v5115_v40 }
 0x3a6   : > { %v5199_v22 = vpack.c.bf16 %v2409_v57, %v2407_v34 }
 0x3a7   : > { %v2252_v43 = vpop.f32.mrf.mxu2  ;;  %v2076_v52 = vpop.f32.mrf.mxu0 }
 0x3a8   : > { %v2253_v6 = vadd.f32 %v2252_v43, %v5066_v21  ;;  %v2341_v38 = vpop.f32.mrf.mxu3  ;;  %v2077_v33 = vadd.f32 %v2076_v52, %v5057_v5  ;;  %v2165_v51 = vpop.f32.mrf.mxu1 }
 0x3aa   : > { %v2342_v28 = vadd.f32 %v2341_v38, %v2253_v6  ;;  %v2166_v44 = vadd.f32 %v2165_v51, %v2077_v33 }
 0x3ac   : > { %v2412_v36 = vmax.f32 %v2166_v44, 0.0  ;;  %v2411_v17 = vmax.f32 %v2342_v28, 0.0 }
 0x3ae   : > { %v5203_v54 = vpack.c.bf16 %v2412_v36, %v2410_v18 }
 0x3af   : > { %v2254_v53 = vpop.f32.mrf.mxu2  ;;  %v2079_v62 = vpop.f32.mrf.mxu0 }
 0x3b0   : > { %v2255_v56 = vadd.f32 %v2254_v53, %v5066_v21  ;;  %v2343_v40 = vpop.f32.mrf.mxu3  ;;  %v2080_v10 = vadd.f32 %v2079_v62, %v5057_v5  ;;  %v2168_v42 = vpop.f32.mrf.mxu1 }
 0x3b2   : > { %v2344_v14 = vadd.f32 %v2343_v40, %v2255_v56  ;;  %v2169_v32 = vadd.f32 %v2168_v42, %v2080_v10  ;;  %2688 = vmatmul.bf16.gmra.mxu0 %v5119_v48 }
 0x3b3   : > { %2777 = vmatmul.bf16.gmra.mxu1 %v5127_v13 }
 0x3b4   : > { %v2413_v2 = vmax.f32 %v2344_v14, 0.0  ;;  %2866 = vmatmul.bf16.gmra.mxu2 %v5119_v48  ;;  %v2414_v25 = vmax.f32 %v2169_v32, 0.0 }
 0x3b5   : > { %2955 = vmatmul.bf16.gmra.mxu3 %v5127_v13 }
 0x3b6   : > { %v5211_v39 = vpack.c.bf16 %v2413_v2, %v2411_v17 }
 0x3b7   : > { %v2257_v26 = vpop.f32.mrf.mxu2  ;;  %v2081_v50 = vpop.f32.mrf.mxu0 }
 0x3b8   : > { %v2258_v19 = vadd.f32 %v2257_v26, %v5066_v21  ;;  %v2346_v9 = vpop.f32.mrf.mxu3  ;;  %v2082_v35 = vadd.f32 %v2081_v50, %v5057_v5  ;;  %v2170_v0 = vpop.f32.mrf.mxu1 }
 0x3ba   : > { %v2347_v12 = vadd.f32 %v2346_v9, %v2258_v19  ;;  %v2171_v23 = vadd.f32 %v2170_v0, %v2082_v35 }
 0x3bc   : > { %v2416_v16 = vmax.f32 %v2171_v23, 0.0  ;;  %v2415_v58 = vmax.f32 %v2347_v12, 0.0 }
 0x3be   : > { %v5215_v20 = vpack.c.bf16 %v2416_v16, %v2414_v25 }
 0x3bf   : > { %v2259_v4 = vpop.f32.mrf.mxu2  ;;  %v2084_v60 = vpop.f32.mrf.mxu0 }
 0x3c0   : > { %v2260_v48 = vadd.f32 %v2259_v4, %v5066_v21  ;;  %v2348_v13 = vpop.f32.mrf.mxu3  ;;  %v2085_v8 = vadd.f32 %v2084_v60, %v5057_v5  ;;  %v2173_v29 = vpop.f32.mrf.mxu1 }
 0x3c2   : > { %v2349_v30 = vadd.f32 %v2348_v13, %v2260_v48  ;;  %v2174_v31 = vadd.f32 %v2173_v29, %v2085_v8  ;;  %2693 = vmatmul.bf16.gmra.mxu0 %v5131_v27 }
 0x3c3   : > { %2782 = vmatmul.bf16.gmra.mxu1 %v5139_v63 }
 0x3c4   : > { %v2417_v1 = vmax.f32 %v2349_v30, 0.0  ;;  %2871 = vmatmul.bf16.gmra.mxu2 %v5131_v27  ;;  %v2418_v38 = vmax.f32 %v2174_v31, 0.0 }
 0x3c5   : > { %2960 = vmatmul.bf16.gmra.mxu3 %v5139_v63 }
 0x3c6   : > { %v5223_v37 = vpack.c.bf16 %v2417_v1, %v2415_v58 }
 0x3c7   : > { %v2262_v49 = vpop.f32.mrf.mxu2  ;;  %v2086_v3 = vpop.f32.mrf.mxu0 }
 0x3c8   : > { %v2263_v24 = vadd.f32 %v2262_v49, %v5066_v21  ;;  %v2351_v46 = vpop.f32.mrf.mxu3  ;;  %v2087_v34 = vadd.f32 %v2086_v3, %v5057_v5  ;;  %v2175_v57 = vpop.f32.mrf.mxu1 }
 0x3ca   : > { %v2352_v43 = vadd.f32 %v2351_v46, %v2263_v24  ;;  %v2176_v6 = vadd.f32 %v2175_v57, %v2087_v34  ;;  %v2494_v57 = vld [vmem:[#allocation16] sm:$0x3] }
 0x3cc   : > { %v2420_v52 = vmax.f32 %v2176_v6, 0.0  ;;  %v2419_v56 = vmax.f32 %v2352_v43, 0.0 }
 0x3ce   : > { %v5227_v51 = vpack.c.bf16 %v2420_v52, %v2418_v38 }
 0x3cf   : > { %v2264_v33 = vpop.f32.mrf.mxu2  ;;  %v2089_v28 = vpop.f32.mrf.mxu0 }
 0x3d0   : > { %v2265_v27 = vadd.f32 %v2264_v33, %v5066_v21  ;;  %v2353_v63 = vpop.f32.mrf.mxu3  ;;  %v2090_v44 = vadd.f32 %v2089_v28, %v5057_v5  ;;  %v2178_v18 = vpop.f32.mrf.mxu1  ;;  %v5254_v33 = vperm.slane %v2494_v57, 0 }
 0x3d2   : > { %v2354_v36 = vadd.f32 %v2353_v63, %v2265_v27  ;;  %v2179_v53 = vadd.f32 %v2178_v18, %v2090_v44  ;;  %2698 = vmatmul.bf16.gmra.mxu0 %v5143_v11  ;;  %v5259_v63 = vperm.slane %v2494_v57, 1 }
 0x3d3   : > { %2787 = vmatmul.bf16.gmra.mxu1 %v5151_v59 }
 0x3d4   : > { %v2421_v40 = vmax.f32 %v2354_v36, 0.0  ;;  %2876 = vmatmul.bf16.gmra.mxu2 %v5143_v11  ;;  %v2422_v9 = vmax.f32 %v2179_v53, 0.0 }
 0x3d5   : > { %2965 = vmatmul.bf16.gmra.mxu3 %v5151_v59 }
 0x3d6   : > { %v5235_v62 = vpack.c.bf16 %v2421_v40, %v2419_v56 }
 0x3d7   : > { %v2267_v10 = vpop.f32.mrf.mxu2  ;;  %v2091_v32 = vpop.f32.mrf.mxu0 }
 0x3d8   : > { %v2268_v42 = vadd.f32 %v2267_v10, %v5066_v21  ;;  %v2356_v14 = vpop.f32.mrf.mxu3  ;;  %v2092_v17 = vadd.f32 %v2091_v32, %v5057_v5  ;;  %v2180_v2 = vpop.f32.mrf.mxu1 }
 0x3da   : > { %v2357_v26 = vadd.f32 %v2356_v14, %v2268_v42  ;;  %v2181_v19 = vadd.f32 %v2180_v2, %v2092_v17 }
 0x3dc   : > { %v2424_v50 = vmax.f32 %v2181_v19, 0.0  ;;  %v2423_v48 = vmax.f32 %v2357_v26, 0.0 }
 0x3de   : > { %v5239_v0 = vpack.c.bf16 %v2424_v50, %v2422_v9 }
 0x3df   : > { %v2269_v35 = vpop.f32.mrf.mxu2  ;;  %v2094_v12 = vpop.f32.mrf.mxu0 }
 0x3e0   : > { %v2270_v11 = vadd.f32 %v2269_v35, %v5066_v21  ;;  %v2358_v59 = vpop.f32.mrf.mxu3  ;;  %v2095_v23 = vadd.f32 %v2094_v12, %v5057_v5  ;;  %v2183_v25 = vpop.f32.mrf.mxu1 }
 0x3e2   : > { %v2359_v16 = vadd.f32 %v2358_v59, %v2270_v11  ;;  %v2184_v4 = vadd.f32 %v2183_v25, %v2095_v23  ;;  %2703 = vmatmul.bf16.gmra.mxu0 %v5155_v45 }
 0x3e3   : > { %2792 = vmatmul.bf16.gmra.mxu1 %v5163_v7 }
 0x3e4   : > { %v2425_v13 = vmax.f32 %v2359_v16, 0.0  ;;  %2881 = vmatmul.bf16.gmra.mxu2 %v5155_v45  ;;  %v2426_v46 = vmax.f32 %v2184_v4, 0.0 }
 0x3e5   : > { %2970 = vmatmul.bf16.gmra.mxu3 %v5163_v7 }
 0x3e6   : > { %v5247_v60 = vpack.c.bf16 %v2425_v13, %v2423_v48 }
 0x3e7   : > { %v2272_v8 = vpop.f32.mrf.mxu2  ;;  %v2096_v31 = vpop.f32.mrf.mxu0 }
 0x3e8   : > { %v2273_v29 = vadd.f32 %v2272_v8, %v5066_v21  ;;  %v2361_v30 = vpop.f32.mrf.mxu3  ;;  %v2097_v58 = vadd.f32 %v2096_v31, %v5057_v5  ;;  %v2185_v1 = vpop.f32.mrf.mxu1 }
 0x3ea   : > { %v2362_v49 = vadd.f32 %v2361_v30, %v2273_v29  ;;  %v2186_v24 = vadd.f32 %v2185_v1, %v2097_v58 }
 0x3ec   : > { %v2428_v3 = vmax.f32 %v2186_v24, 0.0  ;;  %v2427_v5 = vmax.f32 %v2362_v49, 0.0 }
 0x3ee   : > { %v5251_v43 = vpack.c.bf16 %v2428_v3, %v2426_v46 }
 0x3ef   : > { %v2274_v34 = vpop.f32.mrf.mxu2  ;;  %v2669_v6 = vpop.f32.mrf.mxu0 }
 0x3f0   : > { %v2275_v45 = vadd.f32 %v2274_v34, %v5066_v21  ;;  %v2363_v7 = vpop.f32.mrf.mxu3  ;;  %v2758_v38 = vpop.f32.mrf.mxu1  ;;  %v2670_v21 = vadd.f32 %v2669_v6, %v5254_v33 }
 0x3f2   : > { %v2364_v52 = vadd.f32 %v2363_v7, %v2275_v45  ;;  %2708 = vmatmul.bf16.gmra.mxu0 %v5167_v47  ;;  %v2759_v40 = vadd.f32 %v2758_v38, %v2670_v21 }
 0x3f3   : > { %2797 = vmatmul.bf16.gmra.mxu1 %v5175_v41 }
 0x3f4   : > { %v2429_v27 = vmax.f32 %v2364_v52, 0.0  ;;  %2886 = vmatmul.bf16.gmra.mxu2 %v5167_v47 }
 0x3f5   : > { %2975 = vmatmul.bf16.gmra.mxu3 %v5175_v41 }
 0x3f6   : > { %v5263_v28 = vpack.c.bf16 %v2429_v27, %v2427_v5 }
 0x3f7   : > { %v2847_v44 = vpop.f32.mrf.mxu2  ;;  %v2671_v53 = vpop.f32.mrf.mxu0 }
 0x3f8   : > { %v2848_v18 = vadd.f32 %v2847_v44, %v5259_v63  ;;  %v2936_v36 = vpop.f32.mrf.mxu3  ;;  %v2760_v56 = vpop.f32.mrf.mxu1  ;;  %v2672_v47 = vadd.f32 %v2671_v53, %v5254_v33 }
 0x3fa   : > { %v2937_v10 = vadd.f32 %v2936_v36, %v2848_v18  ;;  %v2761_v26 = vadd.f32 %v2760_v56, %v2672_v47 }
 0x3fc   : > { %v3016_v42 = vpack.c.bf16 %v2937_v10, %v2759_v40 }
 0x3fe   : > { %3048 = vst [vmem:[%s5267_s23] sm:$0xff] %v3016_v42 }
 0x3ff   : > { %v2849_v41 = vpop.f32.mrf.mxu2  ;;  %v2674_v17 = vpop.f32.mrf.mxu0 }
 0x400   : > { %v2850_v14 = vadd.f32 %v2849_v41, %v5259_v63  ;;  %v2938_v32 = vpop.f32.mrf.mxu3  ;;  %v2763_v2 = vpop.f32.mrf.mxu1  ;;  %v2675_v50 = vadd.f32 %v2674_v17, %v5254_v33 }
 0x402   : > { %v2939_v19 = vadd.f32 %v2938_v32, %v2850_v14  ;;  %2713 = vmatmul.bf16.gmra.mxu0 %v5179_v61  ;;  %v2764_v25 = vadd.f32 %v2763_v2, %v2675_v50 }
 0x403   : > { %2802 = vmatmul.bf16.gmra.mxu1 %v5187_v15 }
 0x404   : > { %v3017_v9 = vpack.c.bf16 %v2939_v19, %v2761_v26  ;;  %2891 = vmatmul.bf16.gmra.mxu2 %v5179_v61 }
 0x405   : > { %2980 = vmatmul.bf16.gmra.mxu3 %v5187_v15 }
 0x406   : > { %3049 = vst [vmem:[%s5267_s23 + $0x8] sm:$0xff] %v3017_v9 }
 0x407   : > { %v2852_v35 = vpop.f32.mrf.mxu2  ;;  %v2676_v12 = vpop.f32.mrf.mxu0 }
 0x408   : > { %v2853_v11 = vadd.f32 %v2852_v35, %v5259_v63  ;;  %v2941_v59 = vpop.f32.mrf.mxu3  ;;  %v2765_v23 = vpop.f32.mrf.mxu1  ;;  %v2677_v48 = vadd.f32 %v2676_v12, %v5254_v33 }
 0x40a   : > { %v2942_v16 = vadd.f32 %v2941_v59, %v2853_v11  ;;  %v2766_v30 = vadd.f32 %v2765_v23, %v2677_v48 }
 0x40c   : > { %v3018_v4 = vpack.c.bf16 %v2942_v16, %v2764_v25 }
 0x40e   : > { %3050 = vst [vmem:[%s5267_s23 + $0x10] sm:$0xff] %v3018_v4 }
 0x40f   : > { %v2854_v13 = vpop.f32.mrf.mxu2  ;;  %v2679_v8 = vpop.f32.mrf.mxu0 }
 0x410   : > { %v2855_v61 = vadd.f32 %v2854_v13, %v5259_v63  ;;  %v2943_v15 = vpop.f32.mrf.mxu3  ;;  %v2768_v29 = vpop.f32.mrf.mxu1  ;;  %v2680_v1 = vadd.f32 %v2679_v8, %v5254_v33 }
 0x412   : > { %v2944_v31 = vadd.f32 %v2943_v15, %v2855_v61  ;;  %2718 = vmatmul.bf16.gmra.mxu0 %v5191_v55  ;;  %v2769_v57 = vadd.f32 %v2768_v29, %v2680_v1 }
 0x413   : > { %2807 = vmatmul.bf16.gmra.mxu1 %v5199_v22 }
 0x414   : > { %v3019_v58 = vpack.c.bf16 %v2944_v31, %v2766_v30  ;;  %2896 = vmatmul.bf16.gmra.mxu2 %v5191_v55 }
 0x415   : > { %2985 = vmatmul.bf16.gmra.mxu3 %v5199_v22 }
 0x416   : > { %3051 = vst [vmem:[%s5267_s23 + $0x18] sm:$0xff] %v3019_v58 }
 0x417   : > { %v2857_v49 = vpop.f32.mrf.mxu2  ;;  %v2681_v3 = vpop.f32.mrf.mxu0 }
 0x418   : > { %v2858_v24 = vadd.f32 %v2857_v49, %v5259_v63  ;;  %v2946_v46 = vpop.f32.mrf.mxu3  ;;  %v2770_v34 = vpop.f32.mrf.mxu1  ;;  %v2682_v6 = vadd.f32 %v2681_v3, %v5254_v33 }
 0x41a   : > { %v2947_v45 = vadd.f32 %v2946_v46, %v2858_v24  ;;  %v2771_v27 = vadd.f32 %v2770_v34, %v2682_v6 }
 0x41c   : > { %v3020_v7 = vpack.c.bf16 %v2947_v45, %v2769_v57 }
 0x41e   : > { %3052 = vst [vmem:[%s5267_s23 + $0x20] sm:$0xff] %v3020_v7 }
 0x41f   : > { %v2859_v38 = vpop.f32.mrf.mxu2  ;;  %v2684_v52 = vpop.f32.mrf.mxu0 }
 0x420   : > { %v2860_v55 = vadd.f32 %v2859_v38, %v5259_v63  ;;  %v2948_v22 = vpop.f32.mrf.mxu3  ;;  %v2773_v5 = vpop.f32.mrf.mxu1  ;;  %v2685_v18 = vadd.f32 %v2684_v52, %v5254_v33 }
 0x422   : > { %v2949_v21 = vadd.f32 %v2948_v22, %v2860_v55  ;;  %2723 = vmatmul.bf16.gmra.mxu0 %v5203_v54  ;;  %v2774_v42 = vadd.f32 %v2773_v5, %v2685_v18 }
 0x423   : > { %2812 = vmatmul.bf16.gmra.mxu1 %v5211_v39 }
 0x424   : > { %v3021_v44 = vpack.c.bf16 %v2949_v21, %v2771_v27  ;;  %2901 = vmatmul.bf16.gmra.mxu2 %v5203_v54 }
 0x425   : > { %2990 = vmatmul.bf16.gmra.mxu3 %v5211_v39 }
 0x426   : > { %3053 = vst [vmem:[%s5267_s23 + $0x28] sm:$0xff] %v3021_v44 }
 0x427   : > { %v2862_v36 = vpop.f32.mrf.mxu2  ;;  %v2686_v40 = vpop.f32.mrf.mxu0 }
 0x428   : > { %v2863_v53 = vadd.f32 %v2862_v36, %v5259_v63  ;;  %v2951_v56 = vpop.f32.mrf.mxu3  ;;  %v2775_v10 = vpop.f32.mrf.mxu1  ;;  %v2687_v14 = vadd.f32 %v2686_v40, %v5254_v33 }
 0x42a   : > { %v2952_v47 = vadd.f32 %v2951_v56, %v2863_v53  ;;  %v2776_v26 = vadd.f32 %v2775_v10, %v2687_v14 }
 0x42c   : > { %v3022_v41 = vpack.c.bf16 %v2952_v47, %v2774_v42 }
 0x42e   : > { %3054 = vst [vmem:[%s5267_s23 + $0x30] sm:$0xff] %v3022_v41 }
 0x42f   : > { %v2864_v32 = vpop.f32.mrf.mxu2  ;;  %v2689_v17 = vpop.f32.mrf.mxu0 }
 0x430   : > { %v2865_v54 = vadd.f32 %v2864_v32, %v5259_v63  ;;  %v2953_v39 = vpop.f32.mrf.mxu3  ;;  %v2778_v2 = vpop.f32.mrf.mxu1  ;;  %v2690_v50 = vadd.f32 %v2689_v17, %v5254_v33 }
 0x432   : > { %v2954_v19 = vadd.f32 %v2953_v39, %v2865_v54  ;;  %2728 = vmatmul.bf16.gmra.mxu0 %v5215_v20  ;;  %v2779_v25 = vadd.f32 %v2778_v2, %v2690_v50 }
 0x433   : > { %2817 = vmatmul.bf16.gmra.mxu1 %v5223_v37 }
 0x434   : > { %v3023_v9 = vpack.c.bf16 %v2954_v19, %v2776_v26  ;;  %2906 = vmatmul.bf16.gmra.mxu2 %v5215_v20 }
 0x435   : > { %2995 = vmatmul.bf16.gmra.mxu3 %v5223_v37 }
 0x436   : > { %3055 = vst [vmem:[%s5267_s23 + $0x38] sm:$0xff] %v3023_v9 }
 0x437   : > { %v2867_v35 = vpop.f32.mrf.mxu2  ;;  %v2691_v12 = vpop.f32.mrf.mxu0 }
 0x438   : > { %v2868_v11 = vadd.f32 %v2867_v35, %v5259_v63  ;;  %v2956_v59 = vpop.f32.mrf.mxu3  ;;  %v2780_v23 = vpop.f32.mrf.mxu1  ;;  %v2692_v48 = vadd.f32 %v2691_v12, %v5254_v33 }
 0x43a   : > { %v2957_v16 = vadd.f32 %v2956_v59, %v2868_v11  ;;  %v2781_v8 = vadd.f32 %v2780_v23, %v2692_v48 }
 0x43c   : > { %v3024_v4 = vpack.c.bf16 %v2957_v16, %v2779_v25 }
 0x43e   : > { %3056 = vst [vmem:[%s5267_s23 + $0x40] sm:$0xff] %v3024_v4 }
 0x43f   : > { %v2869_v13 = vpop.f32.mrf.mxu2  ;;  %v2694_v61 = vpop.f32.mrf.mxu0 }
 0x440   : > { %v2870_v20 = vadd.f32 %v2869_v13, %v5259_v63  ;;  %v2958_v37 = vpop.f32.mrf.mxu3  ;;  %v2783_v15 = vpop.f32.mrf.mxu1  ;;  %v2695_v31 = vadd.f32 %v2694_v61, %v5254_v33 }
 0x442   : > { %v2959_v29 = vadd.f32 %v2958_v37, %v2870_v20  ;;  %2733 = vmatmul.bf16.gmra.mxu0 %v5227_v51  ;;  %v2784_v3 = vadd.f32 %v2783_v15, %v2695_v31 }
 0x443   : > { %2822 = vmatmul.bf16.gmra.mxu1 %v5235_v62 }
 0x444   : > { %v3025_v30 = vpack.c.bf16 %v2959_v29, %v2781_v8  ;;  %2911 = vmatmul.bf16.gmra.mxu2 %v5227_v51 }
 0x445   : > { %3000 = vmatmul.bf16.gmra.mxu3 %v5235_v62 }
 0x446   : > { %3057 = vst [vmem:[%s5267_s23 + $0x48] sm:$0xff] %v3025_v30 }
 0x447   : > { %v2872_v58 = vpop.f32.mrf.mxu2  ;;  %v2696_v24 = vpop.f32.mrf.mxu0 }
 0x448   : > { %v2873_v1 = vadd.f32 %v2872_v58, %v5259_v63  ;;  %v2961_v49 = vpop.f32.mrf.mxu3  ;;  %v2785_v46 = vpop.f32.mrf.mxu1  ;;  %v2697_v45 = vadd.f32 %v2696_v24, %v5254_v33 }
 0x44a   : > { %v2962_v34 = vadd.f32 %v2961_v49, %v2873_v1  ;;  %v2786_v55 = vadd.f32 %v2785_v46, %v2697_v45 }
 0x44c   : > { %v3026_v57 = vpack.c.bf16 %v2962_v34, %v2784_v3 }
 0x44e   : > { %3058 = vst [vmem:[%s5267_s23 + $0x50] sm:$0xff] %v3026_v57 }
 0x44f   : > { %v2874_v7 = vpop.f32.mrf.mxu2  ;;  %v2699_v6 = vpop.f32.mrf.mxu0 }
 0x450   : > { %v2875_v51 = vadd.f32 %v2874_v7, %v5259_v63  ;;  %v2963_v62 = vpop.f32.mrf.mxu3  ;;  %v2788_v38 = vpop.f32.mrf.mxu1  ;;  %v2700_v5 = vadd.f32 %v2699_v6, %v5254_v33 }
 0x452   : > { %v2964_v22 = vadd.f32 %v2963_v62, %v2875_v51  ;;  %2738 = vmatmul.bf16.gmra.mxu0 %v5239_v0  ;;  %v2789_v53 = vadd.f32 %v2788_v38, %v2700_v5 }
 0x453   : > { %2827 = vmatmul.bf16.gmra.mxu1 %v5247_v60 }
 0x454   : > { %v3027_v52 = vpack.c.bf16 %v2964_v22, %v2786_v55  ;;  %2916 = vmatmul.bf16.gmra.mxu2 %v5239_v0 }
 0x455   : > { %3005 = vmatmul.bf16.gmra.mxu3 %v5247_v60 }
 0x456   : > { %3059 = vst [vmem:[%s5267_s23 + $0x58] sm:$0xff] %v3027_v52 }
 0x457   : > { %v2877_v27 = vpop.f32.mrf.mxu2  ;;  %v2701_v18 = vpop.f32.mrf.mxu0 }
 0x458   : > { %v2878_v21 = vadd.f32 %v2877_v27, %v5259_v63  ;;  %v2966_v44 = vpop.f32.mrf.mxu3  ;;  %v2790_v36 = vpop.f32.mrf.mxu1  ;;  %v2702_v10 = vadd.f32 %v2701_v18, %v5254_v33 }
 0x45a   : > { %v2967_v56 = vadd.f32 %v2966_v44, %v2878_v21  ;;  %v2791_v14 = vadd.f32 %v2790_v36, %v2702_v10 }
 0x45c   : > { %v3028_v40 = vpack.c.bf16 %v2967_v56, %v2789_v53 }
 0x45e   : > { %3060 = vst [vmem:[%s5267_s23 + $0x60] sm:$0xff] %v3028_v40 }
 0x45f   : > { %v2879_v42 = vpop.f32.mrf.mxu2  ;;  %v2704_v47 = vpop.f32.mrf.mxu0 }
 0x460   : > { %v2880_v0 = vadd.f32 %v2879_v42, %v5259_v63  ;;  %v2968_v60 = vpop.f32.mrf.mxu3  ;;  %v2793_v41 = vpop.f32.mrf.mxu1  ;;  %v2705_v39 = vadd.f32 %v2704_v47, %v5254_v33 }
 0x462   : > { %v2969_v32 = vadd.f32 %v2968_v60, %v2880_v0  ;;  %2743 = vmatmul.bf16.gmra.mxu0 %v5251_v43  ;;  %v2794_v50 = vadd.f32 %v2793_v41, %v2705_v39 }
 0x463   : > { %2832 = vmatmul.bf16.gmra.mxu1 %v5263_v28 }
 0x464   : > { %v3029_v54 = vpack.c.bf16 %v2969_v32, %v2791_v14  ;;  %2921 = vmatmul.bf16.gmra.mxu2 %v5251_v43 }
 0x465   : > { %3010 = vmatmul.bf16.gmra.mxu3 %v5263_v28 }
 0x466   : > { %3061 = vst [vmem:[%s5267_s23 + $0x68] sm:$0xff] %v3029_v54 }
 0x467   : > { %v2882_v17 = vpop.f32.mrf.mxu2  ;;  %v2706_v19 = vpop.f32.mrf.mxu0 }
 0x468   : > { %v2883_v2 = vadd.f32 %v2882_v17, %v5259_v63  ;;  %v2971_v26 = vpop.f32.mrf.mxu3  ;;  %v2795_v9 = vpop.f32.mrf.mxu1  ;;  %v2707_v59 = vadd.f32 %v2706_v19, %v5254_v33 }
 0x46a   : > { %v2972_v35 = vadd.f32 %v2971_v26, %v2883_v2  ;;  %v2796_v16 = vadd.f32 %v2795_v9, %v2707_v59 }
 0x46c   : > { %v3030_v11 = vpack.c.bf16 %v2972_v35, %v2794_v50 }
 0x46e   : > { %3062 = vst [vmem:[%s5267_s23 + $0x70] sm:$0xff] %v3030_v11 }
 0x46f   : > { %v2884_v12 = vpop.f32.mrf.mxu2  ;;  %v2709_v23 = vpop.f32.mrf.mxu0 }
 0x470   : > { %v2885_v43 = vadd.f32 %v2884_v12, %v5259_v63  ;;  %v2973_v28 = vpop.f32.mrf.mxu3  ;;  %v2798_v25 = vpop.f32.mrf.mxu1  ;;  %v2710_v13 = vadd.f32 %v2709_v23, %v5254_v33 }
 0x472   : > { %v2974_v4 = vadd.f32 %v2973_v28, %v2885_v43  ;;  %v2799_v29 = vadd.f32 %v2798_v25, %v2710_v13 }
 0x474   : > { %v3031_v48 = vpack.c.bf16 %v2974_v4, %v2796_v16 }
 0x476   : > { %3063 = vst [vmem:[%s5267_s23 + $0x78] sm:$0xff] %v3031_v48 }
 0x477   : > { %v2887_v20 = vpop.f32.mrf.mxu2  ;;  %v2711_v15 = vpop.f32.mrf.mxu0 }
 0x478   : > { %v2888_v37 = vadd.f32 %v2887_v20, %v5259_v63  ;;  %v2976_v61 = vpop.f32.mrf.mxu3  ;;  %v2800_v8 = vpop.f32.mrf.mxu1  ;;  %v2712_v58 = vadd.f32 %v2711_v15, %v5254_v33 }
 0x47a   : > { %v2977_v30 = vadd.f32 %v2976_v61, %v2888_v37  ;;  %v2801_v34 = vadd.f32 %v2800_v8, %v2712_v58 }
 0x47c   : > { %v3032_v31 = vpack.c.bf16 %v2977_v30, %v2799_v29 }
 0x47e   : > { %3064 = vst [vmem:[%s5267_s23 + $0x80] sm:$0xff] %v3032_v31 }
 0x47f   : > { %v2889_v1 = vpop.f32.mrf.mxu2  ;;  %v2714_v46 = vpop.f32.mrf.mxu0 }
 0x480   : > { %v2890_v49 = vadd.f32 %v2889_v1, %v5259_v63  ;;  %v2978_v24 = vpop.f32.mrf.mxu3  ;;  %v2803_v3 = vpop.f32.mrf.mxu1  ;;  %v2715_v7 = vadd.f32 %v2714_v46, %v5254_v33 }
 0x482   : > { %v2979_v57 = vadd.f32 %v2978_v24, %v2890_v49  ;;  %v2804_v22 = vadd.f32 %v2803_v3, %v2715_v7 }
 0x484   : > { %v3033_v45 = vpack.c.bf16 %v2979_v57, %v2801_v34 }
 0x486   : > { %3065 = vst [vmem:[%s5267_s23 + $0x88] sm:$0xff] %v3033_v45 }
 0x487   : > { %v2892_v51 = vpop.f32.mrf.mxu2  ;;  %v2716_v38 = vpop.f32.mrf.mxu0 }
 0x488   : > { %v2893_v62 = vadd.f32 %v2892_v51, %v5259_v63  ;;  %v2981_v6 = vpop.f32.mrf.mxu3  ;;  %v2805_v55 = vpop.f32.mrf.mxu1  ;;  %v2717_v27 = vadd.f32 %v2716_v38, %v5254_v33 }
 0x48a   : > { %v2982_v52 = vadd.f32 %v2981_v6, %v2893_v62  ;;  %v2806_v56 = vadd.f32 %v2805_v55, %v2717_v27 }
 0x48c   : > { %v3034_v5 = vpack.c.bf16 %v2982_v52, %v2804_v22 }
 0x48e   : > { %3066 = vst [vmem:[%s5267_s23 + $0x90] sm:$0xff] %v3034_v5 }
 0x48f   : > { %v2894_v21 = vpop.f32.mrf.mxu2  ;;  %v2719_v36 = vpop.f32.mrf.mxu0 }
 0x490   : > { %v2895_v44 = vadd.f32 %v2894_v21, %v5259_v63  ;;  %v2983_v18 = vpop.f32.mrf.mxu3  ;;  %v2808_v53 = vpop.f32.mrf.mxu1  ;;  %v2720_v42 = vadd.f32 %v2719_v36, %v5254_v33 }
 0x492   : > { %v2984_v40 = vadd.f32 %v2983_v18, %v2895_v44  ;;  %v2809_v32 = vadd.f32 %v2808_v53, %v2720_v42 }
 0x494   : > { %v3035_v10 = vpack.c.bf16 %v2984_v40, %v2806_v56 }
 0x496   : > { %3067 = vst [vmem:[%s5267_s23 + $0x98] sm:$0xff] %v3035_v10 }
 0x497   : > { %v2897_v0 = vpop.f32.mrf.mxu2  ;;  %v2721_v41 = vpop.f32.mrf.mxu0 }
 0x498   : > { %v2898_v60 = vadd.f32 %v2897_v0, %v5259_v63  ;;  %v2986_v47 = vpop.f32.mrf.mxu3  ;;  %v2810_v14 = vpop.f32.mrf.mxu1  ;;  %v2722_v17 = vadd.f32 %v2721_v41, %v5254_v33 }
 0x49a   : > { %v2987_v54 = vadd.f32 %v2986_v47, %v2898_v60  ;;  %v2811_v35 = vadd.f32 %v2810_v14, %v2722_v17 }
 0x49c   : > { %v3036_v39 = vpack.c.bf16 %v2987_v54, %v2809_v32 }
 0x49e   : > { %3068 = vst [vmem:[%s5267_s23 + $0xa0] sm:$0xff] %v3036_v39 }
 0x49f   : > { %v2899_v2 = vpop.f32.mrf.mxu2  ;;  %v2724_v9 = vpop.f32.mrf.mxu0 }
 0x4a0   : > { %v2900_v26 = vadd.f32 %v2899_v2, %v5259_v63  ;;  %v2988_v19 = vpop.f32.mrf.mxu3  ;;  %v2813_v50 = vpop.f32.mrf.mxu1  ;;  %v2725_v12 = vadd.f32 %v2724_v9, %v5254_v33 }
 0x4a2   : > { %v2989_v11 = vadd.f32 %v2988_v19, %v2900_v26  ;;  %v2814_v4 = vadd.f32 %v2813_v50, %v2725_v12 }
 0x4a4   : > { %v3037_v59 = vpack.c.bf16 %v2989_v11, %v2811_v35 }
 0x4a6   : > { %3069 = vst [vmem:[%s5267_s23 + $0xa8] sm:$0xff] %v3037_v59 }
 0x4a7   : > { %v2902_v43 = vpop.f32.mrf.mxu2  ;;  %v2726_v25 = vpop.f32.mrf.mxu0 }
 0x4a8   : > { %v2903_v28 = vadd.f32 %v2902_v43, %v5259_v63  ;;  %v2991_v23 = vpop.f32.mrf.mxu3  ;;  %v2815_v16 = vpop.f32.mrf.mxu1  ;;  %v2727_v20 = vadd.f32 %v2726_v25, %v5254_v33 }
 0x4aa   : > { %v2992_v48 = vadd.f32 %v2991_v23, %v2903_v28  ;;  %v2816_v30 = vadd.f32 %v2815_v16, %v2727_v20 }
 0x4ac   : > { %v3038_v13 = vpack.c.bf16 %v2992_v48, %v2814_v4 }
 0x4ae   : > { %3070 = vst [vmem:[%s5267_s23 + $0xb0] sm:$0xff] %v3038_v13 }
 0x4af   : > { %v2904_v37 = vpop.f32.mrf.mxu2  ;;  %v2729_v8 = vpop.f32.mrf.mxu0 }
 0x4b0   : > { %v2905_v61 = vadd.f32 %v2904_v37, %v5259_v63  ;;  %v2993_v15 = vpop.f32.mrf.mxu3  ;;  %v2818_v29 = vpop.f32.mrf.mxu1  ;;  %v2730_v1 = vadd.f32 %v2729_v8, %v5254_v33 }
 0x4b2   : > { %v2994_v31 = vadd.f32 %v2993_v15, %v2905_v61  ;;  %v2819_v57 = vadd.f32 %v2818_v29, %v2730_v1 }
 0x4b4   : > { %v3039_v58 = vpack.c.bf16 %v2994_v31, %v2816_v30 }
 0x4b6   : > { %3071 = vst [vmem:[%s5267_s23 + $0xb8] sm:$0xff] %v3039_v58 }
 0x4b7   : > { %v2907_v49 = vpop.f32.mrf.mxu2  ;;  %v2731_v3 = vpop.f32.mrf.mxu0 }
 0x4b8   : > { %v2908_v24 = vadd.f32 %v2907_v49, %v5259_v63  ;;  %v2996_v46 = vpop.f32.mrf.mxu3  ;;  %v2820_v34 = vpop.f32.mrf.mxu1  ;;  %v2732_v51 = vadd.f32 %v2731_v3, %v5254_v33 }
 0x4ba   : > { %v2997_v45 = vadd.f32 %v2996_v46, %v2908_v24  ;;  %v2821_v52 = vadd.f32 %v2820_v34, %v2732_v51 }
 0x4bc   : > { %v3040_v7 = vpack.c.bf16 %v2997_v45, %v2819_v57 }
 0x4be   : > { %3072 = vst [vmem:[%s5267_s23 + $0xc0] sm:$0xff] %v3040_v7 }
 0x4bf   : > { %v2909_v62 = vpop.f32.mrf.mxu2  ;;  %v2734_v55 = vpop.f32.mrf.mxu0 }
 0x4c0   : > { %v2910_v6 = vadd.f32 %v2909_v62, %v5259_v63  ;;  %v2998_v38 = vpop.f32.mrf.mxu3  ;;  %v2823_v22 = vpop.f32.mrf.mxu1  ;;  %v2735_v21 = vadd.f32 %v2734_v55, %v5254_v33 }
 0x4c2   : > { %v2999_v5 = vadd.f32 %v2998_v38, %v2910_v6  ;;  %v2824_v40 = vadd.f32 %v2823_v22, %v2735_v21 }
 0x4c4   : > { %v3041_v27 = vpack.c.bf16 %v2999_v5, %v2821_v52 }
 0x4c6   : > { %3073 = vst [vmem:[%s5267_s23 + $0xc8] sm:$0xff] %v3041_v27 }
 0x4c7   : > { %v2912_v44 = vpop.f32.mrf.mxu2  ;;  %v2736_v53 = vpop.f32.mrf.mxu0 }
 0x4c8   : > { %v2913_v18 = vadd.f32 %v2912_v44, %v5259_v63  ;;  %v3001_v36 = vpop.f32.mrf.mxu3  ;;  %v2825_v56 = vpop.f32.mrf.mxu1  ;;  %v2737_v0 = vadd.f32 %v2736_v53, %v5254_v33 }
 0x4ca   : > { %v3002_v10 = vadd.f32 %v3001_v36, %v2913_v18  ;;  %v2826_v32 = vadd.f32 %v2825_v56, %v2737_v0 }
 0x4cc   : > { %v3042_v42 = vpack.c.bf16 %v3002_v10, %v2824_v40 }
 0x4ce   : > { %3074 = vst [vmem:[%s5267_s23 + $0xd0] sm:$0xff] %v3042_v42 }
 0x4cf   : > { %v2914_v60 = vpop.f32.mrf.mxu2  ;;  %v2739_v14 = vpop.f32.mrf.mxu0 }
 0x4d0   : > { %v2915_v47 = vadd.f32 %v2914_v60, %v5259_v63  ;;  %v3003_v41 = vpop.f32.mrf.mxu3  ;;  %v2828_v39 = vpop.f32.mrf.mxu1  ;;  %v2740_v2 = vadd.f32 %v2739_v14, %v5254_v33 }
 0x4d2   : > { %v3004_v54 = vadd.f32 %v3003_v41, %v2915_v47  ;;  %v2829_v35 = vadd.f32 %v2828_v39, %v2740_v2 }
 0x4d4   : > { %v3043_v17 = vpack.c.bf16 %v3004_v54, %v2826_v32 }
 0x4d6   : > { %3075 = vst [vmem:[%s5267_s23 + $0xd8] sm:$0xff] %v3043_v17 }
 0x4d7   : > { %v2917_v26 = vpop.f32.mrf.mxu2  ;;  %v2741_v50 = vpop.f32.mrf.mxu0 }
 0x4d8   : > { %v2918_v19 = vadd.f32 %v2917_v26, %v5259_v63  ;;  %v3006_v9 = vpop.f32.mrf.mxu3  ;;  %v2830_v12 = vpop.f32.mrf.mxu1  ;;  %v2742_v43 = vadd.f32 %v2741_v50, %v5254_v33 }
 0x4da   : > { %v3007_v11 = vadd.f32 %v3006_v9, %v2918_v19  ;;  %v2831_v4 = vadd.f32 %v2830_v12, %v2742_v43 }
 0x4dc   : > { %v3044_v59 = vpack.c.bf16 %v3007_v11, %v2829_v35 }
 0x4de   : > { %3076 = vst [vmem:[%s5267_s23 + $0xe0] sm:$0xff] %v3044_v59 }
 0x4df   : > { %v2919_v28 = vpop.f32.mrf.mxu2  ;;  %v2744_v16 = vpop.f32.mrf.mxu0 }
 0x4e0   : > { %v2920_v23 = vadd.f32 %v2919_v28, %v5259_v63  ;;  %v3008_v25 = vpop.f32.mrf.mxu3  ;;  %v2745_v20 = vadd.f32 %v2744_v16, %v5254_v33  ;;  %v2833_v37 = vpop.f32.mrf.mxu1 }
 0x4e2   : > { %v3009_v48 = vadd.f32 %v3008_v25, %v2920_v23  ;;  %v2834_v29 = vadd.f32 %v2833_v37, %v2745_v20 }
 0x4e4   : > { %v3045_v13 = vpack.c.bf16 %v3009_v48, %v2831_v4 }
 0x4e6   : > { %3077 = vst [vmem:[%s5267_s23 + $0xe8] sm:$0xff] %v3045_v13 }
 0x4e7   : > { %v2922_v61 = vpop.f32.mrf.mxu2  ;;  %v2746_v31 = vpop.f32.mrf.mxu0 }
 0x4e8   : > { %v2923_v15 = vadd.f32 %v2922_v61, %v5259_v63  ;;  %v3011_v8 = vpop.f32.mrf.mxu3  ;;  %v2747_v1 = vadd.f32 %v2746_v31, %v5254_v33  ;;  %v2835_v46 = vpop.f32.mrf.mxu1 }
 0x4ea   : > { %v3012_v30 = vadd.f32 %v3011_v8, %v2923_v15  ;;  %v2836_v34 = vadd.f32 %v2835_v46, %v2747_v1 }
 0x4ec   : > { %v3046_v58 = vpack.c.bf16 %v3012_v30, %v2834_v29 }
 0x4ee   : > { %3078 = vst [vmem:[%s5267_s23 + $0xf0] sm:$0xff] %v3046_v58 }
 0x4ef   : > { %v2924_v49 = vpop.f32.mrf.mxu2 }
 0x4f0   : > { %v2925_v24 = vadd.f32 %v2924_v49, %v5259_v63  ;;  %v3013_v3 = vpop.f32.mrf.mxu3 }
 0x4f2   : > { %v3014_v57 = vadd.f32 %v3013_v3, %v2925_v24 }
 0x4f4   : > { %v3047_v45 = vpack.c.bf16 %v3014_v57, %v2836_v34 }
 0x4f6   : > { %3079 = vst [vmem:[%s5267_s23 + $0xf8] sm:$0xff] %v3047_v45 }
 0x4f7   : > { %4352 = shalt.err (!%p4349_p8)
}
 0x4f8   : > { %s4421_s15 = smov 128   ;;  %s4422_s17 = smov 8  }
 0x4f9   : > { %3956 = dma.vmem_to_hbm [thread:$0]  (%p4579_p2), %s3095_s20, 4096, %s3097_s24, %s3081_s16, %s4421_s15, %s4421_s15, %s4422_s17  }
 0x4fa PF: > { %p4008_p9 = scmp.ge.s32.totalorder %s4407_s12, 2  ;;  %s3111_s23 = sand.u32 1, %s4395_s30  }
 0x4fb   : > { %s3112_s19 = scalar_lea.sflag [#allocation4], %s3111_s23 }
 0x4fc   : > { %p3988_p10 = pnand %p4008_p9, %p4583_p4 }
 0x4fe   : > { %p3989_p12 = pneg %p3988_p10 }
 0x500   : > { %4390 = dma.done.wait (%p3989_p12), %s3112_s19, 4096  }
 0x501   : > { %4392 = vsyncadd (%p3989_p12), %s3112_s19, 4294963200  ;;  %p26_p13 = scmp.ge.s32.totalorder %s4553_s28, 10   ;;  %s5449_s30 = smov %s4399_s10 }
 0x502   : > { %s5450_s10 = smov %s4403_s11  ;;  %s5451_s11 = smov %s4564_s1 }
 0x503   : > { %s5452_s12 = smov %s4553_s28  ;;  %28 = sbr.rel (!%p26_p13) target bundleno = 14 (0xe), region = 133 }
 0x508   :  { %3118 = vsyncpa [#allocation3], 1 }
 0x509   :  { %3120 = vsyncpa [#allocation3 + $0x1], 1 }
 0x50a   :  { %3121 = vsyncpa [#allocation6], 1 }
 0x50b   :  { %3122 = vsyncpa [#allocation9], 1 }
 0x50c   :  { %3123 = vsyncpa [#allocation12], 1 }
 0x50d   :  { %3124 = vsyncpa [#allocation15], 1 }
 0x50e   :  { %3125 = vsyncpa [#allocation4], 1 }
 0x50f   :  { %3127 = vsyncpa [#allocation4 + $0x1], 1 }

</bundles_post_ra>
